<compile_context>
chip_gen: v6e
topology: v6e:2x2x1
jax: 0.10.0
libtpu: 0.0.40
codegen_flags: <defaults>
</compile_context>

<pallas_src>
import numpy as np
import jax
import jax.numpy as jnp
from jax.experimental import pallas as pl
from jax.experimental.pallas import tpu as pltpu

_LANE = 128
_NEG_SLOPE = 0.2


def _disc_kernel(x_ref, w1_ref, b1_ref, w2_ref, b2_ref, w3_ref, b3_ref, o_ref):
    # One fused MLP pass for a (tb, D) f32 batch tile. Matmuls take bf16
    # operands on the MXU with f32 accumulation; bias-add / LeakyReLU in f32.
    x = x_ref[...].astype(jnp.bfloat16)                       # in-kernel cast (VPU)

    # Layer 1: (tb, 784) @ (784, 512) + (1, 512)
    h1 = jnp.dot(x, w1_ref[...], preferred_element_type=jnp.float32) + b1_ref[...]
    h1 = jnp.maximum(h1, _NEG_SLOPE * h1)                     # LeakyReLU(0.2)

    # Layer 2: (tb, 512) @ (512, 256) + (1, 256)
    h2 = jnp.dot(h1.astype(jnp.bfloat16), w2_ref[...],
                 preferred_element_type=jnp.float32) + b2_ref[...]
    h2 = jnp.maximum(h2, _NEG_SLOPE * h2)                     # LeakyReLU(0.2)

    # Layer 3: (tb, 256) @ (256, 128-padded) + (1, 128-padded); col 0 is real.
    out = jnp.dot(h2.astype(jnp.bfloat16), w3_ref[...],
                  preferred_element_type=jnp.float32) + b3_ref[...]

    # Compact the padded logits: XLU-transpose the (tb, 128) slab so the real
    # column becomes a lane-dense row, then store only that (1, tb) row.
    out_t = out.T                                             # (128, tb) f32
    o_ref[...] = out_t[:1, :][None]                           # (1, 1, tb)


def _round_up(n, m):
    return (n + m - 1) // m * m


def _pick_batch_tile(bp):
    """bp is the (128-multiple) padded batch. Prefer the largest tile that
    still yields >=4 grid steps (dual-TC v7x with pipelining), then >=2."""
    for min_steps in (4, 2):
        for tb in (1024, 512, 256, 128):
            if bp % tb == 0 and bp // tb >= min_steps:
                return tb
    return min(bp, 1024)


def prepare_params(params):
    """One-time conversion of f32 PyTorch-layout params into kernel layout:
    bf16 weights, f32 row-vector biases, final layer padded to 128 lanes."""
    w1, b1, w2, b2, w3, b3 = params
    H1, H2, No = w1.shape[1], w2.shape[1], w3.shape[1]
    w3p = jnp.pad(w3, ((0, 0), (0, _LANE - No)))
    b3p = jnp.pad(b3.reshape(1, No), ((0, 0), (0, _LANE - No)))
    return (
        w1.astype(jnp.bfloat16),
        b1.reshape(1, H1).astype(jnp.float32),
        w2.astype(jnp.bfloat16),
        b2.reshape(1, H2).astype(jnp.float32),
        w3p.astype(jnp.bfloat16),
        b3p.astype(jnp.float32),
    )


def discriminator_forward(img, prepared_params, *, batch_tile=None):
    """img: (B, C, H, W) float32. prepared_params: output of prepare_params.
    Returns validity logits: (B, 1) float32."""
    w1, b1, w2, b2, w3p, b3p = prepared_params
    B = img.shape[0]
    D = int(np.prod(img.shape[1:]))
    H1, H2 = w1.shape[1], w2.shape[1]
    Np = w3p.shape[1]
    assert w1.shape[0] == D and w2.shape[0] == H1 and w3p.shape[0] == H2
    assert Np == _LANE

    # Flat f32 view of the images (reshape is free); pad batch to a multiple
    # of 128 so every block and the in-kernel compaction transpose is aligned.
    x = img.reshape(B, D)
    Bp = _round_up(max(B, _LANE), _LANE)
    if Bp != B:
        x = jnp.pad(x, ((0, Bp - B), (0, 0)))

    tb = _pick_batch_tile(Bp) if batch_tile is None else int(batch_tile)
    assert tb % _LANE == 0 and Bp % tb == 0, \
        "batch_tile must be a multiple of 128 and divide the padded batch"
    grid_steps = Bp // tb

    flops = 2 * Bp * (D * H1 + H1 * H2 + H2 * 1)
    bytes_accessed = (Bp * D * 4                                    # x (f32)
                      + (D * H1 + H1 * H2 + H2 * Np) * 2            # bf16 weights
                      + (H1 + H2 + Np) * 4                          # f32 biases
                      + Bp * 4)                                     # compact output

    out = pl.pallas_call(
        _disc_kernel,
        out_shape=jax.ShapeDtypeStruct((grid_steps, 1, tb), jnp.float32),
        grid_spec=pltpu.PrefetchScalarGridSpec(
            num_scalar_prefetch=0,
            grid=(grid_steps,),
            in_specs=[
                pl.BlockSpec((tb, D), lambda i: (i, 0)),     # x tile (f32, batch-tiled)
                pl.BlockSpec((D, H1), lambda i: (0, 0)),     # w1 (resident)
                pl.BlockSpec((1, H1), lambda i: (0, 0)),     # b1
                pl.BlockSpec((H1, H2), lambda i: (0, 0)),    # w2
                pl.BlockSpec((1, H2), lambda i: (0, 0)),     # b2
                pl.BlockSpec((H2, Np), lambda i: (0, 0)),    # w3 (128-lane padded)
                pl.BlockSpec((1, Np), lambda i: (0, 0)),     # b3 (128-lane padded)
            ],
            out_specs=pl.BlockSpec((1, 1, tb), lambda i: (i, 0, 0)),  # compact logits
        ),
        compiler_params=pltpu.CompilerParams(
            dimension_semantics=("parallel",),
            vmem_limit_bytes=48 * 1024 * 1024,
        ),
        cost_estimate=pl.CostEstimate(
            flops=flops, transcendentals=0, bytes_accessed=bytes_accessed),
    )(x, w1, b1, w2, b2, w3p, b3p)

    # (grid_steps, 1, tb) -> (Bp, 1), drop batch padding. Reshape/slice are cheap.
    return out.reshape(Bp, 1)[:B]


def init_params(key, img_shape=(1, 28, 28)):
    """Deterministic synthetic init mimicking nn.Linear's U(-1/sqrt(fan_in), ...)."""
    D = int(np.prod(img_shape))
    dims = [(D, 512), (512, 256), (256, 1)]
    params = []
    for (fan_in, fan_out) in dims:
        key, kw, kb = jax.random.split(key, 3)
        bound = 1.0 / np.sqrt(fan_in)
        w = jax.random.uniform(kw, (fan_in, fan_out), jnp.float32, -bound, bound)
        b = jax.random.uniform(kb, (fan_out,), jnp.float32, -bound, bound)
        params += [w, b]
    return tuple(params)


def _reference_forward(img, params):
    """Pure-JAX f32 reference for a sanity check."""
    w1, b1, w2, b2, w3, b3 = params
    x = img.reshape(img.shape[0], -1)
    h = x @ w1 + b1
    h = jnp.where(h > 0, h, _NEG_SLOPE * h)
    h = h @ w2 + b2
    h = jnp.where(h > 0, h, _NEG_SLOPE * h)
    return h @ w3 + b3


if __name__ == "__main__":
    key = jax.random.PRNGKey(0)
    img_shape = (1, 28, 28)          # matches the module's default
    kp, kx = jax.random.split(key)
    params = init_params(kp, img_shape)
    prepared = prepare_params(params)   # one-time bf16/pad conversion

    fwd = jax.jit(lambda im: discriminator_forward(im, prepared))

    # Case 1: tiny batch (padded to one 128-row tile, single grid step).
    B = 8
    img = jax.random.normal(kx, (B,) + img_shape, dtype=jnp.float32)
    out = jax.block_until_ready(fwd(img))
    ref = _reference_forward(img, params)
    np.testing.assert_allclose(np.asarray(out), np.asarray(ref), rtol=3e-2, atol=3e-2)
    assert out.shape == (B, 1)

    # Case 2: multi-step batch-tiled grid (exercises the pipelined path).
    B2 = 256
    img2 = jax.random.normal(jax.random.PRNGKey(1), (B2,) + img_shape,
                             dtype=jnp.float32)
    out2 = jax.block_until_ready(fwd(img2))
    ref2 = _reference_forward(img2, params)
    np.testing.assert_allclose(np.asarray(out2), np.asarray(ref2),
                               rtol=3e-2, atol=3e-2)
    assert out2.shape == (B2, 1)

    print("KERNEL_OK")
</pallas_src>

<mosaic_0001>
module attributes {stable_mosaic.version = 11 : i64} {
  func.func @_disc_kernel(%arg0: i32, %arg1: memref<128x784xf32, #tpu.memory_space<vmem>>, %arg2: memref<784x512xbf16, #tpu.memory_space<vmem>>, %arg3: memref<1x512xf32, #tpu.memory_space<vmem>>, %arg4: memref<512x256xbf16, #tpu.memory_space<vmem>>, %arg5: memref<1x256xf32, #tpu.memory_space<vmem>>, %arg6: memref<256x128xbf16, #tpu.memory_space<vmem>>, %arg7: memref<1x128xf32, #tpu.memory_space<vmem>>, %arg8: memref<1x1x128xf32, #tpu.memory_space<vmem>>) attributes {dimension_semantics = [#tpu.dimension_semantics<parallel>], iteration_bounds = array<i64: 1>, scalar_prefetch = 0 : i64, scratch_operands = 0 : i64, tpu.core_type = #tpu.core_type<tc>, window_params = [{transform_indices = @transform_0, window_bounds = array<i64: 128, 784>}, {pipeline_mode = #tpu.pipeline_mode<synchronous>, transform_indices = @transform_1, window_bounds = array<i64: 784, 512>}, {pipeline_mode = #tpu.pipeline_mode<synchronous>, transform_indices = @transform_2, window_bounds = array<i64: 1, 512>}, {pipeline_mode = #tpu.pipeline_mode<synchronous>, transform_indices = @transform_3, window_bounds = array<i64: 512, 256>}, {pipeline_mode = #tpu.pipeline_mode<synchronous>, transform_indices = @transform_4, window_bounds = array<i64: 1, 256>}, {pipeline_mode = #tpu.pipeline_mode<synchronous>, transform_indices = @transform_5, window_bounds = array<i64: 256, 128>}, {pipeline_mode = #tpu.pipeline_mode<synchronous>, transform_indices = @transform_6, window_bounds = array<i64: 1, 128>}, {transform_indices = @transform_7, window_bounds = array<i64: 1, 1, 128>}]} {
    %c0 = arith.constant 0 : index
    %c0_0 = arith.constant 0 : index
    %0 = vector.load %arg1[%c0, %c0_0] : memref<128x784xf32, #tpu.memory_space<vmem>>, vector<128x784xf32>
    %1 = arith.truncf %0 : vector<128x784xf32> to vector<128x784xbf16>
    %c0_1 = arith.constant 0 : index
    %c0_2 = arith.constant 0 : index
    %2 = vector.load %arg2[%c0_1, %c0_2] : memref<784x512xbf16, #tpu.memory_space<vmem>>, vector<784x512xbf16>
    %cst = arith.constant dense<0.000000e+00> : vector<128x512xf32>
    %3 = tpu.matmul %1, %2, %cst {dimension_numbers = #tpu.dot_dimension_numbers<[1], [0], [0], [1], [0, 0, 1, 1], [], []>} : vector<128x784xbf16>, vector<784x512xbf16>, vector<128x512xf32> -> vector<128x512xf32>
    %c0_3 = arith.constant 0 : index
    %c0_4 = arith.constant 0 : index
    %4 = vector.load %arg3[%c0_3, %c0_4] : memref<1x512xf32, #tpu.memory_space<vmem>>, vector<1x512xf32>
    %5 = vector.broadcast %4 : vector<1x512xf32> to vector<128x512xf32>
    %6 = arith.addf %3, %5 : vector<128x512xf32>
    %cst_5 = arith.constant 2.000000e-01 : f32
    %7 = vector.broadcast %cst_5 : f32 to vector<128x512xf32>
    %8 = arith.mulf %7, %6 : vector<128x512xf32>
    %9 = arith.maximumf %6, %8 : vector<128x512xf32>
    %10 = arith.truncf %9 : vector<128x512xf32> to vector<128x512xbf16>
    %c0_6 = arith.constant 0 : index
    %c0_7 = arith.constant 0 : index
    %11 = vector.load %arg4[%c0_6, %c0_7] : memref<512x256xbf16, #tpu.memory_space<vmem>>, vector<512x256xbf16>
    %cst_8 = arith.constant dense<0.000000e+00> : vector<128x256xf32>
    %12 = tpu.matmul %10, %11, %cst_8 {dimension_numbers = #tpu.dot_dimension_numbers<[1], [0], [0], [1], [0, 0, 1, 1], [], []>} : vector<128x512xbf16>, vector<512x256xbf16>, vector<128x256xf32> -> vector<128x256xf32>
    %c0_9 = arith.constant 0 : index
    %c0_10 = arith.constant 0 : index
    %13 = vector.load %arg5[%c0_9, %c0_10] : memref<1x256xf32, #tpu.memory_space<vmem>>, vector<1x256xf32>
    %14 = vector.broadcast %13 : vector<1x256xf32> to vector<128x256xf32>
    %15 = arith.addf %12, %14 : vector<128x256xf32>
    %cst_11 = arith.constant 2.000000e-01 : f32
    %16 = vector.broadcast %cst_11 : f32 to vector<128x256xf32>
    %17 = arith.mulf %16, %15 : vector<128x256xf32>
    %18 = arith.maximumf %15, %17 : vector<128x256xf32>
    %19 = arith.truncf %18 : vector<128x256xf32> to vector<128x256xbf16>
    %c0_12 = arith.constant 0 : index
    %c0_13 = arith.constant 0 : index
    %20 = vector.load %arg6[%c0_12, %c0_13] : memref<256x128xbf16, #tpu.memory_space<vmem>>, vector<256x128xbf16>
    %cst_14 = arith.constant dense<0.000000e+00> : vector<128x128xf32>
    %21 = tpu.matmul %19, %20, %cst_14 {dimension_numbers = #tpu.dot_dimension_numbers<[1], [0], [0], [1], [0, 0, 1, 1], [], []>} : vector<128x256xbf16>, vector<256x128xbf16>, vector<128x128xf32> -> vector<128x128xf32>
    %c0_15 = arith.constant 0 : index
    %c0_16 = arith.constant 0 : index
    %22 = vector.load %arg7[%c0_15, %c0_16] : memref<1x128xf32, #tpu.memory_space<vmem>>, vector<1x128xf32>
    %23 = vector.broadcast %22 : vector<1x128xf32> to vector<128x128xf32>
    %24 = arith.addf %21, %23 : vector<128x128xf32>
    %25 = tpu.transpose %24, [1, 0] : vector<128x128xf32> -> vector<128x128xf32>
    %26 = vector.extract_strided_slice %25 {offsets = [0, 0], sizes = [1, 128], strides = [1, 1]} : vector<128x128xf32> to vector<1x128xf32>
    %27 = vector.shape_cast %26 : vector<1x128xf32> to vector<1x1x128xf32>
    %c0_17 = arith.constant 0 : index
    %c0_18 = arith.constant 0 : index
    %c0_19 = arith.constant 0 : index
    %28 = vector.load %arg8[%c0_17, %c0_18, %c0_19] : memref<1x1x128xf32, #tpu.memory_space<vmem>>, vector<1x1x128xf32>
    tpu.vector_store %arg8[%c0_17, %c0_18, %c0_19], %27 {strides = array<i32>} : memref<1x1x128xf32, #tpu.memory_space<vmem>>, vector<1x1x128xf32>,
    return
  }
  func.func @transform_0(%arg0: i32) -> (i32, i32) {
    %c0_i32 = arith.constant 0 : i32
    %c0_i32_0 = arith.constant 0 : i32
    return %arg0, %c0_i32 : i32, i32
  }
  func.func @transform_1(%arg0: i32) -> (i32, i32) {
    %c0_i32 = arith.constant 0 : i32
    %c0_i32_0 = arith.constant 0 : i32
    %c0_i32_1 = arith.constant 0 : i32
    return %c0_i32, %c0_i32_0 : i32, i32
  }
  func.func @transform_2(%arg0: i32) -> (i32, i32) {
    %c0_i32 = arith.constant 0 : i32
    %c0_i32_0 = arith.constant 0 : i32
    %c0_i32_1 = arith.constant 0 : i32
    return %c0_i32, %c0_i32_0 : i32, i32
  }
  func.func @transform_3(%arg0: i32) -> (i32, i32) {
    %c0_i32 = arith.constant 0 : i32
    %c0_i32_0 = arith.constant 0 : i32
    %c0_i32_1 = arith.constant 0 : i32
    return %c0_i32, %c0_i32_0 : i32, i32
  }
  func.func @transform_4(%arg0: i32) -> (i32, i32) {
    %c0_i32 = arith.constant 0 : i32
    %c0_i32_0 = arith.constant 0 : i32
    %c0_i32_1 = arith.constant 0 : i32
    return %c0_i32, %c0_i32_0 : i32, i32
  }
  func.func @transform_5(%arg0: i32) -> (i32, i32) {
    %c0_i32 = arith.constant 0 : i32
    %c0_i32_0 = arith.constant 0 : i32
    %c0_i32_1 = arith.constant 0 : i32
    return %c0_i32, %c0_i32_0 : i32, i32
  }
  func.func @transform_6(%arg0: i32) -> (i32, i32) {
    %c0_i32 = arith.constant 0 : i32
    %c0_i32_0 = arith.constant 0 : i32
    %c0_i32_1 = arith.constant 0 : i32
    return %c0_i32, %c0_i32_0 : i32, i32
  }
  func.func @transform_7(%arg0: i32) -> (i32, i32, i32) {
    %c0_i32 = arith.constant 0 : i32
    %c0_i32_0 = arith.constant 0 : i32
    %c0_i32_1 = arith.constant 0 : i32
    return %arg0, %c0_i32, %c0_i32_0 : i32, i32, i32
  }
}

</mosaic_0001>

<bundles_post_ra>
// kernel: _lambda_.1
= control target key start
LH: loop header
LB: loop body
LE: loop exit
PB: predicated region body
PF: predicated region fallthrough
CT: control target
= control target key end

     0   :  { %12 = vsyncpa [#allocation3], 0  ;;  %s4273_s24 = smov [#allocation2]   ;;  %s5991_s0 = inlined_call_operand.vmem [shape: f32[128,784], index: 0, kind: input, shape index: {}]   ;;  %s5992_s1 = inlined_call_operand.vmem [shape: bf16[784,512], index: 1, kind: input, shape index: {}]   ;;  %s5993_s2 = inlined_call_operand.vmem [shape: f32[1,512], index: 2, kind: input, shape index: {}]   ;;  %s5994_s3 = inlined_call_operand.hbm [shape: bf16[512,256], index: 3, kind: input, shape index: {}]   ;;  %s5995_s4 = inlined_call_operand.vmem [shape: f32[1,256], index: 4, kind: input, shape index: {}]   ;;  %s5996_s5 = inlined_call_operand.vmem [shape: bf16[256,128], index: 5, kind: input, shape index: {}]   ;;  %s5997_s6 = inlined_call_operand.vmem [shape: f32[1,128], index: 6, kind: input, shape index: {}]   ;;  %s5998_s7 = inlined_call_operand.vmem [shape: f32[1,1,128], index: 7, kind: output, shape index: {}]  }
   0x1   :  { %s24_s25 = sshll.u32 %s4273_s24, 4  ;;  %s25_s25 = int_to_ptr.vmem [resolvable:$true] %s24_s25 }
   0x2   :  { %s4259_s26 = scalar_lea.vmem %s25_s25, 8192  ;;  %p4264_p1 = scmp.lt.s32.totalorder %s25_s25, %s25_s25 }
   0x3   :  { %p4260_p0 = scmp.ne.s32.totalorder %s25_s25, %s4259_s26  ;;  %p4265_p2 = scmp.lt.s32.totalorder %s4259_s26, %s4259_s26 }
   0x5   :  { %p4266_p3 = por %p4265_p2, %p4264_p1 }
   0x7   :  { %p4267_p4 = pnand %p4266_p3, %p4260_p0 }
   0x9   :  { %4270 = shalt.err (!%p4267_p4)
}
   0xa   :  { %s4274_s27 = smov 128   ;;  %s4275_s28 = smov 8  }
   0xb   :  { %30 = dma.hbm_to_vmem [thread:$0]  %s5994_s3, 8192, %s25_s25, [#allocation3], %s4274_s27, %s4274_s27, %s4275_s28  }
   0xc   :  { %4271 = dma.done.wait [#allocation3], 8192  }
   0xd   :  { %4272 = vsyncadd [#allocation3], 4294959104  ;;  %v3845_v0 = vld [vmem:[%s5992_s1 + $0xe4] ss:$16 sps:$4 sm:$0xff]   ;;  %v3849_v2 = vld [vmem:[%s5992_s1 + $0xe0] ss:$16 sps:$4 sm:$0xff]  }
   0xe   :  { %v3847_v1 = vld [vmem:[%s5992_s1 + $0x2e4] ss:$16 sps:$4 sm:$0xff]   ;;  %1432 = vmatprep.subr.bf16.mxu0 %v3845_v0  ;;  %v3850_v3 = vld [vmem:[%s5992_s1 + $0x2e0] ss:$16 sps:$4 sm:$0xff]   ;;  %v42_v46 = vld [vmem:[%s5991_s0 + $0x8] sm:$0xff]  ;;  %vm1407_vm0 = vcmask 130048  }
   0xf   :  { %1545 = vmatprep.subr.bf16.mxu1 %v3847_v1  ;;  %v3851_v4 = vld [vmem:[%s5992_s1 + $0xc4] ss:$16 sps:$4 sm:$0xff]   ;;  %1433 = vmatpush1.bf16.msra.mxu0 %v3849_v2  ;;  %v3855_v6 = vld [vmem:[%s5992_s1 + $0xc0] ss:$16 sps:$4 sm:$0xff]   ;;  %v44_v48 = vld [vmem:[%s5991_s0 + $0x18] sm:$0xff] }
  0x10   :  { %1546 = vmatpush1.bf16.msra.mxu1 %v3850_v3  ;;  %v3853_v5 = vld [vmem:[%s5992_s1 + $0x2c4] ss:$16 sps:$4 sm:$0xff]   ;;  %1434 = vmatprep.subr.bf16.mxu0 %v3851_v4  ;;  %v3856_v7 = vld [vmem:[%s5992_s1 + $0x2c0] ss:$16 sps:$4 sm:$0xff]  }
  0x11   :  { %1547 = vmatprep.subr.bf16.mxu1 %v3853_v5  ;;  %v3857_v8 = vld [vmem:[%s5992_s1 + $0xa4] ss:$16 sps:$4 sm:$0xff]   ;;  %v3861_v10 = vld [vmem:[%s5992_s1 + $0xa0] ss:$16 sps:$4 sm:$0xff]  }
  0x12   :  { %v3859_v9 = vld [vmem:[%s5992_s1 + $0x2a4] ss:$16 sps:$4 sm:$0xff]   ;;  %v3862_v11 = vld [vmem:[%s5992_s1 + $0x2a0] ss:$16 sps:$4 sm:$0xff]  }
  0x13   :  { %1435 = vmatpush1.bf16.msra.mxu0 %v3855_v6  ;;  %v3863_v12 = vld [vmem:[%s5992_s1 + $0x84] ss:$16 sps:$4 sm:$0xff]   ;;  %v3867_v14 = vld [vmem:[%s5992_s1 + $0x80] ss:$16 sps:$4 sm:$0xff]  }
  0x14   :  { %1548 = vmatpush1.bf16.msra.mxu1 %v3856_v7  ;;  %1436 = vmatprep.subr.bf16.mxu0 %v3857_v8  ;;  %v3865_v13 = vld [vmem:[%s5992_s1 + $0x284] ss:$16 sps:$4 sm:$0xff]   ;;  %v3868_v15 = vld [vmem:[%s5992_s1 + $0x280] ss:$16 sps:$4 sm:$0xff]   ;;  %v48_v7 = vld [vmem:[%s5991_s0 + $0x38] sm:$0xff] }
  0x15   :  { %1549 = vmatprep.subr.bf16.mxu1 %v3859_v9  ;;  %v3869_v16 = vld [vmem:[%s5992_s1 + $0x64] ss:$16 sps:$4 sm:$0xff]   ;;  %v3873_v18 = vld [vmem:[%s5992_s1 + $0x60] ss:$16 sps:$4 sm:$0xff]   ;;  %v50_v9 = vld [vmem:[%s5991_s0 + $0x48] sm:$0xff] }
  0x16   :  { %v3871_v17 = vld [vmem:[%s5992_s1 + $0x264] ss:$16 sps:$4 sm:$0xff]   ;;  %v3874_v19 = vld [vmem:[%s5992_s1 + $0x260] ss:$16 sps:$4 sm:$0xff]  }
  0x17   :  { %1437 = vmatpush1.bf16.msra.mxu0 %v3861_v10  ;;  %v3875_v20 = vld [vmem:[%s5992_s1 + $0x44] ss:$16 sps:$4 sm:$0xff]   ;;  %v3879_v22 = vld [vmem:[%s5992_s1 + $0x40] ss:$16 sps:$4 sm:$0xff]  }
  0x18   :  { %1550 = vmatpush1.bf16.msra.mxu1 %v3862_v11  ;;  %1438 = vmatprep.subr.bf16.mxu0 %v3863_v12  ;;  %v3877_v21 = vld [vmem:[%s5992_s1 + $0x244] ss:$16 sps:$4 sm:$0xff]   ;;  %v3880_v23 = vld [vmem:[%s5992_s1 + $0x240] ss:$16 sps:$4 sm:$0xff]  }
  0x19   :  { %1551 = vmatprep.subr.bf16.mxu1 %v3865_v13  ;;  %v3881_v24 = vld [vmem:[%s5992_s1 + $0x24] ss:$16 sps:$4 sm:$0xff]   ;;  %v3885_v26 = vld [vmem:[%s5992_s1 + $0x20] ss:$16 sps:$4 sm:$0xff]   ;;  %v56_v13 = vld [vmem:[%s5991_s0 + $0x78] sm:$0xff] }
  0x1a   :  { %v3883_v25 = vld [vmem:[%s5992_s1 + $0x224] ss:$16 sps:$4 sm:$0xff]   ;;  %v3886_v27 = vld [vmem:[%s5992_s1 + $0x220] ss:$16 sps:$4 sm:$0xff]  }
  0x1b   :  { %1439 = vmatpush1.bf16.msra.mxu0 %v3867_v14  ;;  %v3887_v28 = vld [vmem:[%s5992_s1 + $0x4] ss:$16 sps:$4 sm:$0xff]   ;;  %v3891_v30 = vld [vmem:[%s5992_s1] ss:$16 sps:$4 sm:$0xff]  }
  0x1c   :  { %1552 = vmatpush1.bf16.msra.mxu1 %v3868_v15  ;;  %1440 = vmatprep.subr.bf16.mxu0 %v3869_v16  ;;  %v3889_v29 = vld [vmem:[%s5992_s1 + $0x204] ss:$16 sps:$4 sm:$0xff]   ;;  %v3892_v31 = vld [vmem:[%s5992_s1 + $0x200] ss:$16 sps:$4 sm:$0xff]  }
  0x1d   :  { %1553 = vmatprep.subr.bf16.mxu1 %v3871_v17  ;;  %v3893_v32 = vld [vmem:[%s5992_s1 + $0x1e4] ss:$16 sps:$4 sm:$0xff]   ;;  %v3897_v34 = vld [vmem:[%s5992_s1 + $0x1e0] ss:$16 sps:$4 sm:$0xff]   ;;  %v58_v17 = vld [vmem:[%s5991_s0 + $0x88] sm:$0xff] }
  0x1e   :  { %v3895_v33 = vld [vmem:[%s5992_s1 + $0x3e4] ss:$16 sps:$4 sm:$0xff]   ;;  %v3898_v35 = vld [vmem:[%s5992_s1 + $0x3e0] ss:$16 sps:$4 sm:$0xff]  }
  0x1f   :  { %1441 = vmatpush1.bf16.msra.mxu0 %v3873_v18  ;;  %v3899_v36 = vld [vmem:[%s5992_s1 + $0x1c4] ss:$16 sps:$4 sm:$0xff]   ;;  %v3903_v38 = vld [vmem:[%s5992_s1 + $0x1c0] ss:$16 sps:$4 sm:$0xff]  }
  0x20   :  { %1554 = vmatpush1.bf16.msra.mxu1 %v3874_v19  ;;  %1442 = vmatprep.subr.bf16.mxu0 %v3875_v20  ;;  %v3901_v37 = vld [vmem:[%s5992_s1 + $0x3c4] ss:$16 sps:$4 sm:$0xff]   ;;  %v3904_v39 = vld [vmem:[%s5992_s1 + $0x3c0] ss:$16 sps:$4 sm:$0xff]  }
  0x21   :  { %1555 = vmatprep.subr.bf16.mxu1 %v3877_v21  ;;  %v3905_v40 = vld [vmem:[%s5992_s1 + $0x1a4] ss:$16 sps:$4 sm:$0xff]   ;;  %v3909_v42 = vld [vmem:[%s5992_s1 + $0x1a0] ss:$16 sps:$4 sm:$0xff]  }
  0x22   :  { %v3907_v41 = vld [vmem:[%s5992_s1 + $0x3a4] ss:$16 sps:$4 sm:$0xff]   ;;  %v3910_v43 = vld [vmem:[%s5992_s1 + $0x3a0] ss:$16 sps:$4 sm:$0xff]  }
  0x23   :  { %1443 = vmatpush1.bf16.msra.mxu0 %v3879_v22  ;;  %v3911_v44 = vld [vmem:[%s5992_s1 + $0x184] ss:$16 sps:$4 sm:$0xff]   ;;  %v3915_v50 = vld [vmem:[%s5992_s1 + $0x180] ss:$16 sps:$4 sm:$0xff]  }
  0x24   :  { %1556 = vmatpush1.bf16.msra.mxu1 %v3880_v23  ;;  %1444 = vmatprep.subr.bf16.mxu0 %v3881_v24  ;;  %v3913_v45 = vld [vmem:[%s5992_s1 + $0x384] ss:$16 sps:$4 sm:$0xff]   ;;  %v3916_v51 = vld [vmem:[%s5992_s1 + $0x380] ss:$16 sps:$4 sm:$0xff]  }
  0x25   :  { %1557 = vmatprep.subr.bf16.mxu1 %v3883_v25  ;;  %v49_v47 = vld [vmem:[%s5991_s0 + $0x40] sm:$0xff]  ;;  %v51_v49 = vld [vmem:[%s5991_s0 + $0x50] sm:$0xff]  ;;  %v62_v25 = vld [vmem:[%s5991_s0 + $0xa8] sm:$0xff] }
  0x26   :  { %v3917_v52 = vld [vmem:[%s5992_s1 + $0x164] ss:$16 sps:$4 sm:$0xff]   ;;  %v4479_v53 = vpack.c.bf16 %v49_v47, %v42_v46  ;;  %v4481_v54 = vpack.c.bf16 %v51_v49, %v44_v48  ;;  %v3921_v56 = vld [vmem:[%s5992_s1 + $0x160] ss:$16 sps:$4 sm:$0xff]   ;;  %v86_v47 = vld [vmem:[%s5991_s0 + $0x168] sm:$0xff] }
  0x27   :  { %1445 = vmatpush1.bf16.msra.mxu0 %v3885_v26  ;;  %v3919_v55 = vld [vmem:[%s5992_s1 + $0x364] ss:$16 sps:$4 sm:$0xff]   ;;  %v3922_v57 = vld [vmem:[%s5992_s1 + $0x360] ss:$16 sps:$4 sm:$0xff]  }
  0x28   :  { %1558 = vmatpush1.bf16.msra.mxu1 %v3886_v27  ;;  %1446 = vmatprep.subr.bf16.mxu0 %v3887_v28  ;;  %v3923_v58 = vld [vmem:[%s5992_s1 + $0x144] ss:$16 sps:$4 sm:$0xff]   ;;  %v3927_v60 = vld [vmem:[%s5992_s1 + $0x140] ss:$16 sps:$4 sm:$0xff]   ;;  %v64_v27 = vld [vmem:[%s5991_s0 + $0xb8] sm:$0xff] }
  0x29   :  { %1559 = vmatprep.subr.bf16.mxu1 %v3889_v29  ;;  %1464 = vmatprep.mubr.bf16.mxu0 %v4479_v53  ;;  %v3925_v59 = vld [vmem:[%s5992_s1 + $0x344] ss:$16 sps:$4 sm:$0xff]   ;;  %v3928_v61 = vld [vmem:[%s5992_s1 + $0x340] ss:$16 sps:$4 sm:$0xff]   ;;  %v70_v29 = vld [vmem:[%s5991_s0 + $0xe8] sm:$0xff] }
  0x2a   :  { %1577 = vmatprep.mubr.bf16.mxu1 %v4481_v54  ;;  %v3929_v62 = vld [vmem:[%s5992_s1 + $0x124] ss:$16 sps:$4 sm:$0xff]   ;;  %v3933_v0 = vld [vmem:[%s5992_s1 + $0x120] ss:$16 sps:$4 sm:$0xff]  }
  0x2b   :  { %1447 = vmatpush1.bf16.msra.mxu0 %v3891_v30  ;;  %v3931_v63 = vld [vmem:[%s5992_s1 + $0x324] ss:$16 sps:$4 sm:$0xff]   ;;  %v3934_v1 = vld [vmem:[%s5992_s1 + $0x320] ss:$16 sps:$4 sm:$0xff]  }
  0x2c   :  { %1560 = vmatpush1.bf16.msra.mxu1 %v3892_v31  ;;  %1448 = vmatprep.subr.bf16.mxu0 %v3893_v32  ;;  %v3935_v2 = vld [vmem:[%s5992_s1 + $0x104] ss:$16 sps:$4 sm:$0xff]   ;;  %v3939_v4 = vld [vmem:[%s5992_s1 + $0x100] ss:$16 sps:$4 sm:$0xff]   ;;  %v72_v31 = vld [vmem:[%s5991_s0 + $0xf8] sm:$0xff] }
  0x2d   :  { %1561 = vmatprep.subr.bf16.mxu1 %v3895_v33  ;;  %v3937_v3 = vld [vmem:[%s5992_s1 + $0x304] ss:$16 sps:$4 sm:$0xff]   ;;  %v3940_v5 = vld [vmem:[%s5992_s1 + $0x300] ss:$16 sps:$4 sm:$0xff]  }
  0x2e   :  { %v41_v6 = vld [vmem:[%s5991_s0] sm:$0xff]  ;;  %v43_v8 = vld [vmem:[%s5991_s0 + $0x10] sm:$0xff] }
  0x2f   :  { %1449 = vmatpush2.bf16.msra.mxu0 %v3897_v34  ;;  %v3943_v10 = vld [vmem:[%s5992_s1 + $0x4e4] ss:$16 sps:$4 sm:$0xff]   ;;  %v3941_v12 = vld [vmem:[%s5992_s1 + $0x4e0] ss:$16 sps:$4 sm:$0xff]   ;;  %v4557_v15 = vpack.c.bf16 %v48_v7, %v41_v6  ;;  %v4559_v16 = vpack.c.bf16 %v50_v9, %v43_v8 }
  0x30   :  { %1562 = vmatpush2.bf16.msra.mxu1 %v3898_v35  ;;  %1450 = vmatprep.subr.bf16.mxu0 %v3899_v36  ;;  %v3946_v11 = vld [vmem:[%s5992_s1 + $0x604] ss:$16 sps:$4 sm:$0xff]   ;;  %v3944_v19 = vld [vmem:[%s5992_s1 + $0x600] ss:$16 sps:$4 sm:$0xff]  }
  0x31   :  { %1563 = vmatprep.subr.bf16.mxu1 %v3901_v37  ;;  %v63_v14 = vld [vmem:[%s5991_s0 + $0xb0] sm:$0xff]  ;;  %v65_v18 = vld [vmem:[%s5991_s0 + $0xc0] sm:$0xff] }
  0x32   :  { %v3949_v20 = vld [vmem:[%s5992_s1 + $0x4c4] ss:$16 sps:$4 sm:$0xff]   ;;  %v4573_v21 = vpack.c.bf16 %v63_v14, %v56_v13  ;;  %v3947_v22 = vld [vmem:[%s5992_s1 + $0x4c0] ss:$16 sps:$4 sm:$0xff]   ;;  %v4578_v23 = vpack.c.bf16 %v65_v18, %v58_v17  ;;  %v3997_v13 = vld [vmem:[%s5992_s1 + $0x2ec] ss:$16 sps:$4 sm:$0xff]  }
  0x33   :  { %1451 = vmatpush2.bf16.msra.mxu0 %v3903_v38  ;;  %v55_v24 = vld [vmem:[%s5991_s0 + $0x70] sm:$0xff]  ;;  %v57_v26 = vld [vmem:[%s5991_s0 + $0x80] sm:$0xff]  ;;  %v106_v14 = vld [vmem:[%s5991_s0 + $0x208] sm:$0xff] }
  0x34   :  { %1564 = vmatpush2.bf16.msra.mxu1 %v3904_v39  ;;  %1452 = vmatprep.subr.bf16.mxu0 %v3905_v40  ;;  %v3952_v28 = vld [vmem:[%s5992_s1 + $0x4a4] ss:$16 sps:$4 sm:$0xff]   ;;  %v4611_v33 = vpack.c.bf16 %v62_v25, %v55_v24  ;;  %v4613_v34 = vpack.c.bf16 %v64_v27, %v57_v26  ;;  %v3950_v35 = vld [vmem:[%s5992_s1 + $0x4a0] ss:$16 sps:$4 sm:$0xff]   ;;  %v112_v18 = vld [vmem:[%s5991_s0 + $0x238] sm:$0xff] }
  0x35   :  { %1565 = vmatprep.subr.bf16.mxu1 %v3907_v41  ;;  %v77_v30 = vld [vmem:[%s5991_s0 + $0x120] sm:$0xff]  ;;  %v79_v32 = vld [vmem:[%s5991_s0 + $0x130] sm:$0xff]  ;;  %v76_v41 = vld [vmem:[%s5991_s0 + $0x118] sm:$0xff] }
  0x36   :  { %v4618_v36 = vpack.c.bf16 %v77_v30, %v70_v29  ;;  %v3955_v37 = vld [vmem:[%s5992_s1 + $0x484] ss:$16 sps:$4 sm:$0xff]   ;;  %v4623_v38 = vpack.c.bf16 %v79_v32, %v72_v31  ;;  %v3953_v39 = vld [vmem:[%s5992_s1 + $0x480] ss:$16 sps:$4 sm:$0xff]   ;;  %v118_v32 = vld [vmem:[%s5991_s0 + $0x268] sm:$0xff] }
  0x37   :  { %1453 = vmatpush2.bf16.msra.mxu0 %v3909_v42  ;;  %v69_v40 = vld [vmem:[%s5991_s0 + $0xe0] sm:$0xff]  ;;  %v71_v42 = vld [vmem:[%s5991_s0 + $0xf0] sm:$0xff] }
  0x38   :  { %1566 = vmatpush2.bf16.msra.mxu1 %v3910_v43  ;;  %1454 = vmatprep.subr.bf16.mxu0 %v3911_v44  ;;  %v78_v43 = vld [vmem:[%s5991_s0 + $0x128] sm:$0xff]  ;;  %v3958_v44 = vld [vmem:[%s5992_s1 + $0x464] ss:$16 sps:$4 sm:$0xff]   ;;  %v4659_v49 = vpack.c.bf16 %v76_v41, %v69_v40  ;;  %v3965_v9 = vld [vmem:[%s5992_s1 + $0x400] ss:$16 sps:$4 sm:$0xff]  }
  0x39   :  { %1567 = vmatprep.subr.bf16.mxu1 %v3913_v45  ;;  %v84_v45 = vld [vmem:[%s5991_s0 + $0x158] sm:$0xff]  ;;  %v91_v46 = vld [vmem:[%s5991_s0 + $0x190] sm:$0xff]  ;;  %v93_v48 = vld [vmem:[%s5991_s0 + $0x1a0] sm:$0xff] }
  0x3a   :  { %v3967_v7 = vld [vmem:[%s5992_s1 + $0x404] ss:$16 sps:$4 sm:$0xff]   ;;  %v3968_v26 = vld [vmem:[%s5992_s1 + $0x5e0] ss:$16 sps:$4 sm:$0xff]   ;;  %v126_v40 = vld [vmem:[%s5991_s0 + $0x2a8] sm:$0xff] }
  0x3b   :  { %1455 = vmatpush2.bf16.msra.mxu0 %v3915_v50  ;;  %v4661_v50 = vpack.c.bf16 %v78_v43, %v71_v42  ;;  %v3970_v17 = vld [vmem:[%s5992_s1 + $0x5e4] ss:$16 sps:$4 sm:$0xff]   ;;  %v3971_v30 = vld [vmem:[%s5992_s1 + $0x5c0] ss:$16 sps:$4 sm:$0xff]   ;;  %v128_v42 = vld [vmem:[%s5991_s0 + $0x2b8] sm:$0xff] }
  0x3c   :  { %1568 = vmatpush2.bf16.msra.mxu1 %v3916_v51  ;;  %1456 = vmatprep.subr.bf16.mxu0 %v3917_v52  ;;  %v3956_v51 = vld [vmem:[%s5992_s1 + $0x460] ss:$16 sps:$4 sm:$0xff]   ;;  %v4666_v52 = vpack.c.bf16 %v91_v46, %v84_v45 }
  0x3d   :  { %1569 = vmatprep.subr.bf16.mxu1 %v3919_v55  ;;  %v3961_v55 = vld [vmem:[%s5992_s1 + $0x444] ss:$16 sps:$4 sm:$0xff]   ;;  %v3974_v46 = vld [vmem:[%s5992_s1 + $0x5a0] ss:$16 sps:$4 sm:$0xff]  }
  0x3e   :  { %v111_v31 = vld [vmem:[%s5991_s0 + $0x230] sm:$0xff]  ;;  %v133_v41 = vld [vmem:[%s5991_s0 + $0x2e0] sm:$0xff] }
  0x3f   :  { %1457 = vmatpush2.bf16.msra.mxu0 %v3921_v56  ;;  %v4671_v56 = vpack.c.bf16 %v93_v48, %v86_v47  ;;  %v135_v43 = vld [vmem:[%s5991_s0 + $0x2f0] sm:$0xff]  ;;  %v4813_v47 = vpack.c.bf16 %v133_v41, %v126_v40  ;;  %v54_v41 = vld [vmem:[%s5991_s0 + $0x68] sm:$0xff] }
  0x40   :  { %1570 = vmatpush2.bf16.msra.mxu1 %v3922_v57  ;;  %1458 = vmatprep.subr.bf16.mxu0 %v3923_v58  ;;  %v3959_v57 = vld [vmem:[%s5992_s1 + $0x440] ss:$16 sps:$4 sm:$0xff]   ;;  %v3979_v48 = vld [vmem:[%s5992_s1 + $0x584] ss:$16 sps:$4 sm:$0xff]  }
  0x41   :  { %1571 = vmatprep.subr.bf16.mxu1 %v3925_v59  ;;  %v83_v58 = vld [vmem:[%s5991_s0 + $0x150] sm:$0xff]  ;;  %v90_v59 = vld [vmem:[%s5991_s0 + $0x188] sm:$0xff] }
  0x42   :  { %v47_v40 = vld [vmem:[%s5991_s0 + $0x30] sm:$0xff] }
  0x43   :  { %1459 = vmatpush2.bf16.msra.mxu0 %v3927_v60  ;;  %v85_v60 = vld [vmem:[%s5991_s0 + $0x160] sm:$0xff] }
  0x44   :  { %1572 = vmatpush2.bf16.msra.mxu1 %v3928_v61  ;;  %1460 = vmatprep.subr.bf16.mxu0 %v3929_v62  ;;  %v92_v61 = vld [vmem:[%s5991_s0 + $0x198] sm:$0xff]  ;;  %v3964_v62 = vld [vmem:[%s5992_s1 + $0x424] ss:$16 sps:$4 sm:$0xff]  }
  0x45   :  { %1573 = vmatprep.subr.bf16.mxu1 %v3931_v63  ;;  %v98_v63 = vld [vmem:[%s5991_s0 + $0x1c8] sm:$0xff] }
  0x47   :  { %1461 = vmatpush2.bf16.msra.mxu0 %v3933_v0  ;;  %v105_v0 = vld [vmem:[%s5991_s0 + $0x200] sm:$0xff] }
  0x48   :  { %1574 = vmatpush2.bf16.msra.mxu1 %v3934_v1  ;;  %1462 = vmatprep.subr.bf16.mxu0 %v3935_v2  ;;  %v100_v1 = vld [vmem:[%s5991_s0 + $0x1d8] sm:$0xff]  ;;  %v107_v2 = vld [vmem:[%s5991_s0 + $0x210] sm:$0xff]  ;;  %v4714_v6 = vpack.c.bf16 %v105_v0, %v98_v63  ;;  %v142_v0 = vld [vmem:[%s5991_s0 + $0x328] sm:$0xff] }
  0x49   :  { %1575 = vmatprep.subr.bf16.mxu1 %v3937_v3  ;;  %v4707_v3 = vpack.c.bf16 %v90_v59, %v83_v58  ;;  %v4719_v8 = vpack.c.bf16 %v107_v2, %v100_v1  ;;  %v132_v58 = vld [vmem:[%s5991_s0 + $0x2d8] sm:$0xff]  ;;  %v127_v59 = vld [vmem:[%s5991_s0 + $0x2b0] sm:$0xff]  ;;  %v149_v1 = vld [vmem:[%s5991_s0 + $0x360] sm:$0xff] }
  0x4a   :  { %v147_v63 = vld [vmem:[%s5991_s0 + $0x350] sm:$0xff] }
  0x4b   :  { %1463 = vmatpush2.bf16.msra.mxu0 %v3939_v4  ;;  %v4709_v4 = vpack.c.bf16 %v92_v61, %v85_v60  ;;  %v134_v60 = vld [vmem:[%s5991_s0 + $0x2e8] sm:$0xff]  ;;  %v3982_v61 = vld [vmem:[%s5992_s1 + $0x564] ss:$16 sps:$4 sm:$0xff]  }
  0x4c   :  { %1576 = vmatpush2.bf16.msra.mxu1 %v3940_v5  ;;  %1658 = vmatprep.subr.bf16.mxu0 %v3943_v10  ;;  %v3962_v5 = vld [vmem:[%s5992_s1 + $0x420] ss:$16 sps:$4 sm:$0xff]  }
  0x4d   :  { %1785 = vmatprep.subr.bf16.mxu1 %v3946_v11  ;;  %v97_v10 = vld [vmem:[%s5991_s0 + $0x1c0] sm:$0xff]  ;;  %v104_v11 = vld [vmem:[%s5991_s0 + $0x1f8] sm:$0xff] }
  0x4e   :  { %1465 = vmatmul.mubr.bf16.vlgmr.msra.gmra.mxu0 %v4557_v15  ;;  %v4758_v24 = vpack.c.bf16 %v104_v11, %v97_v10  ;;  %v3985_v10 = vld [vmem:[%s5992_s1 + $0x544] ss:$16 sps:$4 sm:$0xff]   ;;  %v4866_v11 = vpack.c.bf16 %v149_v1, %v142_v0  ;;  %v4001_v0 = vld [vmem:[%s5992_s1 + $0x2c8] ss:$16 sps:$4 sm:$0xff]  }
  0x4f   :  { %1578 = vmatmul.mubr.bf16.vlgmr.msra.gmra.mxu1 %v4559_v16  ;;  %1659 = vmatpush1.bf16.msra.mxu0 %v3941_v12  ;;  %v99_v12 = vld [vmem:[%s5991_s0 + $0x1d0] sm:$0xff] }
  0x50   :  { %1786 = vmatpush1.bf16.msra.mxu1 %v3944_v19  ;;  %1660 = vmatprep.subr.bf16.mxu0 %v3949_v20  ;;  %v119_v19 = vld [vmem:[%s5991_s0 + $0x270] sm:$0xff]  ;;  %v114_v20 = vld [vmem:[%s5991_s0 + $0x248] sm:$0xff]  ;;  %v4760_v25 = vpack.c.bf16 %v106_v14, %v99_v12 }
  0x51   :  { %1474 = vmatprep.mubr.bf16.mxu0 %v4573_v21  ;;  %1587 = vmatprep.mubr.bf16.mxu1 %v4578_v23  ;;  %v4765_v27 = vpack.c.bf16 %v119_v19, %v112_v18  ;;  %v3983_v12 = vld [vmem:[%s5992_s1 + $0x540] ss:$16 sps:$4 sm:$0xff]   ;;  %v146_v14 = vld [vmem:[%s5991_s0 + $0x348] sm:$0xff]  ;;  %v148_v18 = vld [vmem:[%s5991_s0 + $0x358] sm:$0xff] }
  0x52   :  { %1997 = vmatprep.subr.bf16.mxu1 %v3997_v13  ;;  %v139_v13 = vld [vmem:[%s5991_s0 + $0x310] sm:$0xff] }
  0x53   :  { %1661 = vmatpush1.bf16.msra.mxu0 %v3947_v22  ;;  %v121_v22 = vld [vmem:[%s5991_s0 + $0x280] sm:$0xff]  ;;  %v59_v1 = vld [vmem:[%s5991_s0 + $0x90] sm:$0xff] }
  0x54   :  { %1662 = vmatprep.subr.bf16.mxu0 %v3952_v28  ;;  %v3973_v28 = vld [vmem:[%s5992_s1 + $0x5c4] ss:$16 sps:$4 sm:$0xff]   ;;  %v4770_v29 = vpack.c.bf16 %v121_v22, %v114_v20  ;;  %v46_v20 = vld [vmem:[%s5991_s0 + $0x28] sm:$0xff] }
  0x55   :  { %v3988_v19 = vld [vmem:[%s5992_s1 + $0x524] ss:$16 sps:$4 sm:$0xff]  }
  0x56   :  { %1475 = vmatmul.mubr.bf16.gmra.mxu0 %v4611_v33  ;;  %v53_v22 = vld [vmem:[%s5991_s0 + $0x60] sm:$0xff] }
  0x57   :  { %1588 = vmatmul.mubr.bf16.gmra.mxu1 %v4613_v34  ;;  %1663 = vmatpush1.bf16.msra.mxu0 %v3950_v35  ;;  %v113_v35 = vld [vmem:[%s5991_s0 + $0x240] sm:$0xff] }
  0x58   :  { %1484 = vmatprep.mubr.bf16.mxu0 %v4618_v36  ;;  %1664 = vmatprep.subr.bf16.mxu0 %v3955_v37  ;;  %v120_v37 = vld [vmem:[%s5991_s0 + $0x278] sm:$0xff] }
  0x59   :  { %1597 = vmatprep.mubr.bf16.mxu1 %v4623_v38  ;;  %v4808_v45 = vpack.c.bf16 %v120_v37, %v113_v35  ;;  %v3989_v35 = vld [vmem:[%s5992_s1 + $0x500] ss:$16 sps:$4 sm:$0xff]  }
  0x5a   :  { %v45_v37 = vld [vmem:[%s5991_s0 + $0x20] sm:$0xff] }
  0x5b   :  { %1665 = vmatpush1.bf16.msra.mxu0 %v3953_v39  ;;  %v3976_v39 = vld [vmem:[%s5992_s1 + $0x5a4] ss:$16 sps:$4 sm:$0xff]  }
  0x5c   :  { %1666 = vmatprep.subr.bf16.mxu0 %v3958_v44  ;;  %v4806_v44 = vpack.c.bf16 %v118_v32, %v111_v31  ;;  %v4903_v31 = vpack.c.bf16 %v53_v22, %v46_v20  ;;  %v3991_v32 = vld [vmem:[%s5992_s1 + $0x504] ss:$16 sps:$4 sm:$0xff]   ;;  %v4004_v22 = vld [vmem:[%s5992_s1 + $0xa8] ss:$16 sps:$4 sm:$0xff]  }
  0x5d   :  { %v81_v20 = vld [vmem:[%s5991_s0 + $0x140] sm:$0xff] }
  0x5e   :  { %1485 = vmatmul.mubr.bf16.gmra.mxu0 %v4659_v49 }
  0x5f   :  { %1598 = vmatmul.mubr.bf16.gmra.mxu1 %v4661_v50  ;;  %1667 = vmatpush1.bf16.msra.mxu0 %v3956_v51  ;;  %v4818_v51 = vpack.c.bf16 %v135_v43, %v128_v42  ;;  %v6000_v42 = vmov 0   ;;  %v3994_v43 = vld [vmem:[%s5992_s1 + $0xec] ss:$16 sps:$4 sm:$0xff]  }
  0x60   :  { %1494 = vmatprep.mubr.bf16.mxu0 %v4666_v52  ;;  %1668 = vmatprep.subr.bf16.mxu0 %v3961_v55  ;;  %v3977_v55 = vld [vmem:[%s5992_s1 + $0x580] ss:$16 sps:$4 sm:$0xff]  }
  0x61   :  { %1607 = vmatprep.mubr.bf16.mxu1 %v4671_v56 }
  0x63   :  { %1669 = vmatpush1.bf16.msra.mxu0 %v3959_v57  ;;  %v125_v57 = vld [vmem:[%s5991_s0 + $0x2a0] sm:$0xff] }
  0x64   :  { %1670 = vmatprep.subr.bf16.mxu0 %v3964_v62  ;;  %v140_v62 = vld [vmem:[%s5991_s0 + $0x318] sm:$0xff]  ;;  %v4854_v2 = vpack.c.bf16 %v132_v58, %v125_v57  ;;  %v4938_v57 = vpack.c.bf16 %v54_v41, %v47_v40  ;;  %v73_v41 = vld [vmem:[%s5991_s0 + $0x100] sm:$0xff] }
  0x65   :  { %v60_v58 = vld [vmem:[%s5991_s0 + $0x98] sm:$0xff] }
  0x66   :  { %1495 = vmatmul.mubr.bf16.gmra.mxu0 %v4707_v3 }
  0x67   :  { %1608 = vmatmul.mubr.bf16.gmra.mxu1 %v4709_v4  ;;  %1671 = vmatpush1.bf16.msra.mxu0 %v3962_v5  ;;  %v4856_v5 = vpack.c.bf16 %v134_v60, %v127_v59  ;;  %v67_v59 = vld [vmem:[%s5991_s0 + $0xd0] sm:$0xff]  ;;  %v4000_v60 = vld [vmem:[%s5992_s1 + $0xcc] ss:$16 sps:$4 sm:$0xff]  }
  0x68   :  { %1504 = vmatprep.mubr.bf16.mxu0 %v4714_v6  ;;  %1672 = vmatprep.subr.bf16.mxu0 %v3967_v7  ;;  %v3980_v7 = vld [vmem:[%s5992_s1 + $0x560] ss:$16 sps:$4 sm:$0xff]  }
  0x69   :  { %1617 = vmatprep.mubr.bf16.mxu1 %v4719_v8 }
  0x6b   :  { %1673 = vmatpush1.bf16.msra.mxu0 %v3965_v9  ;;  %v4861_v9 = vpack.c.bf16 %v147_v63, %v140_v62  ;;  %v3998_v62 = vld [vmem:[%s5992_s1 + $0xc8] ss:$16 sps:$4 sm:$0xff]   ;;  %v4955_v63 = vpack.c.bf16 %v67_v59, %v60_v58  ;;  %v4018_v58 = vld [vmem:[%s5992_s1 + $0x6c] ss:$16 sps:$4 sm:$0xff]  }
  0x6c   :  { %1674 = vmatprep.subr.bf16.mxu0 %v3970_v17  ;;  %v141_v17 = vld [vmem:[%s5991_s0 + $0x320] sm:$0xff]  ;;  %v4021_v59 = vld [vmem:[%s5992_s1 + $0x26c] ss:$16 sps:$4 sm:$0xff]  }
  0x6e   :  { %1505 = vmatmul.mubr.bf16.gmra.mxu0 %v4758_v24 }
  0x6f   :  { %1618 = vmatmul.mubr.bf16.gmra.mxu1 %v4760_v25  ;;  %1675 = vmatpush2.bf16.msra.mxu0 %v3968_v26  ;;  %v4896_v26 = vpack.c.bf16 %v146_v14, %v139_v13  ;;  %v4006_v13 = vld [vmem:[%s5992_s1 + $0xac] ss:$16 sps:$4 sm:$0xff]  }
  0x70   :  { %1514 = vmatprep.mubr.bf16.mxu0 %v4765_v27  ;;  %1676 = vmatprep.subr.bf16.mxu0 %v3973_v28  ;;  %v4898_v28 = vpack.c.bf16 %v148_v18, %v141_v17  ;;  %v4009_v14 = vld [vmem:[%s5992_s1 + $0x2ac] ss:$16 sps:$4 sm:$0xff]  }
  0x71   :  { %1627 = vmatprep.mubr.bf16.mxu1 %v4770_v29  ;;  %v74_v17 = vld [vmem:[%s5991_s0 + $0x108] sm:$0xff] }
  0x72   :  { %v5011_v40 = vpack.c.bf16 %v81_v20, %v74_v17  ;;  %v87_v20 = vld [vmem:[%s5991_s0 + $0x170] sm:$0xff] }
  0x73   :  { %1677 = vmatpush2.bf16.msra.mxu0 %v3971_v30  ;;  %v3986_v30 = vld [vmem:[%s5992_s1 + $0x520] ss:$16 sps:$4 sm:$0xff]  }
  0x74   :  { %1678 = vmatprep.subr.bf16.mxu0 %v3976_v39  ;;  %v52_v39 = vld [vmem:[%s5991_s0 + $0x58] sm:$0xff] }
  0x76   :  { %1515 = vmatmul.mubr.bf16.gmra.mxu0 %v4806_v44 }
  0x77   :  { %1628 = vmatmul.mubr.bf16.gmra.mxu1 %v4808_v45  ;;  %1679 = vmatpush2.bf16.msra.mxu0 %v3974_v46  ;;  %v3992_v46 = vld [vmem:[%s5992_s1 + $0xe8] ss:$16 sps:$4 sm:$0xff]  }
  0x78   :  { %1524 = vmatprep.mubr.bf16.mxu0 %v4813_v47  ;;  %1680 = vmatprep.subr.bf16.mxu0 %v3979_v48  ;;  %v3995_v48 = vld [vmem:[%s5992_s1 + $0x2e8] ss:$16 sps:$4 sm:$0xff]  }
  0x79   :  { %1637 = vmatprep.mubr.bf16.mxu1 %v4818_v51 }
  0x7b   :  { %1681 = vmatpush2.bf16.msra.mxu0 %v3977_v55  ;;  %v4936_v55 = vpack.c.bf16 %v52_v39, %v45_v37  ;;  %v4010_v37 = vld [vmem:[%s5992_s1 + $0x88] ss:$16 sps:$4 sm:$0xff]  }
  0x7c   :  { %1682 = vmatprep.subr.bf16.mxu0 %v3982_v61  ;;  %v4003_v61 = vld [vmem:[%s5992_s1 + $0x2cc] ss:$16 sps:$4 sm:$0xff]   ;;  %v4013_v39 = vld [vmem:[%s5992_s1 + $0x288] ss:$16 sps:$4 sm:$0xff]  }
  0x7e   :  { %1525 = vmatmul.mubr.bf16.gmra.mxu0 %v4854_v2 }
  0x7f   :  { %1638 = vmatmul.mubr.bf16.gmra.mxu1 %v4856_v5  ;;  %1683 = vmatpush2.bf16.msra.mxu0 %v3980_v7  ;;  %v66_v7 = vld [vmem:[%s5991_s0 + $0xc8] sm:$0xff] }
  0x80   :  { %1534 = vmatprep.mubr.bf16.mxu0 %v4861_v9  ;;  %1684 = vmatprep.subr.bf16.mxu0 %v3985_v10  ;;  %v61_v10 = vld [vmem:[%s5991_s0 + $0xa0] sm:$0xff]  ;;  %v4986_v18 = vpack.c.bf16 %v66_v7, %v59_v1  ;;  %v88_v1 = vld [vmem:[%s5991_s0 + $0x178] sm:$0xff]  ;;  %v95_v7 = vld [vmem:[%s5991_s0 + $0x1b0] sm:$0xff] }
  0x81   :  { %1647 = vmatprep.mubr.bf16.mxu1 %v4866_v11  ;;  %v5064_v17 = vpack.c.bf16 %v95_v7, %v88_v1  ;;  %v4037_v1 = vld [vmem:[%s5992_s1 + $0x208] ss:$16 sps:$4 sm:$0xff]  }
  0x83   :  { %1685 = vmatpush2.bf16.msra.mxu0 %v3983_v12  ;;  %v68_v12 = vld [vmem:[%s5991_s0 + $0xd8] sm:$0xff] }
  0x84   :  { %1686 = vmatprep.subr.bf16.mxu0 %v3988_v19  ;;  %v4988_v19 = vpack.c.bf16 %v68_v12, %v61_v10  ;;  %v4024_v10 = vld [vmem:[%s5992_s1 + $0x4c] ss:$16 sps:$4 sm:$0xff]  }
  0x85   :  { %v4027_v12 = vld [vmem:[%s5992_s1 + $0x24c] ss:$16 sps:$4 sm:$0xff]  }
  0x86   :  { %1535 = vmatmul.mubr.bf16.gmra.mxu0 %v4896_v26 }
  0x87   :  { %1648 = vmatmul.mubr.bf16.gmra.mxu1 %v4898_v28  ;;  %1687 = vmatpush2.bf16.msra.mxu0 %v3986_v30  ;;  %v4007_v30 = vld [vmem:[%s5992_s1 + $0x2a8] ss:$16 sps:$4 sm:$0xff]  }
  0x88   :  { %1690 = vmatprep.mubr.bf16.mxu0 %v4903_v31  ;;  %1688 = vmatprep.subr.bf16.mxu0 %v3991_v32  ;;  %v4012_v32 = vld [vmem:[%s5992_s1 + $0x8c] ss:$16 sps:$4 sm:$0xff]  }
  0x89   :  { %1803 = vmatprep.mubr.bf16.mxu1 %v6000_v42 }
  0x8b   :  { %1689 = vmatpush2.bf16.msra.mxu0 %v3989_v35  ;;  %v4015_v35 = vld [vmem:[%s5992_s1 + $0x28c] ss:$16 sps:$4 sm:$0xff]  }
  0x8c   :  { %1884 = vmatprep.subr.bf16.mxu0 %v3994_v43  ;;  %v80_v43 = vld [vmem:[%s5991_s0 + $0x138] sm:$0xff] }
  0x8e   :  { %1691 = vmatmul.mubr.bf16.vlgmr.msra.gmra.mxu0 %v4936_v55 }
  0x8f   :  { %3664 = vmatmul.mubr.msk.bf16.vlgmr.msra.gmra.mxu1 %vm1407_vm0, %v4938_v57  ;;  %1885 = vmatpush1.bf16.msra.mxu0 %v3992_v46  ;;  %v75_v46 = vld [vmem:[%s5991_s0 + $0x110] sm:$0xff] }
  0x90   :  { %1998 = vmatpush1.bf16.msra.mxu1 %v3995_v48  ;;  %1886 = vmatprep.subr.bf16.mxu0 %v4000_v60  ;;  %v82_v48 = vld [vmem:[%s5991_s0 + $0x148] sm:$0xff] }
  0x91   :  { %1999 = vmatprep.subr.bf16.mxu1 %v4003_v61  ;;  %1700 = vmatprep.mubr.bf16.mxu0 %v4955_v63  ;;  %v4016_v60 = vld [vmem:[%s5992_s1 + $0x68] ss:$16 sps:$4 sm:$0xff]  }
  0x92   :  { %1813 = vmatprep.mubr.bf16.mxu1 %v6000_v42  ;;  %v4019_v61 = vld [vmem:[%s5992_s1 + $0x268] ss:$16 sps:$4 sm:$0xff]  }
  0x93   :  { %1887 = vmatpush1.bf16.msra.mxu0 %v3998_v62  ;;  %v5042_v62 = vpack.c.bf16 %v80_v43, %v73_v41  ;;  %v4031_v41 = vld [vmem:[%s5992_s1 + $0x228] ss:$16 sps:$4 sm:$0xff]  }
  0x94   :  { %2000 = vmatpush1.bf16.msra.mxu1 %v4001_v0  ;;  %1888 = vmatprep.subr.bf16.mxu0 %v4006_v13  ;;  %v5044_v0 = vpack.c.bf16 %v82_v48, %v75_v46  ;;  %v4022_v13 = vld [vmem:[%s5992_s1 + $0x48] ss:$16 sps:$4 sm:$0xff]  }
  0x95   :  { %2001 = vmatprep.subr.bf16.mxu1 %v4009_v14  ;;  %v4025_v14 = vld [vmem:[%s5992_s1 + $0x248] ss:$16 sps:$4 sm:$0xff]  }
  0x96   :  { %1701 = vmatmul.mubr.bf16.gmra.mxu0 %v4986_v18  ;;  %v102_v48 = vld [vmem:[%s5991_s0 + $0x1e8] sm:$0xff] }
  0x97   :  { %3665 = vmatmul.mubr.msk.bf16.gmra.mxu1 %vm1407_vm0, %v4988_v19  ;;  %1889 = vmatpush1.bf16.msra.mxu0 %v4004_v22  ;;  %v94_v22 = vld [vmem:[%s5991_s0 + $0x1a8] sm:$0xff] }
  0x98   :  { %2002 = vmatpush1.bf16.msra.mxu1 %v4007_v30  ;;  %1890 = vmatprep.subr.bf16.mxu0 %v4012_v32  ;;  %v89_v30 = vld [vmem:[%s5991_s0 + $0x180] sm:$0xff]  ;;  %v96_v32 = vld [vmem:[%s5991_s0 + $0x1b8] sm:$0xff]  ;;  %v5095_v43 = vpack.c.bf16 %v94_v22, %v87_v20 }
  0x99   :  { %2003 = vmatprep.subr.bf16.mxu1 %v4015_v35  ;;  %1710 = vmatprep.mubr.bf16.mxu0 %v5011_v40  ;;  %v4030_v35 = vld [vmem:[%s5992_s1 + $0x2c] ss:$16 sps:$4 sm:$0xff]   ;;  %v5097_v46 = vpack.c.bf16 %v96_v32, %v89_v30  ;;  %v4040_v30 = vld [vmem:[%s5992_s1 + $0x1e8] ss:$16 sps:$4 sm:$0xff]  }
  0x9a   :  { %1823 = vmatprep.mubr.bf16.mxu1 %v6000_v42  ;;  %v4042_v20 = vld [vmem:[%s5992_s1 + $0x1ec] ss:$16 sps:$4 sm:$0xff]   ;;  %v4043_v32 = vld [vmem:[%s5992_s1 + $0x3e8] ss:$16 sps:$4 sm:$0xff]  }
  0x9b   :  { %1891 = vmatpush1.bf16.msra.mxu0 %v4010_v37  ;;  %v4033_v37 = vld [vmem:[%s5992_s1 + $0x22c] ss:$16 sps:$4 sm:$0xff]  }
  0x9c   :  { %2004 = vmatpush1.bf16.msra.mxu1 %v4013_v39  ;;  %1892 = vmatprep.subr.bf16.mxu0 %v4018_v58  ;;  %v4028_v39 = vld [vmem:[%s5992_s1 + $0x28] ss:$16 sps:$4 sm:$0xff]   ;;  %v109_v58 = vld [vmem:[%s5991_s0 + $0x220] sm:$0xff]  ;;  %v4045_v22 = vld [vmem:[%s5992_s1 + $0x3ec] ss:$16 sps:$4 sm:$0xff]  }
  0x9d   :  { %2005 = vmatprep.subr.bf16.mxu1 %v4021_v59  ;;  %v4036_v59 = vld [vmem:[%s5992_s1 + $0xc] ss:$16 sps:$4 sm:$0xff]   ;;  %v5117_v7 = vpack.c.bf16 %v109_v58, %v102_v48 }
  0x9e   :  { %1711 = vmatmul.mubr.bf16.gmra.mxu0 %v5042_v62  ;;  %v4048_v48 = vld [vmem:[%s5992_s1 + $0x1cc] ss:$16 sps:$4 sm:$0xff]  }
  0x9f   :  { %3666 = vmatmul.mubr.msk.bf16.gmra.mxu1 %vm1407_vm0, %v5044_v0  ;;  %1893 = vmatpush1.bf16.msra.mxu0 %v4016_v60  ;;  %v4039_v60 = vld [vmem:[%s5992_s1 + $0x20c] ss:$16 sps:$4 sm:$0xff]  }
  0xa0   :  { %2006 = vmatpush1.bf16.msra.mxu1 %v4019_v61  ;;  %1894 = vmatprep.subr.bf16.mxu0 %v4024_v10  ;;  %v4034_v61 = vld [vmem:[%s5992_s1 + $0x8] ss:$16 sps:$4 sm:$0xff]   ;;  %v101_v10 = vld [vmem:[%s5991_s0 + $0x1e0] sm:$0xff]  ;;  %v4051_v58 = vld [vmem:[%s5992_s1 + $0x3cc] ss:$16 sps:$4 sm:$0xff]  }
  0xa1   :  { %2007 = vmatprep.subr.bf16.mxu1 %v4027_v12  ;;  %1720 = vmatprep.mubr.bf16.mxu0 %v5064_v17  ;;  %v108_v12 = vld [vmem:[%s5991_s0 + $0x218] sm:$0xff] }
  0xa2   :  { %1833 = vmatprep.mubr.bf16.mxu1 %v6000_v42 }
  0xa3   :  { %1895 = vmatpush1.bf16.msra.mxu0 %v4022_v13  ;;  %v103_v13 = vld [vmem:[%s5991_s0 + $0x1f0] sm:$0xff] }
  0xa4   :  { %2008 = vmatpush1.bf16.msra.mxu1 %v4025_v14  ;;  %1896 = vmatprep.subr.bf16.mxu0 %v4030_v35  ;;  %v110_v14 = vld [vmem:[%s5991_s0 + $0x228] sm:$0xff]  ;;  %v5148_v35 = vpack.c.bf16 %v108_v12, %v101_v10  ;;  %v117_v12 = vld [vmem:[%s5991_s0 + $0x260] sm:$0xff] }
  0xa5   :  { %2009 = vmatprep.subr.bf16.mxu1 %v4033_v37  ;;  %v5150_v37 = vpack.c.bf16 %v110_v14, %v103_v13  ;;  %v122_v10 = vld [vmem:[%s5991_s0 + $0x288] sm:$0xff]  ;;  %v124_v13 = vld [vmem:[%s5991_s0 + $0x298] sm:$0xff] }
  0xa6   :  { %1721 = vmatmul.mubr.bf16.gmra.mxu0 %v5095_v43  ;;  %v4054_v14 = vld [vmem:[%s5992_s1 + $0x1ac] ss:$16 sps:$4 sm:$0xff]  }
  0xa7   :  { %3667 = vmatmul.mubr.msk.bf16.gmra.mxu1 %vm1407_vm0, %v5097_v46  ;;  %1897 = vmatpush1.bf16.msra.mxu0 %v4028_v39  ;;  %v116_v39 = vld [vmem:[%s5991_s0 + $0x258] sm:$0xff] }
  0xa8   :  { %2010 = vmatpush1.bf16.msra.mxu1 %v4031_v41  ;;  %1898 = vmatprep.subr.bf16.mxu0 %v4036_v59  ;;  %v123_v41 = vld [vmem:[%s5991_s0 + $0x290] sm:$0xff]  ;;  %v4046_v59 = vld [vmem:[%s5992_s1 + $0x1c8] ss:$16 sps:$4 sm:$0xff]  }
  0xa9   :  { %2011 = vmatprep.subr.bf16.mxu1 %v4039_v60  ;;  %1730 = vmatprep.mubr.bf16.mxu0 %v5117_v7  ;;  %v4049_v60 = vld [vmem:[%s5992_s1 + $0x3c8] ss:$16 sps:$4 sm:$0xff]  }
  0xaa   :  { %1843 = vmatprep.mubr.bf16.mxu1 %v6000_v42 }
  0xab   :  { %1899 = vmatpush1.bf16.msra.mxu0 %v4034_v61  ;;  %v5170_v61 = vpack.c.bf16 %v123_v41, %v116_v39  ;;  %v130_v39 = vld [vmem:[%s5991_s0 + $0x2c8] sm:$0xff]  ;;  %v137_v41 = vld [vmem:[%s5991_s0 + $0x300] sm:$0xff] }
  0xac   :  { %2012 = vmatpush1.bf16.msra.mxu1 %v4037_v1  ;;  %1900 = vmatprep.subr.bf16.mxu0 %v4042_v20  ;;  %v115_v1 = vld [vmem:[%s5991_s0 + $0x250] sm:$0xff]  ;;  %v4057_v20 = vld [vmem:[%s5992_s1 + $0x3ac] ss:$16 sps:$4 sm:$0xff]  }
  0xad   :  { %2013 = vmatprep.subr.bf16.mxu1 %v4045_v22  ;;  %v4052_v22 = vld [vmem:[%s5992_s1 + $0x1a8] ss:$16 sps:$4 sm:$0xff]  }
  0xae   :  { %1731 = vmatmul.mubr.bf16.gmra.mxu0 %v5148_v35 }
  0xaf   :  { %3668 = vmatmul.mubr.msk.bf16.gmra.mxu1 %vm1407_vm0, %v5150_v37  ;;  %1901 = vmatpush2.bf16.msra.mxu0 %v4040_v30  ;;  %v5198_v30 = vpack.c.bf16 %v122_v10, %v115_v1  ;;  %v4063_v1 = vld [vmem:[%s5992_s1 + $0x38c] ss:$16 sps:$4 sm:$0xff]   ;;  %v4058_v10 = vld [vmem:[%s5992_s1 + $0x188] ss:$16 sps:$4 sm:$0xff]  }
  0xb0   :  { %2014 = vmatpush2.bf16.msra.mxu1 %v4043_v32  ;;  %1902 = vmatprep.subr.bf16.mxu0 %v4048_v48  ;;  %v5200_v32 = vpack.c.bf16 %v124_v13, %v117_v12  ;;  %v4055_v48 = vld [vmem:[%s5992_s1 + $0x3a8] ss:$16 sps:$4 sm:$0xff]   ;;  %v129_v12 = vld [vmem:[%s5991_s0 + $0x2c0] sm:$0xff] }
  0xb1   :  { %2015 = vmatprep.subr.bf16.mxu1 %v4051_v58  ;;  %1740 = vmatprep.mubr.bf16.mxu0 %v5170_v61  ;;  %6011 = vst [vmem:[#allocation5_spill] sm:$0xff] %v5198_v30  ;;  %v4060_v58 = vld [vmem:[%s5992_s1 + $0x18c] ss:$16 sps:$4 sm:$0xff]  }
  0xb2   :  { %1853 = vmatprep.mubr.bf16.mxu1 %v6000_v42  ;;  %6012 = vst [vmem:[#allocation6_spill] sm:$0xff] %v5200_v32  ;;  %v136_v13 = vld [vmem:[%s5991_s0 + $0x2f8] sm:$0xff] }
  0xb3   :  { %1903 = vmatpush2.bf16.msra.mxu0 %v4046_v59  ;;  %v4061_v59 = vld [vmem:[%s5992_s1 + $0x388] ss:$16 sps:$4 sm:$0xff]  }
  0xb4   :  { %2016 = vmatpush2.bf16.msra.mxu1 %v4049_v60  ;;  %1904 = vmatprep.subr.bf16.mxu0 %v4054_v14  ;;  %v5223_v60 = vpack.c.bf16 %v137_v41, %v130_v39  ;;  %v131_v14 = vld [vmem:[%s5991_s0 + $0x2d0] sm:$0xff]  ;;  %v4066_v39 = vld [vmem:[%s5992_s1 + $0x16c] ss:$16 sps:$4 sm:$0xff]  }
  0xb5   :  { %2017 = vmatprep.subr.bf16.mxu1 %v4057_v20  ;;  %v138_v20 = vld [vmem:[%s5991_s0 + $0x308] sm:$0xff] }
  0xb6   :  { %6013 = vst [vmem:[#allocation7_spill] sm:$0xff] %v5223_v60  ;;  %1741 = vmatmul.mubr.bf16.gmra.mxu0 %v5198_v30  ;;  %v4069_v41 = vld [vmem:[%s5992_s1 + $0x36c] ss:$16 sps:$4 sm:$0xff]   ;;  %v6017_v30 = vmov 0  }
  0xb7   :  { %3669 = vmatmul.mubr.msk.bf16.gmra.mxu1 %vm1407_vm0, %v5200_v32  ;;  %1905 = vmatpush2.bf16.msra.mxu0 %v4052_v22  ;;  %v4064_v22 = vld [vmem:[%s5992_s1 + $0x168] ss:$16 sps:$4 sm:$0xff]   ;;  %v151_v32 = vld [vmem:[%s5991_s0 + $0x370] sm:$0xff] }
  0xb8   :  { %2018 = vmatpush2.bf16.msra.mxu1 %v4055_v48  ;;  %1906 = vmatprep.subr.bf16.mxu0 %v4060_v58  ;;  %v144_v48 = vld [vmem:[%s5991_s0 + $0x338] sm:$0xff]  ;;  %v5254_v58 = vpack.c.bf16 %v136_v13, %v129_v12 }
  0xb9   :  { %2019 = vmatprep.subr.bf16.mxu1 %v4063_v1  ;;  %1750 = vmatprep.mubr.bf16.mxu0 %v5223_v60  ;;  %v5256_v1 = vpack.c.bf16 %v138_v20, %v131_v14  ;;  %v4072_v60 = vld [vmem:[%s5992_s1 + $0x14c] ss:$16 sps:$4 sm:$0xff]   ;;  %v4070_v13 = vld [vmem:[%s5992_s1 + $0x148] ss:$16 sps:$4 sm:$0xff]   ;;  %v143_v14 = vld [vmem:[%s5991_s0 + $0x330] sm:$0xff] }
  0xba   :  { %1863 = vmatprep.mubr.bf16.mxu1 %v6000_v42  ;;  %6014 = vst [vmem:[#allocation8_spill] sm:$0xff] %v5254_v58  ;;  %v4067_v42 = vld [vmem:[%s5992_s1 + $0x368] ss:$16 sps:$4 sm:$0xff]   ;;  %v4075_v12 = vld [vmem:[%s5992_s1 + $0x34c] ss:$16 sps:$4 sm:$0xff]  }
  0xbb   :  { %6015 = vst [vmem:[#allocation9_spill] sm:$0xff] %v5256_v1  ;;  %1907 = vmatpush2.bf16.msra.mxu0 %v4058_v10  ;;  %v4073_v10 = vld [vmem:[%s5992_s1 + $0x348] ss:$16 sps:$4 sm:$0xff]  }
  0xbc   :  { %2020 = vmatpush2.bf16.msra.mxu1 %v4061_v59  ;;  %1908 = vmatprep.subr.bf16.mxu0 %v4066_v39  ;;  %v5276_v59 = vpack.c.bf16 %v151_v32, %v144_v48  ;;  %v150_v20 = vld [vmem:[%s5991_s0 + $0x368] sm:$0xff]  ;;  %v145_v39 = vld [vmem:[%s5991_s0 + $0x340] sm:$0xff] }
  0xbd   :  { %2021 = vmatprep.subr.bf16.mxu1 %v4069_v41  ;;  %v152_v41 = vld [vmem:[%s5991_s0 + $0x378] sm:$0xff] }
  0xbe   :  { %6016 = vst [vmem:[#allocation10_spill] sm:$0xff] %v5276_v59  ;;  %1751 = vmatmul.mubr.bf16.gmra.mxu0 %v5254_v58  ;;  %v4078_v32 = vld [vmem:[%s5992_s1 + $0x12c] ss:$16 sps:$4 sm:$0xff]   ;;  %v4079_v58 = vld [vmem:[%s5992_s1 + $0x328] ss:$16 sps:$4 sm:$0xff]  }
  0xbf   :  { %3670 = vmatmul.mubr.msk.bf16.gmra.mxu1 %vm1407_vm0, %v5256_v1  ;;  %1909 = vmatpush2.bf16.msra.mxu0 %v4064_v22  ;;  %v4081_v48 = vld [vmem:[%s5992_s1 + $0x32c] ss:$16 sps:$4 sm:$0xff]   ;;  %v4076_v1 = vld [vmem:[%s5992_s1 + $0x128] ss:$16 sps:$4 sm:$0xff]   ;;  %v5307_v22 = vpack.c.bf16 %v150_v20, %v143_v14 }
  0xc0   :  { %2022 = vmatpush2.bf16.msra.mxu1 %v4067_v42  ;;  %1910 = vmatprep.subr.bf16.mxu0 %v4072_v60  ;;  %v5309_v42 = vpack.c.bf16 %v152_v41, %v145_v39  ;;  %v4084_v60 = vld [vmem:[%s5992_s1 + $0x10c] ss:$16 sps:$4 sm:$0xff]   ;;  %v4085_v14 = vld [vmem:[%s5992_s1 + $0x308] ss:$16 sps:$4 sm:$0xff]   ;;  %v5468_v41 = vld [vmem:[%s5993_s2] sm:$0xf] }
  0xc1   :  { %2023 = vmatprep.subr.bf16.mxu1 %v4075_v12  ;;  %1760 = vmatprep.mubr.bf16.mxu0 %v5276_v59  ;;  %v4087_v12 = vld [vmem:[%s5992_s1 + $0x30c] ss:$16 sps:$4 sm:$0xff]   ;;  %v4082_v59 = vld [vmem:[%s5992_s1 + $0x108] ss:$16 sps:$4 sm:$0xff]   ;;  %6018 = vst [vmem:[#allocation11_spill] sm:$0xff] %v5468_v41 }
  0xc2   :  { %1873 = vmatprep.mubr.bf16.mxu1 %v6017_v30  ;;  %v4088_v20 = vld [vmem:[%s5992_s1 + $0x4e8] ss:$16 sps:$4 sm:$0xff]  }
  0xc3   :  { %1911 = vmatpush2.bf16.msra.mxu0 %v4070_v13  ;;  %v4090_v13 = vld [vmem:[%s5992_s1 + $0x4ec] ss:$16 sps:$4 sm:$0xff]   ;;  %v4091_v39 = vld [vmem:[%s5992_s1 + $0x608] ss:$16 sps:$4 sm:$0xff]  }
  0xc4   :  { %2024 = vmatpush2.bf16.msra.mxu1 %v4073_v10  ;;  %1912 = vmatprep.subr.bf16.mxu0 %v4078_v32  ;;  %v4093_v10 = vld [vmem:[%s5992_s1 + $0x60c] ss:$16 sps:$4 sm:$0xff]  }
  0xc5   :  { %2025 = vmatprep.subr.bf16.mxu1 %v4081_v48 }
  0xc6   :  { %1761 = vmatmul.mubr.bf16.gmra.mxu0 %v5307_v22 }
  0xc7   :  { %3671 = vmatmul.mubr.msk.bf16.gmra.mxu1 %vm1407_vm0, %v5309_v42  ;;  %1913 = vmatpush2.bf16.msra.mxu0 %v4076_v1  ;;  %v4135_v1 = vld [vmem:[%s5992_s1 + $0x52c] ss:$16 sps:$4 sm:$0xff]  }
  0xc8   :  { %2026 = vmatpush2.bf16.msra.mxu1 %v4079_v58  ;;  %1914 = vmatprep.subr.bf16.mxu0 %v4084_v60  ;;  %v4096_v58 = vld [vmem:[%s5992_s1 + $0x4cc] ss:$16 sps:$4 sm:$0xff]  }
  0xc9   :  { %2027 = vmatprep.subr.bf16.mxu1 %v4087_v12  ;;  %1916 = vmatprep.mubr.bf16.mxu0 %v4479_v53  ;;  %v4094_v53 = vld [vmem:[%s5992_s1 + $0x4c8] ss:$16 sps:$4 sm:$0xff]   ;;  %v4144_v60 = vld [vmem:[#allocation2 + $0x64] ss:$8 sps:$4 sm:$0xff]  }
  0xca   :  { %2029 = vmatprep.mubr.bf16.mxu1 %v4481_v54  ;;  %v4099_v54 = vld [vmem:[%s5992_s1 + $0x4ac] ss:$16 sps:$4 sm:$0xff]  }
  0xcb   :  { %1915 = vmatpush2.bf16.msra.mxu0 %v4082_v59 }
  0xcc   :  { %2028 = vmatpush2.bf16.msra.mxu1 %v4085_v14  ;;  %2110 = vmatprep.subr.bf16.mxu0 %v4090_v13 }
  0xcd   :  { %2237 = vmatprep.subr.bf16.mxu1 %v4093_v10 }
  0xce   :  { %1917 = vmatmul.mubr.bf16.vlgmr.msra.gmra.mxu0 %v4557_v15  ;;  %v4097_v15 = vld [vmem:[%s5992_s1 + $0x4a8] ss:$16 sps:$4 sm:$0xff]  }
  0xcf   :  { %2030 = vmatmul.mubr.bf16.vlgmr.msra.gmra.mxu1 %v4559_v16  ;;  %2111 = vmatpush1.bf16.msra.mxu0 %v4088_v20  ;;  %v4102_v16 = vld [vmem:[%s5992_s1 + $0x48c] ss:$16 sps:$4 sm:$0xff]  }
  0xd0   :  { %2238 = vmatpush1.bf16.msra.mxu1 %v4091_v39  ;;  %2112 = vmatprep.subr.bf16.mxu0 %v4096_v58  ;;  %v4142_v39 = vld [vmem:[#allocation2 + $0x60] ss:$8 sps:$4 sm:$0xff]  }
  0xd1   :  { %1926 = vmatprep.mubr.bf16.mxu0 %v4573_v21  ;;  %2039 = vmatprep.mubr.bf16.mxu1 %v4578_v23  ;;  %v4100_v21 = vld [vmem:[%s5992_s1 + $0x488] ss:$16 sps:$4 sm:$0xff]   ;;  %v4105_v23 = vld [vmem:[%s5992_s1 + $0x46c] ss:$16 sps:$4 sm:$0xff]  }
  0xd3   :  { %2113 = vmatpush1.bf16.msra.mxu0 %v4094_v53 }
  0xd4   :  { %2114 = vmatprep.subr.bf16.mxu0 %v4099_v54  ;;  %v4147_v54 = vld [vmem:[#allocation2 + $0x54] ss:$8 sps:$4 sm:$0xff]  }
  0xd6   :  { %1927 = vmatmul.mubr.bf16.gmra.mxu0 %v4611_v33  ;;  %v4103_v33 = vld [vmem:[%s5992_s1 + $0x468] ss:$16 sps:$4 sm:$0xff]  }
  0xd7   :  { %2040 = vmatmul.mubr.bf16.gmra.mxu1 %v4613_v34  ;;  %2115 = vmatpush1.bf16.msra.mxu0 %v4097_v15  ;;  %v4108_v34 = vld [vmem:[%s5992_s1 + $0x44c] ss:$16 sps:$4 sm:$0xff]  }
  0xd8   :  { %1936 = vmatprep.mubr.bf16.mxu0 %v4618_v36  ;;  %2116 = vmatprep.subr.bf16.mxu0 %v4102_v16  ;;  %v4106_v36 = vld [vmem:[%s5992_s1 + $0x448] ss:$16 sps:$4 sm:$0xff]  }
  0xd9   :  { %2049 = vmatprep.mubr.bf16.mxu1 %v4623_v38  ;;  %v4111_v38 = vld [vmem:[%s5992_s1 + $0x42c] ss:$16 sps:$4 sm:$0xff]  }
  0xdb   :  { %2117 = vmatpush1.bf16.msra.mxu0 %v4100_v21  ;;  %v4145_v21 = vld [vmem:[#allocation2 + $0x50] ss:$8 sps:$4 sm:$0xff]  }
  0xdc   :  { %2118 = vmatprep.subr.bf16.mxu0 %v4105_v23  ;;  %v4150_v23 = vld [vmem:[#allocation2 + $0x44] ss:$8 sps:$4 sm:$0xff]  }
  0xde   :  { %1937 = vmatmul.mubr.bf16.gmra.mxu0 %v4659_v49  ;;  %v4109_v49 = vld [vmem:[%s5992_s1 + $0x428] ss:$16 sps:$4 sm:$0xff]  }
  0xdf   :  { %2050 = vmatmul.mubr.bf16.gmra.mxu1 %v4661_v50  ;;  %2119 = vmatpush1.bf16.msra.mxu0 %v4103_v33  ;;  %v4114_v50 = vld [vmem:[%s5992_s1 + $0x40c] ss:$16 sps:$4 sm:$0xff]  }
  0xe0   :  { %1946 = vmatprep.mubr.bf16.mxu0 %v4666_v52  ;;  %2120 = vmatprep.subr.bf16.mxu0 %v4108_v34  ;;  %v4112_v52 = vld [vmem:[%s5992_s1 + $0x408] ss:$16 sps:$4 sm:$0xff]  }
  0xe1   :  { %2059 = vmatprep.mubr.bf16.mxu1 %v4671_v56  ;;  %v4117_v56 = vld [vmem:[%s5992_s1 + $0x5ec] ss:$16 sps:$4 sm:$0xff]  }
  0xe3   :  { %2121 = vmatpush1.bf16.msra.mxu0 %v4106_v36 }
  0xe4   :  { %2122 = vmatprep.subr.bf16.mxu0 %v4111_v38 }
  0xe6   :  { %1947 = vmatmul.mubr.bf16.gmra.mxu0 %v4707_v3  ;;  %v4115_v3 = vld [vmem:[%s5992_s1 + $0x5e8] ss:$16 sps:$4 sm:$0xff]  }
  0xe7   :  { %2060 = vmatmul.mubr.bf16.gmra.mxu1 %v4709_v4  ;;  %2123 = vmatpush1.bf16.msra.mxu0 %v4109_v49  ;;  %v4120_v4 = vld [vmem:[%s5992_s1 + $0x5cc] ss:$16 sps:$4 sm:$0xff]  }
  0xe8   :  { %1956 = vmatprep.mubr.bf16.mxu0 %v4714_v6  ;;  %2124 = vmatprep.subr.bf16.mxu0 %v4114_v50  ;;  %v4118_v6 = vld [vmem:[%s5992_s1 + $0x5c8] ss:$16 sps:$4 sm:$0xff]  }
  0xe9   :  { %2069 = vmatprep.mubr.bf16.mxu1 %v4719_v8  ;;  %v4123_v8 = vld [vmem:[%s5992_s1 + $0x5ac] ss:$16 sps:$4 sm:$0xff]   ;;  %v4148_v50 = vld [vmem:[#allocation2 + $0x40] ss:$8 sps:$4 sm:$0xff]  }
  0xeb   :  { %2125 = vmatpush1.bf16.msra.mxu0 %v4112_v52 }
  0xec   :  { %2126 = vmatprep.subr.bf16.mxu0 %v4117_v56 }
  0xee   :  { %1957 = vmatmul.mubr.bf16.gmra.mxu0 %v4758_v24  ;;  %v4121_v24 = vld [vmem:[%s5992_s1 + $0x5a8] ss:$16 sps:$4 sm:$0xff]  }
  0xef   :  { %2070 = vmatmul.mubr.bf16.gmra.mxu1 %v4760_v25  ;;  %2127 = vmatpush2.bf16.msra.mxu0 %v4115_v3  ;;  %v4126_v25 = vld [vmem:[%s5992_s1 + $0x58c] ss:$16 sps:$4 sm:$0xff]  }
  0xf0   :  { %1966 = vmatprep.mubr.bf16.mxu0 %v4765_v27  ;;  %2128 = vmatprep.subr.bf16.mxu0 %v4120_v4  ;;  %v4124_v27 = vld [vmem:[%s5992_s1 + $0x588] ss:$16 sps:$4 sm:$0xff]   ;;  %v4153_v3 = vld [vmem:[#allocation2 + $0x34] ss:$8 sps:$4 sm:$0xff]  }
  0xf1   :  { %2079 = vmatprep.mubr.bf16.mxu1 %v4770_v29  ;;  %v4129_v29 = vld [vmem:[%s5992_s1 + $0x56c] ss:$16 sps:$4 sm:$0xff]  }
  0xf3   :  { %2129 = vmatpush2.bf16.msra.mxu0 %v4118_v6 }
  0xf4   :  { %2130 = vmatprep.subr.bf16.mxu0 %v4123_v8 }
  0xf6   :  { %1967 = vmatmul.mubr.bf16.gmra.mxu0 %v4806_v44  ;;  %v4127_v44 = vld [vmem:[%s5992_s1 + $0x568] ss:$16 sps:$4 sm:$0xff]  }
  0xf7   :  { %2080 = vmatmul.mubr.bf16.gmra.mxu1 %v4808_v45  ;;  %2131 = vmatpush2.bf16.msra.mxu0 %v4121_v24  ;;  %v4132_v45 = vld [vmem:[%s5992_s1 + $0x54c] ss:$16 sps:$4 sm:$0xff]   ;;  %v4151_v24 = vld [vmem:[#allocation2 + $0x30] ss:$8 sps:$4 sm:$0xff]  }
  0xf8   :  { %1976 = vmatprep.mubr.bf16.mxu0 %v4813_v47  ;;  %2132 = vmatprep.subr.bf16.mxu0 %v4126_v25  ;;  %v4130_v47 = vld [vmem:[%s5992_s1 + $0x548] ss:$16 sps:$4 sm:$0xff]  }
  0xf9   :  { %2089 = vmatprep.mubr.bf16.mxu1 %v4818_v51  ;;  %v407_v51 = vlaneseq }
  0xfb   :  { %2133 = vmatpush2.bf16.msra.mxu0 %v4124_v27  ;;  %v4156_v27 = vld [vmem:[#allocation2 + $0x24] ss:$8 sps:$4 sm:$0xff]  }
  0xfc   :  { %2134 = vmatprep.subr.bf16.mxu0 %v4129_v29 }
  0xfe   :  { %1977 = vmatmul.mubr.bf16.gmra.mxu0 %v4854_v2  ;;  %v4133_v2 = vld [vmem:[%s5992_s1 + $0x528] ss:$16 sps:$4 sm:$0xff]  }
  0xff   :  { %2090 = vmatmul.mubr.bf16.gmra.mxu1 %v4856_v5  ;;  %2135 = vmatpush2.bf16.msra.mxu0 %v4127_v44  ;;  %v5452_v5 = vshrl.u32 %v407_v51, 7 }
 0x100   :  { %1986 = vmatprep.mubr.bf16.mxu0 %v4861_v9  ;;  %2136 = vmatprep.subr.bf16.mxu0 %v4132_v45  ;;  %v4138_v9 = vld [vmem:[%s5992_s1 + $0x50c] ss:$16 sps:$4 sm:$0xff]  }
 0x101   :  { %2099 = vmatprep.mubr.bf16.mxu1 %v4866_v11  ;;  %v4136_v11 = vld [vmem:[%s5992_s1 + $0x508] ss:$16 sps:$4 sm:$0xff]   ;;  %v6007_v59 = vsub.s32 0, %v5452_v5 }
 0x103   :  { %2137 = vmatpush2.bf16.msra.mxu0 %v4130_v47  ;;  %v5474_v32 = vrot.slane %v5468_v41, %v6007_v59  ;;  %v4189_v47 = vld [vmem:[#allocation2 + $0x174] ss:$8 sps:$4 sm:$0xff]  }
 0x104   :  { %2138 = vmatprep.subr.bf16.mxu0 %v4135_v1  ;;  %3005 = vmatprep.subr.bf16.mxu1 %v4189_v47 }
 0x106   :  { %1987 = vmatmul.mubr.bf16.gmra.mxu0 %v4896_v26  ;;  %v4141_v26 = vld [vmem:[#allocation2 + $0x74] ss:$8 sps:$4 sm:$0xff]  }
 0x107   :  { %2100 = vmatmul.mubr.bf16.gmra.mxu1 %v4898_v28  ;;  %2139 = vmatpush2.bf16.msra.mxu0 %v4133_v2  ;;  %v6008_v28 = vsub.s32 1, %v5452_v5  ;;  %v4154_v2 = vld [vmem:[#allocation2 + $0x20] ss:$8 sps:$4 sm:$0xff]  }
 0x108   :  { %2142 = vmatprep.mubr.bf16.mxu0 %v4903_v31  ;;  %2140 = vmatprep.subr.bf16.mxu0 %v4138_v9  ;;  %v4139_v31 = vld [vmem:[#allocation2 + $0x70] ss:$8 sps:$4 sm:$0xff]  }
 0x109   :  { %2255 = vmatprep.mubr.bf16.mxu1 %v6017_v30  ;;  %v5479_v48 = vrot.slane %v5468_v41, %v6008_v28  ;;  %v4187_v9 = vld [vmem:[#allocation2 + $0x170] ss:$8 sps:$4 sm:$0xff]   ;;  %v4232_v41 = vld [vmem:[#allocation2 + $0x180] ss:$8 sps:$4 sm:$0xff]  }
 0x10b   :  { %2141 = vmatpush2.bf16.msra.mxu0 %v4136_v11 }
 0x10c   :  { %2892 = vmatprep.subr.bf16.mxu0 %v4141_v26 }
 0x10e   :  { %v1466_v12 = vpop.f32.mrf.mxu0  ;;  %2143 = vmatmul.mubr.bf16.vlgmr.msra.gmra.mxu0 %v4936_v55 }
 0x10f   :  { %v1579_v14 = vpop.f32.mrf.mxu1  ;;  %3672 = vmatmul.mubr.msk.bf16.vlgmr.msra.gmra.mxu1 %vm1407_vm0, %v4938_v57  ;;  %v1467_v13 = vadd.f32 %v1466_v12, %v5474_v32  ;;  %2152 = vmatprep.mubr.bf16.mxu0 %v4955_v63  ;;  %v4192_v12 = vld [vmem:[#allocation2 + $0x164] ss:$8 sps:$4 sm:$0xff]  }
 0x110   :  { %2265 = vmatprep.mubr.bf16.mxu1 %v6017_v30  ;;  %v1468_v10 = vpop.f32.mrf.mxu0  ;;  %2893 = vmatpush1.bf16.msra.mxu0 %v4139_v31 }
 0x111   :  { %v1581_v20 = vpop.f32.mrf.mxu1  ;;  %v5487_v58 = vadd.f32 %v1579_v14, %v1467_v13  ;;  %v1469_v53 = vadd.f32 %v1468_v10, %v5479_v48  ;;  %2894 = vmatprep.subr.bf16.mxu0 %v4144_v60  ;;  %3006 = vmatpush1.bf16.msra.mxu1 %v4187_v9  ;;  %v4157_v10 = vld [vmem:[#allocation2 + $0x10] ss:$8 sps:$4 sm:$0xff]  }
 0x112   :  { %v5490_v55 = vpop.f32.mrf.mxu0  ;;  %3007 = vmatprep.subr.bf16.mxu1 %v4192_v12 }
 0x113   :  { %v5492_v15 = vpop.f32.mrf.mxu1  ;;  %v5494_v57 = vadd.f32 %v1581_v20, %v1469_v53  ;;  %v4190_v20 = vld [vmem:[#allocation2 + $0x160] ss:$8 sps:$4 sm:$0xff]   ;;  %v4162_v53 = vld [vmem:[#allocation2 + $0x4] ss:$8 sps:$4 sm:$0xff]  }
 0x114   :  { %v5496_v16 = vpop.f32.mrf.mxu0  ;;  %2895 = vmatpush1.bf16.msra.mxu0 %v4142_v39 }
 0x115   :  { %v5498_v63 = vpop.f32.mrf.mxu1  ;;  %2896 = vmatprep.subr.bf16.mxu0 %v4147_v54  ;;  %3008 = vmatpush1.bf16.msra.mxu1 %v4190_v20  ;;  %v4204_v20 = vld [vmem:[#allocation2 + $0x124] ss:$8 sps:$4 sm:$0xff]  }
 0x116   :  { %v1476_v33 = vpop.f32.mrf.mxu0  ;;  %2153 = vmatmul.mubr.bf16.gmra.mxu0 %v4986_v18 }
 0x117   :  { %v1589_v34 = vpop.f32.mrf.mxu1  ;;  %3673 = vmatmul.mubr.msk.bf16.gmra.mxu1 %vm1407_vm0, %v4988_v19  ;;  %v1477_v36 = vadd.f32 %v1476_v33, %v5474_v32  ;;  %2162 = vmatprep.mubr.bf16.mxu0 %v5011_v40  ;;  %v4195_v33 = vld [vmem:[#allocation2 + $0x154] ss:$8 sps:$4 sm:$0xff]  }
 0x118   :  { %2275 = vmatprep.mubr.bf16.mxu1 %v6017_v30  ;;  %v1478_v38 = vpop.f32.mrf.mxu0  ;;  %2897 = vmatpush1.bf16.msra.mxu0 %v4145_v21 }
 0x119   :  { %v1591_v49 = vpop.f32.mrf.mxu1  ;;  %v5506_v52 = vadd.f32 %v1589_v34, %v1477_v36  ;;  %v1479_v56 = vadd.f32 %v1478_v38, %v5479_v48  ;;  %2898 = vmatprep.subr.bf16.mxu0 %v4150_v23  ;;  %v4160_v38 = vld [vmem:[#allocation2] ss:$8 sps:$4 sm:$0xff]   ;;  %3009 = vmatprep.subr.bf16.mxu1 %v4195_v33 }
 0x11a   :  { %v1480_v18 = vpop.f32.mrf.mxu0 }
 0x11b   :  { %v1593_v4 = vpop.f32.mrf.mxu1  ;;  %v5509_v6 = vadd.f32 %v1591_v49, %v1479_v56  ;;  %v1481_v19 = vadd.f32 %v1480_v18, %v5474_v32  ;;  %v4193_v49 = vld [vmem:[#allocation2 + $0x150] ss:$8 sps:$4 sm:$0xff]   ;;  %v4165_v56 = vld [vmem:[#allocation2 + $0xf4] ss:$8 sps:$4 sm:$0xff]  }
 0x11c   :  { %v5512_v8 = vpop.f32.mrf.mxu0  ;;  %2899 = vmatpush1.bf16.msra.mxu0 %v4148_v50  ;;  %3010 = vmatpush1.bf16.msra.mxu1 %v4193_v49  ;;  %v6019_v49 = vld [vmem:[#allocation5_spill] sm:$0xff] }
 0x11d   :  { %v5514_v40 = vpop.f32.mrf.mxu1  ;;  %v5516_v25 = vadd.f32 %v1593_v4, %v1481_v19  ;;  %2900 = vmatprep.subr.bf16.mxu0 %v4153_v3  ;;  %v4198_v4 = vld [vmem:[#allocation2 + $0x144] ss:$8 sps:$4 sm:$0xff]  }
 0x11e   :  { %v1486_v29 = vpop.f32.mrf.mxu0  ;;  %2163 = vmatmul.mubr.bf16.gmra.mxu0 %v5042_v62  ;;  %v4159_v62 = vld [vmem:[#allocation2 + $0x14] ss:$8 sps:$4 sm:$0xff]   ;;  %3011 = vmatprep.subr.bf16.mxu1 %v4198_v4 }
 0x11f   :  { %v1599_v44 = vpop.f32.mrf.mxu1  ;;  %3674 = vmatmul.mubr.msk.bf16.gmra.mxu1 %vm1407_vm0, %v5044_v0  ;;  %v1487_v45 = vadd.f32 %v1486_v29, %v5474_v32  ;;  %2172 = vmatprep.mubr.bf16.mxu0 %v5064_v17  ;;  %v4196_v29 = vld [vmem:[#allocation2 + $0x140] ss:$8 sps:$4 sm:$0xff]  }
 0x120   :  { %2285 = vmatprep.mubr.bf16.mxu1 %v6017_v30  ;;  %v1488_v51 = vpop.f32.mrf.mxu0  ;;  %2901 = vmatpush1.bf16.msra.mxu0 %v4151_v24 }
 0x121   :  { %v1601_v1 = vpop.f32.mrf.mxu1  ;;  %v5524_v11 = vadd.f32 %v1599_v44, %v1487_v45  ;;  %v1489_v26 = vadd.f32 %v1488_v51, %v5479_v48  ;;  %2902 = vmatprep.subr.bf16.mxu0 %v4156_v27  ;;  %v4163_v27 = vld [vmem:[#allocation2 + $0xf0] ss:$8 sps:$4 sm:$0xff]   ;;  %v4168_v45 = vld [vmem:[#allocation2 + $0xe4] ss:$8 sps:$4 sm:$0xff]   ;;  %3012 = vmatpush1.bf16.msra.mxu1 %v4196_v29 }
 0x122   :  { %v1490_v0 = vpop.f32.mrf.mxu0  ;;  %v4205_v29 = vld [vmem:[#allocation2 + $0x110] ss:$8 sps:$4 sm:$0xff]  }
 0x123   :  { %v1603_v31 = vpop.f32.mrf.mxu1  ;;  %v5527_v60 = vadd.f32 %v1601_v1, %v1489_v26  ;;  %v1491_v17 = vadd.f32 %v1490_v0, %v5474_v32  ;;  %v4199_v0 = vld [vmem:[#allocation2 + $0x130] ss:$8 sps:$4 sm:$0xff]  }
 0x124   :  { %v5530_v14 = vpop.f32.mrf.mxu0  ;;  %2903 = vmatpush1.bf16.msra.mxu0 %v4154_v2  ;;  %v4201_v2 = vld [vmem:[#allocation2 + $0x134] ss:$8 sps:$4 sm:$0xff]  }
 0x125   :  { %v5532_v13 = vpop.f32.mrf.mxu1  ;;  %v5534_v39 = vadd.f32 %v1603_v31, %v1491_v17  ;;  %2904 = vmatprep.subr.bf16.mxu0 %v4159_v62  ;;  %v4166_v62 = vld [vmem:[#allocation2 + $0xe0] ss:$8 sps:$4 sm:$0xff]   ;;  %v4171_v17 = vld [vmem:[#allocation2 + $0xd4] ss:$8 sps:$4 sm:$0xff]   ;;  %3013 = vmatprep.subr.bf16.mxu1 %v4201_v2 }
 0x126   :  { %v1496_v54 = vpop.f32.mrf.mxu0  ;;  %2173 = vmatmul.mubr.bf16.gmra.mxu0 %v5095_v43  ;;  %3014 = vmatpush1.bf16.msra.mxu1 %v4199_v0 }
 0x127   :  { %v1609_v21 = vpop.f32.mrf.mxu1  ;;  %3675 = vmatmul.mubr.msk.bf16.gmra.mxu1 %vm1407_vm0, %v5097_v46  ;;  %v1497_v23 = vadd.f32 %v1496_v54, %v5474_v32  ;;  %2182 = vmatprep.mubr.bf16.mxu0 %v5117_v7 }
 0x128   :  { %2295 = vmatprep.mubr.bf16.mxu1 %v6017_v30  ;;  %v1498_v34 = vpop.f32.mrf.mxu0  ;;  %2905 = vmatpush1.bf16.msra.mxu0 %v4157_v10 }
 0x129   :  { %v1611_v36 = vpop.f32.mrf.mxu1  ;;  %v5542_v50 = vadd.f32 %v1609_v21, %v1497_v23  ;;  %v1499_v43 = vadd.f32 %v1498_v34, %v5479_v48  ;;  %2906 = vmatprep.subr.bf16.mxu0 %v4162_v53  ;;  %v4169_v21 = vld [vmem:[#allocation2 + $0xd0] ss:$8 sps:$4 sm:$0xff]   ;;  %v4202_v23 = vld [vmem:[#allocation2 + $0x120] ss:$8 sps:$4 sm:$0xff]   ;;  %v4174_v34 = vld [vmem:[#allocation2 + $0xc4] ss:$8 sps:$4 sm:$0xff]   ;;  %3015 = vmatprep.subr.bf16.mxu1 %v4204_v20 }
 0x12a   :  { %v1500_v46 = vpop.f32.mrf.mxu0  ;;  %3016 = vmatpush1.bf16.msra.mxu1 %v4202_v23  ;;  %v6022_v23 = vld [vmem:[#allocation8_spill] sm:$0xff] }
 0x12b   :  { %v1613_v3 = vpop.f32.mrf.mxu1  ;;  %v5545_v18 = vadd.f32 %v1611_v36, %v1499_v43  ;;  %v1501_v7 = vadd.f32 %v1500_v46, %v5474_v32  ;;  %v6020_v43 = vld [vmem:[#allocation6_spill] sm:$0xff]  ;;  %v6021_v46 = vld [vmem:[#allocation7_spill] sm:$0xff] }
 0x12c   :  { %v5548_v19 = vpop.f32.mrf.mxu0  ;;  %2907 = vmatpush1.bf16.msra.mxu0 %v4160_v38 }
 0x12d   :  { %v5550_v24 = vpop.f32.mrf.mxu1  ;;  %v5552_v44 = vadd.f32 %v1613_v3, %v1501_v7  ;;  %2908 = vmatprep.subr.bf16.mxu0 %v4165_v56  ;;  %v4207_v3 = vld [vmem:[#allocation2 + $0x114] ss:$8 sps:$4 sm:$0xff]  }
 0x12e   :  { %v1506_v47 = vpop.f32.mrf.mxu0  ;;  %2183 = vmatmul.mubr.bf16.gmra.mxu0 %v5148_v35  ;;  %3017 = vmatprep.subr.bf16.mxu1 %v4207_v3  ;;  %v4211_v3 = vld [vmem:[#allocation2 + $0x1f0] ss:$8 sps:$4 sm:$0xff]  }
 0x12f   :  { %v1619_v51 = vpop.f32.mrf.mxu1  ;;  %3676 = vmatmul.mubr.msk.bf16.gmra.mxu1 %vm1407_vm0, %v5150_v37  ;;  %v1507_v1 = vadd.f32 %v1506_v47, %v5474_v32  ;;  %2192 = vmatprep.mubr.bf16.mxu0 %v5170_v61 }
 0x130   :  { %2305 = vmatprep.mubr.bf16.mxu1 %v6017_v30  ;;  %v1508_v9 = vpop.f32.mrf.mxu0  ;;  %2909 = vmatpush2.bf16.msra.mxu0 %v4163_v27  ;;  %v4172_v27 = vld [vmem:[#allocation2 + $0xc0] ss:$8 sps:$4 sm:$0xff]  }
 0x131   :  { %v1621_v26 = vpop.f32.mrf.mxu1  ;;  %v5560_v31 = vadd.f32 %v1619_v51, %v1507_v1  ;;  %v1509_v35 = vadd.f32 %v1508_v9, %v5479_v48  ;;  %2910 = vmatprep.subr.bf16.mxu0 %v4168_v45  ;;  %v4177_v51 = vld [vmem:[#allocation2 + $0xb4] ss:$8 sps:$4 sm:$0xff]   ;;  %3018 = vmatpush1.bf16.msra.mxu1 %v4205_v29 }
 0x132   :  { %v1510_v37 = vpop.f32.mrf.mxu0 }
 0x133   :  { %v1623_v12 = vpop.f32.mrf.mxu1  ;;  %v5563_v10 = vadd.f32 %v1621_v26, %v1509_v35  ;;  %v1511_v61 = vadd.f32 %v1510_v37, %v5474_v32  ;;  %v4208_v37 = vld [vmem:[#allocation2 + $0x100] ss:$8 sps:$4 sm:$0xff]  }
 0x134   :  { %v5566_v53 = vpop.f32.mrf.mxu0  ;;  %2911 = vmatpush2.bf16.msra.mxu0 %v4166_v62  ;;  %v4210_v62 = vld [vmem:[#allocation2 + $0x104] ss:$8 sps:$4 sm:$0xff]  }
 0x135   :  { %v5568_v54 = vpop.f32.mrf.mxu1  ;;  %v5570_v33 = vadd.f32 %v1623_v12, %v1511_v61  ;;  %2912 = vmatprep.subr.bf16.mxu0 %v4171_v17  ;;  %v4175_v17 = vld [vmem:[#allocation2 + $0xb0] ss:$8 sps:$4 sm:$0xff]   ;;  %v4180_v61 = vld [vmem:[#allocation2 + $0xa4] ss:$8 sps:$4 sm:$0xff]   ;;  %3019 = vmatprep.subr.bf16.mxu1 %v4210_v62 }
 0x136   :  { %v1516_v36 = vpop.f32.mrf.mxu0  ;;  %2193 = vmatmul.mubr.bf16.gmra.mxu0 %v6019_v49  ;;  %v4213_v49 = vld [vmem:[#allocation2 + $0x1f4] ss:$8 sps:$4 sm:$0xff]   ;;  %3020 = vmatpush1.bf16.msra.mxu1 %v4208_v37  ;;  %v4181_v62 = vld [vmem:[#allocation2 + $0x90] ss:$8 sps:$4 sm:$0xff]  }
 0x137   :  { %v1629_v38 = vpop.f32.mrf.mxu1  ;;  %3677 = vmatmul.mubr.msk.bf16.gmra.mxu1 %vm1407_vm0, %v6020_v43  ;;  %v1517_v56 = vadd.f32 %v1516_v36, %v5474_v32  ;;  %2202 = vmatprep.mubr.bf16.mxu0 %v6021_v46  ;;  %v4178_v46 = vld [vmem:[#allocation2 + $0xa0] ss:$8 sps:$4 sm:$0xff]  }
 0x138   :  { %2315 = vmatprep.mubr.bf16.mxu1 %v6017_v30  ;;  %v1518_v7 = vpop.f32.mrf.mxu0  ;;  %2913 = vmatpush2.bf16.msra.mxu0 %v4169_v21 }
 0x139   :  { %v1631_v4 = vpop.f32.mrf.mxu1  ;;  %v5578_v45 = vadd.f32 %v1629_v38, %v1517_v56  ;;  %v1519_v47 = vadd.f32 %v1518_v7, %v5479_v48  ;;  %2914 = vmatprep.subr.bf16.mxu0 %v4174_v34  ;;  %v6023_v34 = vld [vmem:[#allocation9_spill] sm:$0xff]  ;;  %v6024_v38 = vld [vmem:[#allocation10_spill] sm:$0xff]  ;;  %3021 = vmatprep.subr.bf16.mxu1 %v4213_v49 }
 0x13a   :  { %v1520_v1 = vpop.f32.mrf.mxu0  ;;  %3022 = vmatpush2.bf16.msra.mxu1 %v4211_v3  ;;  %v4184_v49 = vld [vmem:[#allocation2 + $0x80] ss:$8 sps:$4 sm:$0xff]  }
 0x13b   :  { %v1633_v2 = vpop.f32.mrf.mxu1  ;;  %v5581_v9 = vadd.f32 %v1631_v4, %v1519_v47  ;;  %v1521_v26 = vadd.f32 %v1520_v1, %v5474_v32  ;;  %v4216_v1 = vld [vmem:[#allocation2 + $0x1e4] ss:$8 sps:$4 sm:$0xff]  }
 0x13c   :  { %v5584_v0 = vpop.f32.mrf.mxu0  ;;  %2915 = vmatpush2.bf16.msra.mxu0 %v4172_v27  ;;  %v4183_v27 = vld [vmem:[#allocation2 + $0x94] ss:$8 sps:$4 sm:$0xff]   ;;  %3023 = vmatprep.subr.bf16.mxu1 %v4216_v1  ;;  %v1471_v1 = vadd.f32 %v5490_v55, %v5474_v32 }
 0x13d   :  { %v5586_v35 = vpop.f32.mrf.mxu1  ;;  %v5588_v12 = vadd.f32 %v1633_v2, %v1521_v26  ;;  %2916 = vmatprep.subr.bf16.mxu0 %v4177_v51 }
 0x13e   :  { %v1526_v20 = vpop.f32.mrf.mxu0  ;;  %2203 = vmatmul.mubr.bf16.gmra.mxu0 %v6022_v23 }
 0x13f   :  { %v1639_v21 = vpop.f32.mrf.mxu1  ;;  %3678 = vmatmul.mubr.msk.bf16.gmra.mxu1 %vm1407_vm0, %v6023_v34  ;;  %v1527_v36 = vadd.f32 %v1526_v20, %v5474_v32  ;;  %2212 = vmatprep.mubr.bf16.mxu0 %v6024_v38  ;;  %v4219_v34 = vld [vmem:[#allocation2 + $0x1d4] ss:$8 sps:$4 sm:$0xff]  }
 0x140   :  { %2325 = vmatprep.mubr.bf16.mxu1 %v6017_v30  ;;  %v1528_v43 = vpop.f32.mrf.mxu0  ;;  %2917 = vmatpush2.bf16.msra.mxu0 %v4175_v17  ;;  %v4214_v17 = vld [vmem:[#allocation2 + $0x1e0] ss:$8 sps:$4 sm:$0xff]  }
 0x141   :  { %v1641_v56 = vpop.f32.mrf.mxu1  ;;  %v5596_v7 = vadd.f32 %v1639_v21, %v1527_v36  ;;  %v1529_v4 = vadd.f32 %v1528_v43, %v5479_v48  ;;  %2918 = vmatprep.subr.bf16.mxu0 %v4180_v61  ;;  %v4186_v61 = vld [vmem:[#allocation2 + $0x84] ss:$8 sps:$4 sm:$0xff]   ;;  %3024 = vmatpush2.bf16.msra.mxu1 %v4214_v17  ;;  %v4217_v43 = vld [vmem:[#allocation2 + $0x1d0] ss:$8 sps:$4 sm:$0xff]  }
 0x142   :  { %v1530_v29 = vpop.f32.mrf.mxu0  ;;  %3025 = vmatprep.subr.bf16.mxu1 %v4219_v34 }
 0x143   :  { %v1643_v47 = vpop.f32.mrf.mxu1  ;;  %v5599_v51 = vadd.f32 %v1641_v56, %v1529_v4  ;;  %v1531_v30 = vadd.f32 %v1530_v29, %v5474_v32 }
 0x144   :  { %v5602_v2 = vpop.f32.mrf.mxu0  ;;  %2919 = vmatpush2.bf16.msra.mxu0 %v4178_v46 }
 0x145   :  { %v5604_v26 = vpop.f32.mrf.mxu1  ;;  %v5606_v37 = vadd.f32 %v1643_v47, %v1531_v30  ;;  %2920 = vmatprep.subr.bf16.mxu0 %v4183_v27  ;;  %v4222_v27 = vld [vmem:[#allocation2 + $0x1c4] ss:$8 sps:$4 sm:$0xff]   ;;  %3026 = vmatpush2.bf16.msra.mxu1 %v4217_v43  ;;  %v4220_v30 = vld [vmem:[#allocation2 + $0x1c0] ss:$8 sps:$4 sm:$0xff]  }
 0x146   :  { %v1536_v20 = vpop.f32.mrf.mxu0  ;;  %2213 = vmatmul.mubr.bf16.gmra.mxu0 %v5307_v22  ;;  %3027 = vmatprep.subr.bf16.mxu1 %v4222_v27 }
 0x147   :  { %v1649_v21 = vpop.f32.mrf.mxu1  ;;  %3679 = vmatmul.mubr.msk.bf16.gmra.mxu1 %vm1407_vm0, %v5309_v42  ;;  %v1537_v23 = vadd.f32 %v1536_v20, %v5474_v32  ;;  %v1473_v20 = vadd.f32 %v5496_v16, %v5479_v48 }
 0x148   :  { %v1538_v36 = vpop.f32.mrf.mxu0  ;;  %2921 = vmatpush2.bf16.msra.mxu0 %v4181_v62 }
 0x149   :  { %v1651_v38 = vpop.f32.mrf.mxu1  ;;  %v5612_v56 = vadd.f32 %v1649_v21, %v1537_v23  ;;  %v1539_v46 = vadd.f32 %v1538_v36, %v5479_v48  ;;  %2922 = vmatprep.subr.bf16.mxu0 %v4186_v61  ;;  %v4225_v21 = vld [vmem:[#allocation2 + $0x1b4] ss:$8 sps:$4 sm:$0xff]   ;;  %3028 = vmatpush2.bf16.msra.mxu1 %v4220_v30 }
 0x14a   :  { %v1540_v3 = vpop.f32.mrf.mxu0  ;;  %3029 = vmatprep.subr.bf16.mxu1 %v4225_v21 }
 0x14b   :  { %v1653_v22 = vpop.f32.mrf.mxu1  ;;  %v5615_v4 = vadd.f32 %v1651_v38, %v1539_v46  ;;  %v1541_v42 = vadd.f32 %v1540_v3, %v5474_v32  ;;  %v4223_v38 = vld [vmem:[#allocation2 + $0x1b0] ss:$8 sps:$4 sm:$0xff]   ;;  %v1586_v46 = vadd.f32 %v5498_v63, %v1473_v20  ;;  %v4231_v20 = vld [vmem:[#allocation2 + $0x194] ss:$8 sps:$4 sm:$0xff]  }
 0x14c   :  { %v5618_v29 = vpop.f32.mrf.mxu0  ;;  %2923 = vmatpush2.bf16.msra.mxu0 %v4184_v49  ;;  %v1584_v49 = vadd.f32 %v5492_v15, %v1471_v1  ;;  %v1483_v15 = vadd.f32 %v5512_v8, %v5479_v48 }
 0x14d   :  { %v5620_v47 = vpop.f32.mrf.mxu1  ;;  %v5624_v62 = vadd.f32 %v1653_v22, %v1541_v42  ;;  %v4228_v42 = vld [vmem:[#allocation2 + $0x1a4] ss:$8 sps:$4 sm:$0xff]   ;;  %3030 = vmatpush2.bf16.msra.mxu1 %v4223_v38  ;;  %v4229_v38 = vld [vmem:[#allocation2 + $0x190] ss:$8 sps:$4 sm:$0xff]  }
 0x14e   :  { %6025 = vst [vmem:[#allocation5_spill] sm:$0xff] %v5620_v47  ;;  %v1692_v17 = vpop.f32.mrf.mxu0  ;;  %3031 = vmatprep.subr.bf16.mxu1 %v4228_v42 }
 0x14f   :  { %6026 = vst [vmem:[#allocation6_spill] sm:$0xff] %v5624_v62  ;;  %v1805_v61 = vpop.f32.mrf.mxu1  ;;  %v1693_v23 = vadd.f32 %v1692_v17, %v5487_v58  ;;  %v4226_v58 = vld [vmem:[#allocation2 + $0x1a0] ss:$8 sps:$4 sm:$0xff]  }
 0x150   :  { %v1694_v34 = vpop.f32.mrf.mxu0 }
 0x151   :  { %v1807_v36 = vpop.f32.mrf.mxu1  ;;  %v1695_v43 = vadd.f32 %v1694_v34, %v5494_v57  ;;  %v1806_v16 = vadd.f32 %v1805_v61, %v1693_v23  ;;  %3032 = vmatpush2.bf16.msra.mxu1 %v4226_v58 }
 0x152   :  { %v1696_v32 = vpop.f32.mrf.mxu0  ;;  %3033 = vmatprep.subr.bf16.mxu1 %v4231_v20 }
 0x153   :  { %v1809_v55 = vpop.f32.mrf.mxu1  ;;  %v1808_v3 = vadd.f32 %v1807_v36, %v1695_v43  ;;  %v1697_v22 = vadd.f32 %v1696_v32, %v1584_v49  ;;  %v2336_v36 = vmul.f32 0.2, %v1806_v16 }
 0x154   :  { %v1698_v27 = vpop.f32.mrf.mxu0 }
 0x155   :  { %v1811_v59 = vpop.f32.mrf.mxu1  ;;  %v1810_v17 = vadd.f32 %v1809_v55, %v1697_v22  ;;  %v1699_v30 = vadd.f32 %v1698_v27, %v1586_v46  ;;  %v2337_v21 = vmul.f32 0.2, %v1808_v3  ;;  %v1596_v22 = vadd.f32 %v5514_v40, %v1483_v15  ;;  %v4234_v27 = vld [vmem:[#allocation2 + $0x184] ss:$8 sps:$4 sm:$0xff]   ;;  %3034 = vmatpush2.bf16.msra.mxu1 %v4229_v38 }
 0x156   :  { %v1702_v57 = vpop.f32.mrf.mxu0  ;;  %3035 = vmatprep.subr.bf16.mxu1 %v4234_v27 }
 0x157   :  { %v1815_v1 = vpop.f32.mrf.mxu1  ;;  %v2340_v34 = vmul.f32 0.2, %v1810_v17  ;;  %v1812_v28 = vadd.f32 %v1811_v59, %v1699_v30  ;;  %v1703_v63 = vadd.f32 %v1702_v57, %v5506_v52  ;;  %v2401_v42 = vmax.f32 %v1808_v3, %v2337_v21 }
 0x158   :  { %v1704_v61 = vpop.f32.mrf.mxu0  ;;  %v2400_v52 = vmax.f32 %v1806_v16, %v2336_v36 }
 0x159   :  { %v1817_v23 = vpop.f32.mrf.mxu1  ;;  %v2341_v49 = vmul.f32 0.2, %v1812_v28  ;;  %v1705_v43 = vadd.f32 %v1704_v61, %v5509_v6  ;;  %v2404_v32 = vmax.f32 %v1810_v17, %v2340_v34  ;;  %v1816_v55 = vadd.f32 %v1815_v1, %v1703_v63  ;;  %3036 = vmatpush2.bf16.msra.mxu1 %v4232_v41 }
 0x15a   :  { %v1706_v8 = vpop.f32.mrf.mxu0 }
 0x15b   :  { %v1819_v46 = vpop.f32.mrf.mxu1  ;;  %v2405_v59 = vmax.f32 %v1812_v28, %v2341_v49  ;;  %v1818_v30 = vadd.f32 %v1817_v23, %v1705_v43  ;;  %v1707_v57 = vadd.f32 %v1706_v8, %v5516_v25  ;;  %v2464_v17 = vpack.c.bf16 %v2404_v32, %v2400_v52 }
 0x15c   :  { %v1708_v62 = vpop.f32.mrf.mxu0  ;;  %v2344_v1 = vmul.f32 0.2, %v1816_v55  ;;  %v1493_v28 = vadd.f32 %v5530_v14, %v5479_v48 }
 0x15d   :  { %v1821_v58 = vpop.f32.mrf.mxu1  ;;  %v1709_v47 = vadd.f32 %v1708_v62, %v1596_v22  ;;  %v2465_v6 = vpack.c.bf16 %v2405_v59, %v2401_v42  ;;  %v1820_v34 = vadd.f32 %v1819_v46, %v1707_v57  ;;  %v2345_v25 = vmul.f32 0.2, %v1818_v30 }
 0x15e   :  { %v1712_v63 = vpop.f32.mrf.mxu0  ;;  %v2408_v23 = vmax.f32 %v1816_v55, %v2344_v1  ;;  %v1606_v14 = vadd.f32 %v5532_v13, %v1493_v28 }
 0x15f   :  { %v1825_v20 = vpop.f32.mrf.mxu1  ;;  %v1822_v40 = vadd.f32 %v1821_v58, %v1709_v47  ;;  %v1713_v3 = vadd.f32 %v1712_v63, %v5524_v11  ;;  %2924 = vmatprep.mubr.bf16.mxu0 %v2465_v6  ;;  %v2348_v16 = vmul.f32 0.2, %v1820_v34  ;;  %v2409_v8 = vmax.f32 %v1818_v30, %v2345_v25 }
 0x160   :  { %v1714_v15 = vpop.f32.mrf.mxu0  ;;  %2925 = vmatmul.mubr.bf16.vlgmr.msra.gmra.mxu0 %v2464_v17 }
 0x161   :  { %v1827_v21 = vpop.f32.mrf.mxu1  ;;  %v2349_v62 = vmul.f32 0.2, %v1822_v40  ;;  %v1826_v36 = vadd.f32 %v1825_v20, %v1713_v3  ;;  %v1715_v61 = vadd.f32 %v1714_v15, %v5527_v60  ;;  %v2412_v38 = vmax.f32 %v1820_v34, %v2348_v16 }
 0x162   :  { %v1716_v49 = vpop.f32.mrf.mxu0  ;;  %v1503_v60 = vadd.f32 %v5548_v19, %v5479_v48 }
 0x163   :  { %v1829_v43 = vpop.f32.mrf.mxu1  ;;  %v2413_v47 = vmax.f32 %v1822_v40, %v2349_v62  ;;  %v1828_v32 = vadd.f32 %v1827_v21, %v1715_v61  ;;  %v1717_v11 = vadd.f32 %v1716_v49, %v5534_v39  ;;  %v2468_v46 = vpack.c.bf16 %v2412_v38, %v2408_v23 }
 0x164   :  { %v1718_v22 = vpop.f32.mrf.mxu0  ;;  %v2352_v59 = vmul.f32 0.2, %v1826_v36  ;;  %v1616_v3 = vadd.f32 %v5550_v24, %v1503_v60 }
 0x165   :  { %v1831_v42 = vpop.f32.mrf.mxu1  ;;  %v1830_v41 = vadd.f32 %v1829_v43, %v1717_v11  ;;  %v1719_v27 = vadd.f32 %v1718_v22, %v1606_v14  ;;  %v2469_v57 = vpack.c.bf16 %v2413_v47, %v2409_v8  ;;  %v2353_v58 = vmul.f32 0.2, %v1828_v32 }
 0x166   :  { %v1722_v55 = vpop.f32.mrf.mxu0  ;;  %v2416_v1 = vmax.f32 %v1826_v36, %v2352_v59  ;;  %v1513_v14 = vadd.f32 %v5566_v53, %v5479_v48 }
 0x167   :  { %v1835_v52 = vpop.f32.mrf.mxu1  ;;  %v2356_v6 = vmul.f32 0.2, %v1830_v41  ;;  %v1832_v13 = vadd.f32 %v1831_v42, %v1719_v27  ;;  %v1723_v17 = vadd.f32 %v1722_v55, %v5542_v50  ;;  %2934 = vmatprep.mubr.bf16.mxu0 %v2469_v57  ;;  %v2417_v25 = vmax.f32 %v1828_v32, %v2353_v58 }
 0x168   :  { %v1724_v39 = vpop.f32.mrf.mxu0  ;;  %2935 = vmatmul.mubr.bf16.gmra.mxu0 %v2468_v46  ;;  %v1626_v55 = vadd.f32 %v5568_v54, %v1513_v14 }
 0x169   :  { %v1837_v30 = vpop.f32.mrf.mxu1  ;;  %v2420_v34 = vmax.f32 %v1830_v41, %v2356_v6  ;;  %v2357_v63 = vmul.f32 0.2, %v1832_v13  ;;  %v1725_v20 = vadd.f32 %v1724_v39, %v5545_v18  ;;  %v1836_v28 = vadd.f32 %v1835_v52, %v1723_v17 }
 0x16a   :  { %v1726_v40 = vpop.f32.mrf.mxu0 }
 0x16b   :  { %v1839_v19 = vpop.f32.mrf.mxu1  ;;  %v2472_v16 = vpack.c.bf16 %v2420_v34, %v2416_v1  ;;  %v2421_v15 = vmax.f32 %v1832_v13, %v2357_v63  ;;  %v1838_v21 = vadd.f32 %v1837_v30, %v1725_v20  ;;  %v1727_v50 = vadd.f32 %v1726_v40, %v5552_v44 }
 0x16c   :  { %v1728_v62 = vpop.f32.mrf.mxu0  ;;  %v2360_v38 = vmul.f32 0.2, %v1836_v28 }
 0x16d   :  { %v1841_v61 = vpop.f32.mrf.mxu1  ;;  %v1729_v23 = vadd.f32 %v1728_v62, %v1616_v3  ;;  %v2473_v36 = vpack.c.bf16 %v2421_v15, %v2417_v25  ;;  %v1840_v49 = vadd.f32 %v1839_v19, %v1727_v50  ;;  %v2361_v32 = vmul.f32 0.2, %v1838_v21 }
 0x16e   :  { %v1732_v43 = vpop.f32.mrf.mxu0  ;;  %v2424_v59 = vmax.f32 %v1836_v28, %v2360_v38 }
 0x16f   :  { %v1845_v18 = vpop.f32.mrf.mxu1  ;;  %v1842_v47 = vadd.f32 %v1841_v61, %v1729_v23  ;;  %v1733_v24 = vadd.f32 %v1732_v43, %v5560_v31  ;;  %2944 = vmatprep.mubr.bf16.mxu0 %v2473_v36  ;;  %v2364_v11 = vmul.f32 0.2, %v1840_v49  ;;  %v2425_v57 = vmax.f32 %v1838_v21, %v2361_v32 }
 0x170   :  { %v1734_v8 = vpop.f32.mrf.mxu0  ;;  %2945 = vmatmul.mubr.bf16.gmra.mxu0 %v2472_v16 }
 0x171   :  { %v1847_v46 = vpop.f32.mrf.mxu1  ;;  %v2365_v44 = vmul.f32 0.2, %v1842_v47  ;;  %v1846_v22 = vadd.f32 %v1845_v18, %v1733_v24  ;;  %v1735_v42 = vadd.f32 %v1734_v8, %v5563_v10  ;;  %v2428_v41 = vmax.f32 %v1840_v49, %v2364_v11 }
 0x172   :  { %v1736_v27 = vpop.f32.mrf.mxu0  ;;  %v1523_v10 = vadd.f32 %v5584_v0, %v5479_v48  ;;  %v1533_v11 = vadd.f32 %v5602_v2, %v5479_v48 }
 0x173   :  { %v1849_v60 = vpop.f32.mrf.mxu1  ;;  %v2429_v53 = vmax.f32 %v1842_v47, %v2365_v44  ;;  %v1848_v52 = vadd.f32 %v1847_v46, %v1735_v42  ;;  %v1737_v31 = vadd.f32 %v1736_v27, %v5570_v33  ;;  %v2476_v58 = vpack.c.bf16 %v2428_v41, %v2424_v59 }
 0x174   :  { %v1738_v6 = vpop.f32.mrf.mxu0  ;;  %v2368_v17 = vmul.f32 0.2, %v1846_v22  ;;  %v1636_v62 = vadd.f32 %v5586_v35, %v1523_v10 }
 0x175   :  { %v1851_v13 = vpop.f32.mrf.mxu1  ;;  %v1850_v39 = vadd.f32 %v1849_v60, %v1737_v31  ;;  %v1739_v30 = vadd.f32 %v1738_v6, %v1626_v55  ;;  %v2477_v63 = vpack.c.bf16 %v2429_v53, %v2425_v57  ;;  %v2369_v20 = vmul.f32 0.2, %v1848_v52 }
 0x176   :  { %v1742_v1 = vpop.f32.mrf.mxu0  ;;  %v2432_v3 = vmax.f32 %v1846_v22, %v2368_v17 }
 0x177   :  { %v1855_v34 = vpop.f32.mrf.mxu1  ;;  %v2372_v28 = vmul.f32 0.2, %v1850_v39  ;;  %v1852_v54 = vadd.f32 %v1851_v13, %v1739_v30  ;;  %v1743_v40 = vadd.f32 %v1742_v1, %v5578_v45  ;;  %2954 = vmatprep.mubr.bf16.mxu0 %v2477_v63  ;;  %v2433_v61 = vmax.f32 %v1848_v52, %v2369_v20 }
 0x178   :  { %v1744_v33 = vpop.f32.mrf.mxu0  ;;  %2955 = vmatmul.mubr.bf16.gmra.mxu0 %v2476_v58  ;;  %v1646_v52 = vadd.f32 %v5604_v26, %v1533_v11  ;;  %v417_v63 = vsub.s32 2, %v5452_v5 }
 0x179   :  { %v1857_v19 = vpop.f32.mrf.mxu1  ;;  %v2436_v25 = vmax.f32 %v1850_v39, %v2372_v28  ;;  %v2373_v16 = vmul.f32 0.2, %v1852_v54  ;;  %v1745_v15 = vadd.f32 %v1744_v33, %v5581_v9  ;;  %v1856_v21 = vadd.f32 %v1855_v34, %v1743_v40 }
 0x17a   :  { %v1746_v50 = vpop.f32.mrf.mxu0  ;;  %v421_v33 = vsub.s32 3, %v5452_v5 }
 0x17b   :  { %v1859_v0 = vpop.f32.mrf.mxu1  ;;  %v2480_v23 = vpack.c.bf16 %v2436_v25, %v2432_v3  ;;  %v2437_v36 = vmax.f32 %v1852_v54, %v2373_v16  ;;  %v1858_v38 = vadd.f32 %v1857_v19, %v1745_v15  ;;  %v1747_v45 = vadd.f32 %v1746_v50, %v5588_v12 }
 0x17c   :  { %v1748_v49 = vpop.f32.mrf.mxu0  ;;  %v2376_v47 = vmul.f32 0.2, %v1856_v21 }
 0x17d   :  { %v1861_v43 = vpop.f32.mrf.mxu1  ;;  %v1749_v18 = vadd.f32 %v1748_v49, %v1636_v62  ;;  %v2481_v14 = vpack.c.bf16 %v2437_v36, %v2433_v61  ;;  %v1860_v24 = vadd.f32 %v1859_v0, %v1747_v45  ;;  %v2377_v46 = vmul.f32 0.2, %v1858_v38  ;;  %v6028_v0 = vld [vmem:[#allocation11_spill] sm:$0xff] }
 0x17e   :  { %v1752_v32 = vpop.f32.mrf.mxu0  ;;  %v2440_v27 = vmax.f32 %v1856_v21, %v2376_v47  ;;  %v5676_v62 = vrot.slane %v6028_v0, %v417_v63 }
 0x17f   :  { %v1865_v9 = vpop.f32.mrf.mxu1  ;;  %v1862_v8 = vadd.f32 %v1861_v43, %v1749_v18  ;;  %v1753_v35 = vadd.f32 %v1752_v32, %v5596_v7  ;;  %2964 = vmatprep.mubr.bf16.mxu0 %v2481_v14  ;;  %v2380_v44 = vmul.f32 0.2, %v1860_v24  ;;  %v2441_v57 = vmax.f32 %v1858_v38, %v2377_v46  ;;  %v6029_v38 = vld [vmem:[#allocation6_spill] sm:$0xff] }
 0x180   :  { %v1754_v22 = vpop.f32.mrf.mxu0  ;;  %2965 = vmatmul.mubr.bf16.gmra.mxu0 %v2480_v23 }
 0x181   :  { %v1867_v42 = vpop.f32.mrf.mxu1  ;;  %v2381_v12 = vmul.f32 0.2, %v1862_v8  ;;  %v1866_v59 = vadd.f32 %v1865_v9, %v1753_v35  ;;  %v1755_v41 = vadd.f32 %v1754_v22, %v5599_v51  ;;  %v2444_v60 = vmax.f32 %v1860_v24, %v2380_v44 }
 0x182   :  { %v1756_v55 = vpop.f32.mrf.mxu0  ;;  %v1543_v51 = vadd.f32 %v5618_v29, %v5479_v48  ;;  %v6027_v29 = vld [vmem:[#allocation5_spill] sm:$0xff] }
 0x183   :  { %v1869_v53 = vpop.f32.mrf.mxu1  ;;  %v2445_v2 = vmax.f32 %v1862_v8, %v2381_v12  ;;  %v1868_v31 = vadd.f32 %v1867_v42, %v1755_v41  ;;  %v1757_v7 = vadd.f32 %v1756_v55, %v5606_v37  ;;  %v2484_v58 = vpack.c.bf16 %v2444_v60, %v2440_v27 }
 0x184   :  { %v1758_v6 = vpop.f32.mrf.mxu0  ;;  %v2384_v17 = vmul.f32 0.2, %v1866_v59  ;;  %v1656_v16 = vadd.f32 %v6027_v29, %v1543_v51 }
 0x185   :  { %v1871_v13 = vpop.f32.mrf.mxu1  ;;  %v1870_v39 = vadd.f32 %v1869_v53, %v1757_v7  ;;  %v1759_v30 = vadd.f32 %v1758_v6, %v1646_v52  ;;  %v2485_v34 = vpack.c.bf16 %v2445_v2, %v2441_v57  ;;  %v2385_v26 = vmul.f32 0.2, %v1868_v31 }
 0x186   :  { %v1762_v10 = vpop.f32.mrf.mxu0  ;;  %v2448_v19 = vmax.f32 %v1866_v59, %v2384_v17 }
 0x187   :  { %v1875_v1 = vpop.f32.mrf.mxu1  ;;  %v2388_v20 = vmul.f32 0.2, %v1870_v39  ;;  %v1872_v28 = vadd.f32 %v1871_v13, %v1759_v30  ;;  %v1763_v37 = vadd.f32 %v1762_v10, %v5612_v56  ;;  %2974 = vmatprep.mubr.bf16.mxu0 %v2485_v34  ;;  %v2449_v56 = vmax.f32 %v1868_v31, %v2385_v26 }
 0x188   :  { %v1764_v54 = vpop.f32.mrf.mxu0  ;;  %2975 = vmatmul.mubr.bf16.gmra.mxu0 %v2484_v58 }
 0x189   :  { %v1877_v40 = vpop.f32.mrf.mxu1  ;;  %v2452_v3 = vmax.f32 %v1870_v39, %v2388_v20  ;;  %v2389_v25 = vmul.f32 0.2, %v1872_v28  ;;  %v1765_v48 = vadd.f32 %v1764_v54, %v5615_v4  ;;  %v1876_v15 = vadd.f32 %v1875_v1, %v1763_v37 }
 0x18a   :  { %v1766_v21 = vpop.f32.mrf.mxu0  ;;  %v5680_v4 = vrot.slane %v6028_v0, %v421_v33 }
 0x18b   :  { %v1879_v50 = vpop.f32.mrf.mxu1  ;;  %v2488_v61 = vpack.c.bf16 %v2452_v3, %v2448_v19  ;;  %v2453_v23 = vmax.f32 %v1872_v28, %v2389_v25  ;;  %v1878_v36 = vadd.f32 %v1877_v40, %v1765_v48  ;;  %v1767_v45 = vadd.f32 %v1766_v21, %v6029_v38 }
 0x18c   :  { %v1768_v49 = vpop.f32.mrf.mxu0  ;;  %v2392_v47 = vmul.f32 0.2, %v1876_v15 }
 0x18d   :  { %v1881_v43 = vpop.f32.mrf.mxu1  ;;  %v1769_v18 = vadd.f32 %v1768_v49, %v1656_v16  ;;  %v2489_v14 = vpack.c.bf16 %v2453_v23, %v2449_v56  ;;  %v1880_v24 = vadd.f32 %v1879_v50, %v1767_v45  ;;  %v2393_v11 = vmul.f32 0.2, %v1878_v36 }
 0x18e   :  { %v1918_v32 = vpop.f32.mrf.mxu0  ;;  %v2456_v41 = vmax.f32 %v1876_v15, %v2392_v47 }
 0x18f   :  { %v2031_v9 = vpop.f32.mrf.mxu1  ;;  %v1882_v8 = vadd.f32 %v1881_v43, %v1769_v18  ;;  %v1919_v35 = vadd.f32 %v1918_v32, %v5676_v62  ;;  %2984 = vmatprep.mubr.bf16.mxu0 %v2489_v14  ;;  %v2396_v46 = vmul.f32 0.2, %v1880_v24  ;;  %v2457_v53 = vmax.f32 %v1878_v36, %v2393_v11 }
 0x190   :  { %v1920_v44 = vpop.f32.mrf.mxu0  ;;  %2985 = vmatmul.mubr.bf16.gmra.mxu0 %v2488_v61 }
 0x191   :  { %v2033_v22 = vpop.f32.mrf.mxu1  ;;  %v2397_v42 = vmul.f32 0.2, %v1882_v8  ;;  %v5683_v12 = vadd.f32 %v2031_v9, %v1919_v35  ;;  %v1921_v59 = vadd.f32 %v1920_v44, %v5680_v4  ;;  %v2460_v27 = vmax.f32 %v1880_v24, %v2396_v46 }
 0x192   :  { %v5686_v60 = vpop.f32.mrf.mxu0 }
 0x193   :  { %v5688_v55 = vpop.f32.mrf.mxu1  ;;  %v2461_v52 = vmax.f32 %v1882_v8, %v2397_v42  ;;  %v5690_v2 = vadd.f32 %v2033_v22, %v1921_v59  ;;  %v2492_v31 = vpack.c.bf16 %v2460_v27, %v2456_v41 }
 0x194   :  { %v5692_v7 = vpop.f32.mrf.mxu0 }
 0x195   :  { %v5694_v57 = vpop.f32.mrf.mxu1  ;;  %v2493_v58 = vpack.c.bf16 %v2461_v52, %v2457_v53 }
 0x196   :  { %v1928_v6 = vpop.f32.mrf.mxu0 }
 0x197   :  { %v2041_v13 = vpop.f32.mrf.mxu1  ;;  %v1929_v17 = vadd.f32 %v1928_v6, %v5676_v62  ;;  %2994 = vmatprep.mubr.bf16.mxu0 %v2493_v58 }
 0x198   :  { %v1930_v39 = vpop.f32.mrf.mxu0  ;;  %2995 = vmatmul.mubr.bf16.gmra.mxu0 %v2492_v31 }
 0x199   :  { %v2043_v30 = vpop.f32.mrf.mxu1  ;;  %v5697_v51 = vadd.f32 %v2041_v13, %v1929_v17  ;;  %v1931_v10 = vadd.f32 %v1930_v39, %v5680_v4 }
 0x19a   :  { %v1932_v1 = vpop.f32.mrf.mxu0 }
 0x19b   :  { %v2045_v34 = vpop.f32.mrf.mxu1  ;;  %v5700_v63 = vadd.f32 %v2043_v30, %v1931_v10  ;;  %v1933_v26 = vadd.f32 %v1932_v1, %v5676_v62 }
 0x19c   :  { %v5703_v20 = vpop.f32.mrf.mxu0 }
 0x19d   :  { %v5705_v28 = vpop.f32.mrf.mxu1  ;;  %v5707_v37 = vadd.f32 %v2045_v34, %v1933_v26 }
 0x19e   :  { %v1938_v54 = vpop.f32.mrf.mxu0 }
 0x19f   :  { %v2051_v40 = vpop.f32.mrf.mxu1  ;;  %v1939_v33 = vadd.f32 %v1938_v54, %v5676_v62 }
 0x1a0   :  { %v1940_v19 = vpop.f32.mrf.mxu0 }
 0x1a1   :  { %v2053_v3 = vpop.f32.mrf.mxu1  ;;  %v5710_v25 = vadd.f32 %v2051_v40, %v1939_v33  ;;  %v1941_v48 = vadd.f32 %v1940_v19, %v5680_v4 }
 0x1a2   :  { %v1942_v29 = vpop.f32.mrf.mxu0 }
 0x1a3   :  { %v2055_v16 = vpop.f32.mrf.mxu1  ;;  %v5713_v15 = vadd.f32 %v2053_v3, %v1941_v48  ;;  %v1943_v21 = vadd.f32 %v1942_v29, %v5676_v62 }
 0x1a4   :  { %v5716_v50 = vpop.f32.mrf.mxu0 }
 0x1a5   :  { %v5718_v0 = vpop.f32.mrf.mxu1  ;;  %v5720_v56 = vadd.f32 %v2055_v16, %v1943_v21 }
 0x1a6   :  { %v1948_v61 = vpop.f32.mrf.mxu0 }
 0x1a7   :  { %v2061_v23 = vpop.f32.mrf.mxu1  ;;  %v1949_v36 = vadd.f32 %v1948_v61, %v5676_v62 }
 0x1a8   :  { %v1950_v38 = vpop.f32.mrf.mxu0 }
 0x1a9   :  { %v2063_v45 = vpop.f32.mrf.mxu1  ;;  %v5723_v49 = vadd.f32 %v2061_v23, %v1949_v36  ;;  %v1951_v43 = vadd.f32 %v1950_v38, %v5680_v4 }
 0x1aa   :  { %v1952_v18 = vpop.f32.mrf.mxu0 }
 0x1ab   :  { %v2065_v14 = vpop.f32.mrf.mxu1  ;;  %v5726_v47 = vadd.f32 %v2063_v45, %v1951_v43  ;;  %v1953_v24 = vadd.f32 %v1952_v18, %v5676_v62 }
 0x1ac   :  { %v5729_v32 = vpop.f32.mrf.mxu0 }
 0x1ad   :  { %v5731_v9 = vpop.f32.mrf.mxu1  ;;  %v5733_v11 = vadd.f32 %v2065_v14, %v1953_v24 }
 0x1ae   :  { %v1958_v8 = vpop.f32.mrf.mxu0 }
 0x1af   :  { %v2071_v35 = vpop.f32.mrf.mxu1  ;;  %v1959_v46 = vadd.f32 %v1958_v8, %v5676_v62 }
 0x1b0   :  { %v1960_v44 = vpop.f32.mrf.mxu0 }
 0x1b1   :  { %v2073_v22 = vpop.f32.mrf.mxu1  ;;  %v5736_v42 = vadd.f32 %v2071_v35, %v1959_v46  ;;  %v1961_v59 = vadd.f32 %v1960_v44, %v5680_v4 }
 0x1b2   :  { %v1962_v41 = vpop.f32.mrf.mxu0 }
 0x1b3   :  { %v2075_v27 = vpop.f32.mrf.mxu1  ;;  %v5739_v53 = vadd.f32 %v2073_v22, %v1961_v59  ;;  %v1963_v52 = vadd.f32 %v1962_v41, %v5676_v62 }
 0x1b4   :  { %v5742_v31 = vpop.f32.mrf.mxu0 }
 0x1b5   :  { %v5744_v58 = vpop.f32.mrf.mxu1  ;;  %v5746_v6 = vadd.f32 %v2075_v27, %v1963_v52 }
 0x1b6   :  { %v1968_v13 = vpop.f32.mrf.mxu0 }
 0x1b7   :  { %v2081_v17 = vpop.f32.mrf.mxu1  ;;  %v1969_v39 = vadd.f32 %v1968_v13, %v5676_v62 }
 0x1b8   :  { %v1970_v30 = vpop.f32.mrf.mxu0 }
 0x1b9   :  { %v2083_v10 = vpop.f32.mrf.mxu1  ;;  %v5749_v1 = vadd.f32 %v2081_v17, %v1969_v39  ;;  %v1971_v34 = vadd.f32 %v1970_v30, %v5680_v4 }
 0x1ba   :  { %v1972_v26 = vpop.f32.mrf.mxu0 }
 0x1bb   :  { %v2085_v54 = vpop.f32.mrf.mxu1  ;;  %v5752_v40 = vadd.f32 %v2083_v10, %v1971_v34  ;;  %v1973_v33 = vadd.f32 %v1972_v26, %v5676_v62  ;;  %v1923_v26 = vadd.f32 %v5686_v60, %v5676_v62 }
 0x1bc   :  { %v5755_v19 = vpop.f32.mrf.mxu0 }
 0x1bd   :  { %v5757_v3 = vpop.f32.mrf.mxu1  ;;  %v5759_v48 = vadd.f32 %v2085_v54, %v1973_v33 }
 0x1be   :  { %v1978_v29 = vpop.f32.mrf.mxu0 }
 0x1bf   :  { %v2091_v16 = vpop.f32.mrf.mxu1  ;;  %v1979_v21 = vadd.f32 %v1978_v29, %v5676_v62 }
 0x1c0   :  { %v1980_v61 = vpop.f32.mrf.mxu0 }
 0x1c1   :  { %v2093_v23 = vpop.f32.mrf.mxu1  ;;  %v5762_v36 = vadd.f32 %v2091_v16, %v1979_v21  ;;  %v1981_v38 = vadd.f32 %v1980_v61, %v5680_v4  ;;  %v1925_v16 = vadd.f32 %v5692_v7, %v5680_v4 }
 0x1c2   :  { %v1982_v45 = vpop.f32.mrf.mxu0 }
 0x1c3   :  { %v2095_v43 = vpop.f32.mrf.mxu1  ;;  %v5765_v18 = vadd.f32 %v2093_v23, %v1981_v38  ;;  %v1983_v14 = vadd.f32 %v1982_v45, %v5676_v62  ;;  %v2036_v38 = vadd.f32 %v5688_v55, %v1923_v26 }
 0x1c4   :  { %v5768_v24 = vpop.f32.mrf.mxu0 }
 0x1c5   :  { %v5770_v8 = vpop.f32.mrf.mxu1  ;;  %v5772_v35 = vadd.f32 %v2095_v43, %v1983_v14 }
 0x1c6   :  { %v1988_v46 = vpop.f32.mrf.mxu0 }
 0x1c7   :  { %v2101_v44 = vpop.f32.mrf.mxu1  ;;  %v1989_v22 = vadd.f32 %v1988_v46, %v5676_v62  ;;  %v2038_v46 = vadd.f32 %v5694_v57, %v1925_v16 }
 0x1c8   :  { %v1990_v59 = vpop.f32.mrf.mxu0 }
 0x1c9   :  { %v2103_v41 = vpop.f32.mrf.mxu1  ;;  %v5775_v27 = vadd.f32 %v2101_v44, %v1989_v22  ;;  %v1991_v52 = vadd.f32 %v1990_v59, %v5680_v4 }
 0x1ca   :  { %v1992_v13 = vpop.f32.mrf.mxu0 }
 0x1cb   :  { %v2105_v17 = vpop.f32.mrf.mxu1  ;;  %v5778_v39 = vadd.f32 %v2103_v41, %v1991_v52  ;;  %v1993_v30 = vadd.f32 %v1992_v13, %v5676_v62 }
 0x1cc   :  { %v5781_v10 = vpop.f32.mrf.mxu0 }
 0x1cd   :  { %v5783_v34 = vpop.f32.mrf.mxu1  ;;  %v5787_v54 = vadd.f32 %v2105_v17, %v1993_v30 }
 0x1ce   :  { %v2144_v33 = vpop.f32.mrf.mxu0 }
 0x1cf   :  { %v2257_v29 = vpop.f32.mrf.mxu1  ;;  %v2145_v21 = vadd.f32 %v2144_v33, %v5683_v12  ;;  %v1935_v12 = vadd.f32 %v5703_v20, %v5680_v4 }
 0x1d0   :  { %v2146_v61 = vpop.f32.mrf.mxu0 }
 0x1d1   :  { %v2259_v23 = vpop.f32.mrf.mxu1  ;;  %v2147_v45 = vadd.f32 %v2146_v61, %v5690_v2  ;;  %v2258_v44 = vadd.f32 %v2257_v29, %v2145_v21 }
 0x1d2   :  { %v2148_v43 = vpop.f32.mrf.mxu0 }
 0x1d3   :  { %v2261_v14 = vpop.f32.mrf.mxu1  ;;  %v2260_v62 = vadd.f32 %v2259_v23, %v2147_v45  ;;  %v2149_v60 = vadd.f32 %v2148_v43, %v2036_v38  ;;  %v2338_v26 = vmul.f32 0.2, %v2258_v44  ;;  %v2048_v45 = vadd.f32 %v5705_v28, %v1935_v12 }
 0x1d4   :  { %v2150_v22 = vpop.f32.mrf.mxu0 }
 0x1d5   :  { %v2263_v59 = vpop.f32.mrf.mxu1  ;;  %v2262_v41 = vadd.f32 %v2261_v14, %v2149_v60  ;;  %v2151_v52 = vadd.f32 %v2150_v22, %v2038_v46  ;;  %v2339_v17 = vmul.f32 0.2, %v2260_v62  ;;  %v2402_v46 = vmax.f32 %v2258_v44, %v2338_v26 }
 0x1d6   :  { %v2154_v7 = vpop.f32.mrf.mxu0 }
 0x1d7   :  { %v2267_v13 = vpop.f32.mrf.mxu1  ;;  %v2342_v55 = vmul.f32 0.2, %v2262_v41  ;;  %v2264_v30 = vadd.f32 %v2263_v59, %v2151_v52  ;;  %v2155_v2 = vadd.f32 %v2154_v7, %v5697_v51  ;;  %v2403_v20 = vmax.f32 %v2260_v62, %v2339_v17  ;;  %v4235_v17 = vld [vmem:[%s5996_s5 + $0x78] sm:$0xff]  }
 0x1d8   :  { %v2156_v33 = vpop.f32.mrf.mxu0  ;;  %v1945_v7 = vadd.f32 %v5716_v50, %v5680_v4  ;;  %v4236_v50 = vld [vmem:[%s5996_s5 + $0x38] sm:$0xff]   ;;  %3761 = vmatprep.subr.bf16.mxu0 %v4235_v17  ;;  %3825 = vmatprep.subr.bf16.mxu1 %v4235_v17 }
 0x1d9   :  { %v2269_v57 = vpop.f32.mrf.mxu1  ;;  %v2343_v16 = vmul.f32 0.2, %v2264_v30  ;;  %v2157_v29 = vadd.f32 %v2156_v33, %v5700_v63  ;;  %v2406_v21 = vmax.f32 %v2262_v41, %v2342_v55  ;;  %v2268_v61 = vadd.f32 %v2267_v13, %v2155_v2  ;;  %3762 = vmatpush3.bf16.msra.mxu0 %v4236_v50 }
 0x1da   :  { %v2158_v23 = vpop.f32.mrf.mxu0 }
 0x1db   :  { %v2271_v38 = vpop.f32.mrf.mxu1  ;;  %v2407_v43 = vmax.f32 %v2264_v30, %v2343_v16  ;;  %v2270_v14 = vadd.f32 %v2269_v57, %v2157_v29  ;;  %v2159_v60 = vadd.f32 %v2158_v23, %v5707_v37  ;;  %v2466_v63 = vpack.c.bf16 %v2406_v21, %v2402_v46  ;;  %v4237_v30 = vld [vmem:[%s5996_s5 + $0x70] sm:$0xff]  }
 0x1dc   :  { %v2160_v22 = vpop.f32.mrf.mxu0  ;;  %v2346_v41 = vmul.f32 0.2, %v2268_v61  ;;  %v2058_v16 = vadd.f32 %v5718_v0, %v1945_v7  ;;  %v4238_v46 = vld [vmem:[%s5996_s5 + $0x30] sm:$0xff]   ;;  %3763 = vmatprep.subr.bf16.mxu0 %v4237_v30 }
 0x1dd   :  { %v2273_v51 = vpop.f32.mrf.mxu1  ;;  %v2161_v59 = vadd.f32 %v2160_v22, %v2048_v45  ;;  %v2467_v52 = vpack.c.bf16 %v2407_v43, %v2403_v20  ;;  %v2272_v13 = vadd.f32 %v2271_v38, %v2159_v60  ;;  %v2347_v33 = vmul.f32 0.2, %v2270_v14  ;;  %3764 = vmatpush3.bf16.msra.mxu0 %v4238_v46 }
 0x1de   :  { %v2164_v55 = vpop.f32.mrf.mxu0  ;;  %v2410_v29 = vmax.f32 %v2268_v61, %v2346_v41  ;;  %v4239_v61 = vld [vmem:[%s5996_s5 + $0x68] sm:$0xff]  }
 0x1df   :  { %v2277_v2 = vpop.f32.mrf.mxu1  ;;  %v2274_v28 = vadd.f32 %v2273_v51, %v2161_v59  ;;  %v2165_v62 = vadd.f32 %v2164_v55, %v5710_v25  ;;  %3037 = vmatprep.mubr.bf16.mxu1 %v2467_v52  ;;  %v2350_v44 = vmul.f32 0.2, %v2272_v13  ;;  %v2411_v60 = vmax.f32 %v2270_v14, %v2347_v33  ;;  %v4240_v33 = vld [vmem:[%s5996_s5 + $0x28] sm:$0xff]   ;;  %3765 = vmatprep.subr.bf16.mxu0 %v4239_v61 }
 0x1e0   :  { %v2166_v12 = vpop.f32.mrf.mxu0  ;;  %3038 = vmatmul.mubr.bf16.vlgmr.msra.gmra.mxu1 %v2466_v63 }
 0x1e1   :  { %v2279_v37 = vpop.f32.mrf.mxu1  ;;  %v2351_v26 = vmul.f32 0.2, %v2274_v28  ;;  %v2278_v57 = vadd.f32 %v2277_v2, %v2165_v62  ;;  %v2167_v25 = vadd.f32 %v2166_v12, %v5713_v15  ;;  %v2414_v21 = vmax.f32 %v2272_v13, %v2350_v44  ;;  %3833 = vmatpush3.bf16.msra.mxu1 %v4236_v50  ;;  %3766 = vmatpush3.bf16.msra.mxu0 %v4240_v33 }
 0x1e2   :  { %v2168_v23 = vpop.f32.mrf.mxu0  ;;  %3826 = vmatprep.subr.bf16.mxu1 %v4237_v30 }
 0x1e3   :  { %v2281_v38 = vpop.f32.mrf.mxu1  ;;  %v2415_v45 = vmax.f32 %v2274_v28, %v2351_v26  ;;  %v2280_v20 = vadd.f32 %v2279_v37, %v2167_v25  ;;  %v2169_v43 = vadd.f32 %v2168_v23, %v5720_v56  ;;  %v2470_v15 = vpack.c.bf16 %v2414_v21, %v2410_v29  ;;  %v4242_v21 = vld [vmem:[%s5996_s5 + $0x20] sm:$0xff]  }
 0x1e4   :  { %v2170_v22 = vpop.f32.mrf.mxu0  ;;  %v2354_v51 = vmul.f32 0.2, %v2278_v57  ;;  %v1955_v56 = vadd.f32 %v5729_v32, %v5680_v4  ;;  %v4241_v32 = vld [vmem:[%s5996_s5 + $0x60] sm:$0xff]  }
 0x1e5   :  { %v2283_v0 = vpop.f32.mrf.mxu1  ;;  %v2282_v59 = vadd.f32 %v2281_v38, %v2169_v43  ;;  %v2171_v52 = vadd.f32 %v2170_v22, %v2058_v16  ;;  %v2471_v41 = vpack.c.bf16 %v2415_v45, %v2411_v60  ;;  %v2355_v13 = vmul.f32 0.2, %v2280_v20  ;;  %3834 = vmatpush3.bf16.msra.mxu1 %v4238_v46  ;;  %3767 = vmatprep.subr.bf16.mxu0 %v4241_v32 }
 0x1e6   :  { %v2174_v7 = vpop.f32.mrf.mxu0  ;;  %v2418_v44 = vmax.f32 %v2278_v57, %v2354_v51  ;;  %3827 = vmatprep.subr.bf16.mxu1 %v4239_v61  ;;  %v1965_v22 = vadd.f32 %v5742_v31, %v5680_v4  ;;  %3768 = vmatpush3.bf16.msra.mxu0 %v4242_v21  ;;  %v4244_v61 = vld [vmem:[%s5996_s5 + $0x18] sm:$0xff]  }
 0x1e7   :  { %v2287_v63 = vpop.f32.mrf.mxu1  ;;  %v2358_v14 = vmul.f32 0.2, %v2282_v59  ;;  %v2284_v55 = vadd.f32 %v2283_v0, %v2171_v52  ;;  %v2175_v2 = vadd.f32 %v2174_v7, %v5723_v49  ;;  %3047 = vmatprep.mubr.bf16.mxu1 %v2471_v41  ;;  %v2068_v49 = vadd.f32 %v5731_v9, %v1955_v56  ;;  %v4243_v9 = vld [vmem:[%s5996_s5 + $0x58] sm:$0xff]   ;;  %v4245_v7 = vld [vmem:[%s5996_s5 + $0x50] sm:$0xff]  }
 0x1e8   :  { %v2176_v28 = vpop.f32.mrf.mxu0  ;;  %3048 = vmatmul.mubr.bf16.gmra.mxu1 %v2470_v15  ;;  %v2419_v25 = vmax.f32 %v2280_v20, %v2355_v13  ;;  %3769 = vmatprep.subr.bf16.mxu0 %v4243_v9 }
 0x1e9   :  { %v2289_v62 = vpop.f32.mrf.mxu1  ;;  %v2422_v12 = vmax.f32 %v2282_v59, %v2358_v14  ;;  %v2359_v37 = vmul.f32 0.2, %v2284_v55  ;;  %v2177_v17 = vadd.f32 %v2176_v28, %v5726_v47  ;;  %v2288_v50 = vadd.f32 %v2287_v63, %v2175_v2  ;;  %3835 = vmatpush3.bf16.msra.mxu1 %v4240_v33 }
 0x1ea   :  { %v2178_v30 = vpop.f32.mrf.mxu0  ;;  %3828 = vmatprep.subr.bf16.mxu1 %v4241_v32  ;;  %v2078_v2 = vadd.f32 %v5744_v58, %v1965_v22  ;;  %3770 = vmatpush3.bf16.msra.mxu0 %v4244_v61  ;;  %v4246_v32 = vld [vmem:[%s5996_s5 + $0x10] sm:$0xff]   ;;  %v1975_v58 = vadd.f32 %v5755_v19, %v5680_v4 }
 0x1eb   :  { %v2291_v26 = vpop.f32.mrf.mxu1  ;;  %v2474_v16 = vpack.c.bf16 %v2422_v12, %v2418_v44  ;;  %v2423_v29 = vmax.f32 %v2284_v55, %v2359_v37  ;;  %v2290_v57 = vadd.f32 %v2289_v62, %v2177_v17  ;;  %v2179_v23 = vadd.f32 %v2178_v30, %v5733_v11  ;;  %3771 = vmatprep.subr.bf16.mxu0 %v4245_v7 }
 0x1ec   :  { %v2180_v47 = vpop.f32.mrf.mxu0  ;;  %v2362_v43 = vmul.f32 0.2, %v2288_v50 }
 0x1ed   :  { %v2293_v38 = vpop.f32.mrf.mxu1  ;;  %v2181_v45 = vadd.f32 %v2180_v47, %v2068_v49  ;;  %v2475_v20 = vpack.c.bf16 %v2423_v29, %v2419_v25  ;;  %v2292_v46 = vadd.f32 %v2291_v26, %v2179_v23  ;;  %v2363_v51 = vmul.f32 0.2, %v2290_v57  ;;  %3836 = vmatpush3.bf16.msra.mxu1 %v4242_v21 }
 0x1ee   :  { %v2184_v60 = vpop.f32.mrf.mxu0  ;;  %3829 = vmatprep.subr.bf16.mxu1 %v4243_v9  ;;  %v2426_v41 = vmax.f32 %v2288_v50, %v2362_v43  ;;  %3772 = vmatpush3.bf16.msra.mxu0 %v4246_v32 }
 0x1ef   :  { %v2297_v15 = vpop.f32.mrf.mxu1  ;;  %v2294_v0 = vadd.f32 %v2293_v38, %v2181_v45  ;;  %v2185_v11 = vadd.f32 %v2184_v60, %v5736_v42  ;;  %3057 = vmatprep.mubr.bf16.mxu1 %v2475_v20  ;;  %v2366_v59 = vmul.f32 0.2, %v2292_v46  ;;  %v2427_v44 = vmax.f32 %v2290_v57, %v2363_v51 }
 0x1f0   :  { %v2186_v52 = vpop.f32.mrf.mxu0  ;;  %3058 = vmatmul.mubr.bf16.gmra.mxu1 %v2474_v16 }
 0x1f1   :  { %v2299_v56 = vpop.f32.mrf.mxu1  ;;  %v2367_v31 = vmul.f32 0.2, %v2294_v0  ;;  %v2298_v63 = vadd.f32 %v2297_v15, %v2185_v11  ;;  %v2187_v42 = vadd.f32 %v2186_v52, %v5739_v53  ;;  %v2430_v13 = vmax.f32 %v2292_v46, %v2366_v59  ;;  %3837 = vmatpush3.bf16.msra.mxu1 %v4244_v61 }
 0x1f2   :  { %v2188_v14 = vpop.f32.mrf.mxu0  ;;  %3830 = vmatprep.subr.bf16.mxu1 %v4245_v7  ;;  %v2088_v46 = vadd.f32 %v5757_v3, %v1975_v58 }
 0x1f3   :  { %v2301_v55 = vpop.f32.mrf.mxu1  ;;  %v2431_v33 = vmax.f32 %v2294_v0, %v2367_v31  ;;  %v2300_v28 = vadd.f32 %v2299_v56, %v2187_v42  ;;  %v2189_v62 = vadd.f32 %v2188_v14, %v5746_v6  ;;  %v2478_v12 = vpack.c.bf16 %v2430_v13, %v2426_v41 }
 0x1f4   :  { %v2190_v53 = vpop.f32.mrf.mxu0  ;;  %v2370_v17 = vmul.f32 0.2, %v2298_v63  ;;  %v1985_v31 = vadd.f32 %v5768_v24, %v5680_v4 }
 0x1f5   :  { %v2303_v37 = vpop.f32.mrf.mxu1  ;;  %v2302_v49 = vadd.f32 %v2301_v55, %v2189_v62  ;;  %v2191_v50 = vadd.f32 %v2190_v53, %v2078_v2  ;;  %v2479_v26 = vpack.c.bf16 %v2431_v33, %v2427_v44  ;;  %v2371_v25 = vmul.f32 0.2, %v2300_v28  ;;  %3838 = vmatpush3.bf16.msra.mxu1 %v4246_v32 }
 0x1f6   :  { %v2194_v30 = vpop.f32.mrf.mxu0  ;;  %v2434_v47 = vmax.f32 %v2298_v63, %v2370_v17  ;;  %v2098_v44 = vadd.f32 %v5770_v8, %v1985_v31 }
 0x1f7   :  { %v2307_v6 = vpop.f32.mrf.mxu1  ;;  %v2374_v16 = vmul.f32 0.2, %v2302_v49  ;;  %v2304_v29 = vadd.f32 %v2303_v37, %v2191_v50  ;;  %v2195_v21 = vadd.f32 %v2194_v30, %v5749_v1  ;;  %3067 = vmatprep.mubr.bf16.mxu1 %v2479_v26  ;;  %v2435_v60 = vmax.f32 %v2300_v28, %v2371_v25 }
 0x1f8   :  { %v2196_v57 = vpop.f32.mrf.mxu0  ;;  %3068 = vmatmul.mubr.bf16.gmra.mxu1 %v2478_v12 }
 0x1f9   :  { %v2309_v23 = vpop.f32.mrf.mxu1  ;;  %v2438_v38 = vmax.f32 %v2302_v49, %v2374_v16  ;;  %v2375_v9 = vmul.f32 0.2, %v2304_v29  ;;  %v2197_v45 = vadd.f32 %v2196_v57, %v5752_v40  ;;  %v2308_v19 = vadd.f32 %v2307_v6, %v2195_v21 }
 0x1fa   :  { %v2198_v20 = vpop.f32.mrf.mxu0 }
 0x1fb   :  { %v2311_v43 = vpop.f32.mrf.mxu1  ;;  %v2482_v15 = vpack.c.bf16 %v2438_v38, %v2434_v47  ;;  %v2439_v22 = vmax.f32 %v2304_v29, %v2375_v9  ;;  %v2310_v1 = vadd.f32 %v2309_v23, %v2197_v45  ;;  %v2199_v0 = vadd.f32 %v2198_v20, %v5759_v48 }
 0x1fc   :  { %v2200_v11 = vpop.f32.mrf.mxu0  ;;  %v2378_v52 = vmul.f32 0.2, %v2308_v19 }
 0x1fd   :  { %v2313_v61 = vpop.f32.mrf.mxu1  ;;  %v2201_v51 = vadd.f32 %v2200_v11, %v2088_v46  ;;  %v2483_v59 = vpack.c.bf16 %v2439_v22, %v2435_v60  ;;  %v2312_v56 = vadd.f32 %v2311_v43, %v2199_v0  ;;  %v2379_v42 = vmul.f32 0.2, %v2310_v1 }
 0x1fe   :  { %v2204_v7 = vpop.f32.mrf.mxu0  ;;  %v2442_v33 = vmax.f32 %v2308_v19, %v2378_v52 }
 0x1ff   :  { %v2317_v40 = vpop.f32.mrf.mxu1  ;;  %v2314_v63 = vadd.f32 %v2313_v61, %v2201_v51  ;;  %v2205_v3 = vadd.f32 %v2204_v7, %v5762_v36  ;;  %3077 = vmatprep.mubr.bf16.mxu1 %v2483_v59  ;;  %v2382_v41 = vmul.f32 0.2, %v2312_v56  ;;  %v2443_v53 = vmax.f32 %v2310_v1, %v2379_v42  ;;  %v4249_v42 = vld [vmem:[%s5996_s5 + $0x40] sm:$0xff]  }
 0x200   :  { %v2206_v13 = vpop.f32.mrf.mxu0  ;;  %3078 = vmatmul.mubr.bf16.gmra.mxu1 %v2482_v15 }
 0x201   :  { %v2319_v14 = vpop.f32.mrf.mxu1  ;;  %v2383_v48 = vmul.f32 0.2, %v2314_v63  ;;  %v2318_v55 = vadd.f32 %v2317_v40, %v2205_v3  ;;  %v2207_v2 = vadd.f32 %v2206_v13, %v5765_v18  ;;  %v2446_v28 = vmax.f32 %v2312_v56, %v2382_v41  ;;  %v4248_v3 = vld [vmem:[%s5996_s5 + $0x8] sm:$0xff]   ;;  %v4250_v41 = vld [vmem:[%s5996_s5] sm:$0xff]  }
 0x202   :  { %v2208_v62 = vpop.f32.mrf.mxu0  ;;  %v1995_v18 = vadd.f32 %v5781_v10, %v5680_v4 }
 0x203   :  { %v2321_v32 = vpop.f32.mrf.mxu1  ;;  %v2447_v24 = vmax.f32 %v2314_v63, %v2383_v48  ;;  %v2320_v12 = vadd.f32 %v2319_v14, %v2207_v2  ;;  %v2209_v36 = vadd.f32 %v2208_v62, %v5772_v35  ;;  %v2486_v37 = vpack.c.bf16 %v2446_v28, %v2442_v33 }
 0x204   :  { %v2210_v17 = vpop.f32.mrf.mxu0  ;;  %v2386_v50 = vmul.f32 0.2, %v2318_v55  ;;  %v2108_v45 = vadd.f32 %v5783_v34, %v1995_v18 }
 0x205   :  { %v2323_v49 = vpop.f32.mrf.mxu1  ;;  %v2322_v58 = vadd.f32 %v2321_v32, %v2209_v36  ;;  %v2211_v30 = vadd.f32 %v2210_v17, %v2098_v44  ;;  %v2487_v25 = vpack.c.bf16 %v2447_v24, %v2443_v53  ;;  %v2387_v16 = vmul.f32 0.2, %v2320_v12  ;;  %v2560_v17 = vld [vmem:[%s5995_s4] sm:$0x3] }
 0x206   :  { %v2214_v6 = vpop.f32.mrf.mxu0  ;;  %v2450_v23 = vmax.f32 %v2318_v55, %v2386_v50  ;;  %v6030_v50 = vsub.s32 1, %v5452_v5 }
 0x207   :  { %v2327_v26 = vpop.f32.mrf.mxu1  ;;  %v2390_v29 = vmul.f32 0.2, %v2322_v58  ;;  %v2324_v8 = vadd.f32 %v2323_v49, %v2211_v30  ;;  %v2215_v21 = vadd.f32 %v2214_v6, %v5775_v27  ;;  %3087 = vmatprep.mubr.bf16.mxu1 %v2487_v25  ;;  %v2451_v20 = vmax.f32 %v2320_v12, %v2387_v16 }
 0x208   :  { %v2216_v35 = vpop.f32.mrf.mxu0  ;;  %3088 = vmatmul.mubr.bf16.gmra.mxu1 %v2486_v37  ;;  %v6031_v30 = vsub.s32 0, %v5452_v5 }
 0x209   :  { %v2329_v57 = vpop.f32.mrf.mxu1  ;;  %v2454_v47 = vmax.f32 %v2322_v58, %v2390_v29  ;;  %v2391_v38 = vmul.f32 0.2, %v2324_v8  ;;  %v2217_v9 = vadd.f32 %v2216_v35, %v5778_v39  ;;  %v2328_v4 = vadd.f32 %v2327_v26, %v2215_v21 }
 0x20a   :  { %v2218_v10 = vpop.f32.mrf.mxu0  ;;  %v5900_v58 = vrot.slane %v2560_v17, %v6030_v50  ;;  %v5904_v18 = vrot.slane %v2560_v17, %v6031_v30 }
 0x20b   :  { %v2331_v19 = vpop.f32.mrf.mxu1  ;;  %v2490_v43 = vpack.c.bf16 %v2454_v47, %v2450_v23  ;;  %v2455_v46 = vmax.f32 %v2324_v8, %v2391_v38  ;;  %v2330_v60 = vadd.f32 %v2329_v57, %v2217_v9  ;;  %v2219_v27 = vadd.f32 %v2218_v10, %v5787_v54  ;;  %v4247_v54 = vld [vmem:[%s5996_s5 + $0x48] sm:$0xff]  }
 0x20c   :  { %v2220_v15 = vpop.f32.mrf.mxu0  ;;  %v2394_v0 = vmul.f32 0.2, %v2328_v4  ;;  %3773 = vmatprep.subr.bf16.mxu0 %v4247_v54  ;;  %3831 = vmatprep.subr.bf16.mxu1 %v4247_v54 }
 0x20d   :  { %v2221_v22 = vadd.f32 %v2220_v15, %v2108_v45  ;;  %v2491_v1 = vpack.c.bf16 %v2455_v46, %v2451_v20  ;;  %v2332_v11 = vadd.f32 %v2331_v19, %v2219_v27  ;;  %v2333_v61 = vpop.f32.mrf.mxu1  ;;  %v2395_v51 = vmul.f32 0.2, %v2330_v60  ;;  %3774 = vmatpush3.bf16.msra.mxu0 %v4248_v3  ;;  %3839 = vmatpush3.bf16.msra.mxu1 %v4248_v3 }
 0x20e   :  { %v2458_v52 = vmax.f32 %v2328_v4, %v2394_v0  ;;  %3775 = vmatprep.subr.bf16.mxu0 %v4249_v42  ;;  %3832 = vmatprep.subr.bf16.mxu1 %v4249_v42 }
 0x20f   :  { %v2334_v39 = vadd.f32 %v2333_v61, %v2221_v22  ;;  %3097 = vmatprep.mubr.bf16.mxu1 %v2491_v1  ;;  %v2398_v59 = vmul.f32 0.2, %v2332_v11  ;;  %v2459_v7 = vmax.f32 %v2330_v60, %v2395_v51 }
 0x210   :  { %3098 = vmatmul.mubr.bf16.gmra.mxu1 %v2490_v43 }
 0x211   :  { %v2399_v34 = vmul.f32 0.2, %v2334_v39  ;;  %v2462_v56 = vmax.f32 %v2332_v11, %v2398_v59  ;;  %3776 = vmatpush3.bf16.msra.mxu0 %v4250_v41  ;;  %3840 = vmatpush3.bf16.msra.mxu1 %v4250_v41 }
 0x213   :  { %v2463_v40 = vmax.f32 %v2334_v39, %v2399_v34  ;;  %v2494_v31 = vpack.c.bf16 %v2462_v56, %v2458_v52 }
 0x215   :  { %v2495_v63 = vpack.c.bf16 %v2463_v40, %v2459_v7 }
 0x217   :  { %3107 = vmatprep.mubr.bf16.mxu1 %v2495_v63 }
 0x218   :  { %3108 = vmatmul.mubr.bf16.gmra.mxu1 %v2494_v31 }
 0x220   :  { %v2926_v13 = vpop.f32.mrf.mxu0 }
 0x221   :  { %v2927_v16 = vadd.f32 %v2926_v13, %v5904_v18 }
 0x222   :  { %v2928_v14 = vpop.f32.mrf.mxu0 }
 0x223   :  { %v2929_v25 = vadd.f32 %v2928_v14, %v5900_v58 }
 0x224   :  { %v2930_v48 = vpop.f32.mrf.mxu0 }
 0x225   :  { %v2931_v8 = vadd.f32 %v2930_v48, %v5904_v18 }
 0x226   :  { %v2932_v55 = vpop.f32.mrf.mxu0 }
 0x227   :  { %v2933_v47 = vadd.f32 %v2932_v55, %v5900_v58 }
 0x228   :  { %v2936_v2 = vpop.f32.mrf.mxu0 }
 0x229   :  { %v2937_v27 = vadd.f32 %v2936_v2, %v5904_v18 }
 0x22a   :  { %v2938_v33 = vpop.f32.mrf.mxu0 }
 0x22b   :  { %v2939_v46 = vadd.f32 %v2938_v33, %v5900_v58 }
 0x22c   :  { %v2940_v28 = vpop.f32.mrf.mxu0 }
 0x22d   :  { %v2941_v11 = vadd.f32 %v2940_v28, %v5904_v18 }
 0x22e   :  { %v2942_v62 = vpop.f32.mrf.mxu0 }
 0x22f   :  { %v2943_v52 = vadd.f32 %v2942_v62, %v5900_v58 }
 0x230   :  { %v2946_v32 = vpop.f32.mrf.mxu0 }
 0x231   :  { %v2947_v48 = vadd.f32 %v2946_v32, %v5904_v18 }
 0x232   :  { %v2948_v44 = vpop.f32.mrf.mxu0 }
 0x233   :  { %v2949_v13 = vadd.f32 %v2948_v44, %v5900_v58 }
 0x234   :  { %v2950_v24 = vpop.f32.mrf.mxu0 }
 0x235   :  { %v2951_v28 = vadd.f32 %v2950_v24, %v5904_v18 }
 0x236   :  { %v5885_v12 = vpop.f32.mrf.mxu0 }
 0x238   :  { %v5887_v36 = vpop.f32.mrf.mxu0 }
 0x23a   :  { %v5889_v53 = vpop.f32.mrf.mxu0 }
 0x23c   :  { %v5891_v37 = vpop.f32.mrf.mxu0 }
 0x23e   :  { %v5896_v49 = vpop.f32.mrf.mxu0 }
 0x240   :  { %v5906_v6 = vpop.f32.mrf.mxu0 }
 0x242   :  { %v5911_v21 = vpop.f32.mrf.mxu0 }
 0x244   :  { %v5914_v9 = vpop.f32.mrf.mxu0 }
 0x246   :  { %v5918_v15 = vpop.f32.mrf.mxu0 }
 0x248   :  { %v5922_v40 = vpop.f32.mrf.mxu0 }
 0x24a   :  { %v5926_v55 = vpop.f32.mrf.mxu0 }
 0x2a0   :  { %v3039_v26 = vpop.f32.mrf.mxu1 }
 0x2a1   :  { %v3040_v57 = vadd.f32 %v3039_v26, %v2927_v16  ;;  %v2953_v16 = vadd.f32 %v5885_v12, %v5900_v58  ;;  %v2957_v12 = vadd.f32 %v5887_v36, %v5904_v18 }
 0x2a2   :  { %v3041_v29 = vpop.f32.mrf.mxu1 }
 0x2a3   :  { %v3042_v35 = vadd.f32 %v3041_v29, %v2929_v25  ;;  %v3118_v19 = vmul.f32 0.2, %v3040_v57 }
 0x2a4   :  { %v3043_v23 = vpop.f32.mrf.mxu1 }
 0x2a5   :  { %v3044_v5 = vadd.f32 %v3043_v23, %v2931_v8  ;;  %v3119_v45 = vmul.f32 0.2, %v3042_v35  ;;  %v3150_v61 = vmax.f32 %v3040_v57, %v3118_v19  ;;  %v5931_v8 = vpop.f32.mrf.mxu0 }
 0x2a6   :  { %v3045_v38 = vpop.f32.mrf.mxu1 }
 0x2a7   :  { %v3120_v4 = vmul.f32 0.2, %v3044_v5  ;;  %v3046_v10 = vadd.f32 %v3045_v38, %v2933_v47  ;;  %v3151_v22 = vmax.f32 %v3042_v35, %v3119_v45  ;;  %v2959_v38 = vadd.f32 %v5889_v53, %v5900_v58 }
 0x2a8   :  { %v3049_v43 = vpop.f32.mrf.mxu1 }
 0x2a9   :  { %v3121_v20 = vmul.f32 0.2, %v3046_v10  ;;  %v3152_v60 = vmax.f32 %v3044_v5, %v3120_v4  ;;  %v3050_v39 = vadd.f32 %v3049_v43, %v2937_v27  ;;  %v2982_v4 = vpop.f32.mrf.mxu0 }
 0x2aa   :  { %v3051_v0 = vpop.f32.mrf.mxu1 }
 0x2ab   :  { %v3153_v1 = vmax.f32 %v3046_v10, %v3121_v20  ;;  %v3052_v51 = vadd.f32 %v3051_v0, %v2939_v46  ;;  %v3182_v56 = vpack.c.bf16 %v3152_v60, %v3150_v61  ;;  %v3122_v42 = vmul.f32 0.2, %v3050_v39  ;;  %v5941_v61 = vpop.f32.mrf.mxu0 }
 0x2ac   :  { %v3053_v59 = vpop.f32.mrf.mxu1  ;;  %v2961_v20 = vadd.f32 %v5891_v37, %v5904_v18  ;;  %v2963_v0 = vadd.f32 %v5896_v49, %v5900_v58  ;;  %v2967_v49 = vadd.f32 %v5906_v6, %v5904_v18 }
 0x2ad   :  { %v3183_v34 = vpack.c.bf16 %v3153_v1, %v3151_v22  ;;  %v3054_v7 = vadd.f32 %v3053_v59, %v2941_v11  ;;  %v3123_v63 = vmul.f32 0.2, %v3052_v51  ;;  %v3154_v30 = vmax.f32 %v3050_v39, %v3122_v42 }
 0x2ae   :  { %v3055_v31 = vpop.f32.mrf.mxu1 }
 0x2af   :  { %3365 = vmatprep.mubr.bf16.mxu0 %v3183_v34  ;;  %v3124_v54 = vmul.f32 0.2, %v3054_v7  ;;  %v3056_v3 = vadd.f32 %v3055_v31, %v2943_v52  ;;  %v3155_v62 = vmax.f32 %v3052_v51, %v3123_v63  ;;  %v2988_v31 = vpop.f32.mrf.mxu0 }
 0x2b0   :  { %3366 = vmatmul.mubr.bf16.vlgmr.msra.gmra.mxu0 %v3182_v56  ;;  %v3059_v41 = vpop.f32.mrf.mxu1  ;;  %v2969_v56 = vadd.f32 %v5911_v21, %v5900_v58 }
 0x2b1   :  { %v3125_v14 = vmul.f32 0.2, %v3056_v3  ;;  %v3156_v2 = vmax.f32 %v3054_v7, %v3124_v54  ;;  %v3060_v26 = vadd.f32 %v3059_v41, %v2947_v48 }
 0x2b2   :  { %v3061_v33 = vpop.f32.mrf.mxu1 }
 0x2b3   :  { %v3157_v17 = vmax.f32 %v3056_v3, %v3125_v14  ;;  %v3062_v50 = vadd.f32 %v3061_v33, %v2949_v13  ;;  %v3184_v32 = vpack.c.bf16 %v3156_v2, %v3154_v30  ;;  %v3126_v24 = vmul.f32 0.2, %v3060_v26 }
 0x2b4   :  { %v3063_v25 = vpop.f32.mrf.mxu1  ;;  %v2971_v3 = vadd.f32 %v5914_v9, %v5904_v18  ;;  %v2973_v33 = vadd.f32 %v5918_v15, %v5900_v58 }
 0x2b5   :  { %v3064_v29 = vadd.f32 %v3063_v25, %v2951_v28  ;;  %v3185_v44 = vpack.c.bf16 %v3157_v17, %v3155_v62  ;;  %v3127_v57 = vmul.f32 0.2, %v3062_v50  ;;  %v3158_v27 = vmax.f32 %v3060_v26, %v3126_v24  ;;  %v2990_v62 = vpop.f32.mrf.mxu0 }
 0x2b6   :  { %v3065_v35 = vpop.f32.mrf.mxu1 }
 0x2b7   :  { %v3128_v23 = vmul.f32 0.2, %v3064_v29  ;;  %v3066_v47 = vadd.f32 %v3065_v35, %v2953_v16  ;;  %3373 = vmatprep.mubr.bf16.mxu0 %v3185_v44  ;;  %v3159_v43 = vmax.f32 %v3062_v50, %v3127_v57  ;;  %v2979_v16 = vadd.f32 %v5926_v55, %v5900_v58  ;;  %v2992_v15 = vpop.f32.mrf.mxu0 }
 0x2b8   :  { %v3069_v5 = vpop.f32.mrf.mxu1  ;;  %3374 = vmatmul.mubr.bf16.gmra.mxu0 %v3184_v32  ;;  %v2977_v44 = vadd.f32 %v5922_v40, %v5904_v18  ;;  %v2981_v57 = vadd.f32 %v5931_v8, %v5904_v18  ;;  %v2989_v8 = vadd.f32 %v2988_v31, %v5900_v58 }
 0x2b9   :  { %v3129_v45 = vmul.f32 0.2, %v3066_v47  ;;  %v3160_v10 = vmax.f32 %v3064_v29, %v3128_v23  ;;  %v3070_v22 = vadd.f32 %v3069_v5, %v2957_v12  ;;  %v2983_v12 = vadd.f32 %v2982_v4, %v5900_v58 }
 0x2ba   :  { %v3071_v19 = vpop.f32.mrf.mxu1 }
 0x2bb   :  { %v3161_v46 = vmax.f32 %v3066_v47, %v3129_v45  ;;  %v3072_v60 = vadd.f32 %v3071_v19, %v2959_v38  ;;  %v3186_v36 = vpack.c.bf16 %v3160_v10, %v3158_v27  ;;  %v3130_v37 = vmul.f32 0.2, %v3070_v22  ;;  %v2996_v19 = vpop.f32.mrf.mxu0 }
 0x2bc   :  { %v3073_v1 = vpop.f32.mrf.mxu1 }
 0x2bd   :  { %v3074_v53 = vadd.f32 %v3073_v1, %v2961_v20  ;;  %v3187_v11 = vpack.c.bf16 %v3161_v46, %v3159_v43  ;;  %v3131_v39 = vmul.f32 0.2, %v3072_v60  ;;  %v3162_v14 = vmax.f32 %v3070_v22, %v3130_v37 }
 0x2be   :  { %v3075_v51 = vpop.f32.mrf.mxu1 }
 0x2bf   :  { %v3132_v59 = vmul.f32 0.2, %v3074_v53  ;;  %v3076_v34 = vadd.f32 %v3075_v51, %v2963_v0  ;;  %3381 = vmatprep.mubr.bf16.mxu0 %v3187_v11  ;;  %v3163_v42 = vmax.f32 %v3072_v60, %v3131_v39  ;;  %v2987_v0 = vadd.f32 %v5941_v61, %v5904_v18 }
 0x2c0   :  { %v3079_v52 = vpop.f32.mrf.mxu1  ;;  %3382 = vmatmul.mubr.bf16.gmra.mxu0 %v3186_v36  ;;  %v2991_v36 = vadd.f32 %v2990_v62, %v5904_v18 }
 0x2c1   :  { %v3133_v7 = vmul.f32 0.2, %v3076_v34  ;;  %v3164_v63 = vmax.f32 %v3074_v53, %v3132_v59  ;;  %v3080_v48 = vadd.f32 %v3079_v52, %v2967_v49  ;;  %v2998_v53 = vpop.f32.mrf.mxu0 }
 0x2c2   :  { %v3081_v54 = vpop.f32.mrf.mxu1 }
 0x2c3   :  { %v3165_v41 = vmax.f32 %v3076_v34, %v3133_v7  ;;  %v3082_v13 = vadd.f32 %v3081_v54, %v2969_v56  ;;  %v3188_v17 = vpack.c.bf16 %v3164_v63, %v3162_v14  ;;  %v3134_v25 = vmul.f32 0.2, %v3080_v48  ;;  %v3000_v31 = vpop.f32.mrf.mxu0 }
 0x2c4   :  { %v3083_v2 = vpop.f32.mrf.mxu1  ;;  %v2993_v56 = vadd.f32 %v2992_v15, %v5900_v58  ;;  %v2999_v14 = vadd.f32 %v2998_v53, %v5900_v58  ;;  %v3001_v62 = vadd.f32 %v3000_v31, %v5904_v18 }
 0x2c5   :  { %v3084_v21 = vadd.f32 %v3083_v2, %v2971_v3  ;;  %v3189_v28 = vpack.c.bf16 %v3165_v41, %v3163_v42  ;;  %v3135_v50 = vmul.f32 0.2, %v3082_v13  ;;  %v3166_v5 = vmax.f32 %v3080_v48, %v3134_v25 }
 0x2c6   :  { %v3085_v6 = vpop.f32.mrf.mxu1  ;;  %v2997_v2 = vadd.f32 %v2996_v19, %v5904_v18 }
 0x2c7   :  { %v3136_v30 = vmul.f32 0.2, %v3084_v21  ;;  %v3086_v26 = vadd.f32 %v3085_v6, %v2973_v33  ;;  %3389 = vmatprep.mubr.bf16.mxu0 %v3189_v28  ;;  %v3167_v23 = vmax.f32 %v3082_v13, %v3135_v50  ;;  %v3002_v33 = vpop.f32.mrf.mxu0 }
 0x2c8   :  { %v3089_v9 = vpop.f32.mrf.mxu1  ;;  %3390 = vmatmul.mubr.bf16.gmra.mxu0 %v3188_v17 }
 0x2c9   :  { %v3137_v29 = vmul.f32 0.2, %v3086_v26  ;;  %v3168_v32 = vmax.f32 %v3084_v21, %v3136_v30  ;;  %v3090_v38 = vadd.f32 %v3089_v9, %v2977_v44  ;;  %v3003_v9 = vadd.f32 %v3002_v33, %v5900_v58 }
 0x2ca   :  { %v3091_v35 = vpop.f32.mrf.mxu1 }
 0x2cb   :  { %v3169_v47 = vmax.f32 %v3086_v26, %v3137_v29  ;;  %v3092_v24 = vadd.f32 %v3091_v35, %v2979_v16  ;;  %v3190_v20 = vpack.c.bf16 %v3168_v32, %v3166_v5  ;;  %v3138_v27 = vmul.f32 0.2, %v3090_v38 }
 0x2cc   :  { %v3093_v45 = vpop.f32.mrf.mxu1 }
 0x2cd   :  { %v3094_v10 = vadd.f32 %v3093_v45, %v2981_v57  ;;  %v3191_v55 = vpack.c.bf16 %v3169_v47, %v3167_v23  ;;  %v3139_v40 = vmul.f32 0.2, %v3092_v24  ;;  %v3170_v34 = vmax.f32 %v3090_v38, %v3138_v27 }
 0x2ce   :  { %v3095_v43 = vpop.f32.mrf.mxu1 }
 0x2cf   :  { %v3140_v46 = vmul.f32 0.2, %v3094_v10  ;;  %v3096_v60 = vadd.f32 %v3095_v43, %v2983_v12  ;;  %3397 = vmatprep.mubr.bf16.mxu1 %v3191_v55  ;;  %v3171_v51 = vmax.f32 %v3092_v24, %v3139_v40  ;;  %v5970_v55 = vld [vmem:[%s5997_s6] ss:$0 sm:$0xff] }
 0x2d0   :  { %v3099_v22 = vpop.f32.mrf.mxu1  ;;  %3398 = vmatmul.mubr.bf16.vlgmr.msra.gmra.mxu1 %v3190_v20 }
 0x2d1   :  { %v3141_v1 = vmul.f32 0.2, %v3096_v60  ;;  %v3172_v4 = vmax.f32 %v3094_v10, %v3140_v46  ;;  %v3100_v37 = vadd.f32 %v3099_v22, %v2987_v0 }
 0x2d2   :  { %v3101_v11 = vpop.f32.mrf.mxu1 }
 0x2d3   :  { %v3173_v39 = vmax.f32 %v3096_v60, %v3141_v1  ;;  %v3102_v59 = vadd.f32 %v3101_v11, %v2989_v8  ;;  %v3192_v63 = vpack.c.bf16 %v3172_v4, %v3170_v34  ;;  %v3142_v41 = vmul.f32 0.2, %v3100_v37 }
 0x2d4   :  { %v3103_v52 = vpop.f32.mrf.mxu1 }
 0x2d5   :  { %v3104_v7 = vadd.f32 %v3103_v52, %v2991_v36  ;;  %v3193_v49 = vpack.c.bf16 %v3173_v39, %v3171_v51  ;;  %v3143_v3 = vmul.f32 0.2, %v3102_v59  ;;  %v3174_v30 = vmax.f32 %v3100_v37, %v3142_v41 }
 0x2d6   :  { %v3105_v54 = vpop.f32.mrf.mxu1 }
 0x2d7   :  { %v3144_v61 = vmul.f32 0.2, %v3104_v7  ;;  %v3106_v42 = vadd.f32 %v3105_v54, %v2993_v56  ;;  %3405 = vmatprep.mubr.bf16.mxu1 %v3193_v49  ;;  %v3175_v17 = vmax.f32 %v3102_v59, %v3143_v3 }
 0x2d8   :  { %v3109_v13 = vpop.f32.mrf.mxu1  ;;  %3406 = vmatmul.mubr.bf16.gmra.mxu1 %v3192_v63 }
 0x2d9   :  { %v3145_v48 = vmul.f32 0.2, %v3106_v42  ;;  %v3176_v21 = vmax.f32 %v3104_v7, %v3144_v61  ;;  %v3110_v26 = vadd.f32 %v3109_v13, %v2997_v2 }
 0x2da   :  { %v3111_v28 = vpop.f32.mrf.mxu1 }
 0x2db   :  { %v3177_v6 = vmax.f32 %v3106_v42, %v3145_v48  ;;  %v3112_v50 = vadd.f32 %v3111_v28, %v2999_v14  ;;  %v3194_v44 = vpack.c.bf16 %v3176_v21, %v3174_v30  ;;  %v3146_v23 = vmul.f32 0.2, %v3110_v26 }
 0x2dc   :  { %v3113_v25 = vpop.f32.mrf.mxu1 }
 0x2dd   :  { %v3114_v16 = vadd.f32 %v3113_v25, %v3001_v62  ;;  %v3195_v29 = vpack.c.bf16 %v3177_v6, %v3175_v17  ;;  %v3147_v32 = vmul.f32 0.2, %v3112_v50  ;;  %v3178_v38 = vmax.f32 %v3110_v26, %v3146_v23 }
 0x2de   :  { %v3115_v15 = vpop.f32.mrf.mxu1 }
 0x2df   :  { %v3148_v35 = vmul.f32 0.2, %v3114_v16  ;;  %v3116_v57 = vadd.f32 %v3115_v15, %v3003_v9  ;;  %3413 = vmatprep.mubr.bf16.mxu1 %v3195_v29  ;;  %v3179_v24 = vmax.f32 %v3112_v50, %v3147_v32 }
 0x2e0   :  { %3414 = vmatmul.mubr.bf16.gmra.mxu1 %v3194_v44 }
 0x2e1   :  { %v3149_v47 = vmul.f32 0.2, %v3116_v57  ;;  %v3180_v18 = vmax.f32 %v3114_v16, %v3148_v35 }
 0x2e3   :  { %v3181_v5 = vmax.f32 %v3116_v57, %v3149_v47  ;;  %v3196_v12 = vpack.c.bf16 %v3180_v18, %v3178_v38 }
 0x2e5   :  { %v3197_v45 = vpack.c.bf16 %v3181_v5, %v3179_v24 }
 0x2e7   :  { %3421 = vmatprep.mubr.bf16.mxu1 %v3197_v45 }
 0x2e8   :  { %3422 = vmatmul.mubr.bf16.gmra.mxu1 %v3196_v12 }
 0x370   :  { %v3777_v58 = vpop.f32.mrf.mxu0 }
 0x372   :  { %v3778_v10 = vpop.f32.mrf.mxu0 }
 0x373   :  { %v3779_v19 = vadd.f32 %v3778_v10, %v3777_v58 }
 0x374   :  { %v3780_v20 = vpop.f32.mrf.mxu0 }
 0x375   :  { %v3368_v43 = vadd.f32 %v3779_v19, %v5970_v55 }
 0x376   :  { %v3781_v40 = vpop.f32.mrf.mxu0 }
 0x377   :  { %v3782_v46 = vadd.f32 %v3781_v40, %v3780_v20  ;;  %3430 = vxpose.xlu0.b32.start [1/16] (narrow) %v3368_v43, 8 }
 0x378   :  { %v3783_v60 = vpop.f32.mrf.mxu0 }
 0x379   :  { %v3371_v27 = vadd.f32 %v3782_v46, %v5970_v55 }
 0x37a   :  { %v3784_v22 = vpop.f32.mrf.mxu0 }
 0x37b   :  { %3431 = vxpose.xlu0.b32.cont [2/16] (narrow) %v3371_v27, 8  ;;  %v3785_v8 = vadd.f32 %v3784_v22, %v3783_v60 }
 0x37c   :  { %v3786_v1 = vpop.f32.mrf.mxu0 }
 0x37d   :  { %v3376_v0 = vadd.f32 %v3785_v8, %v5970_v55 }
 0x37e   :  { %v3787_v53 = vpop.f32.mrf.mxu0 }
 0x37f   :  { %v3788_v4 = vadd.f32 %v3787_v53, %v3786_v1  ;;  %3432 = vxpose.xlu0.b32.cont [3/16] (narrow) %v3376_v0, 8 }
 0x380   :  { %v3789_v11 = vpop.f32.mrf.mxu0 }
 0x381   :  { %v3379_v36 = vadd.f32 %v3788_v4, %v5970_v55 }
 0x382   :  { %v3790_v51 = vpop.f32.mrf.mxu0 }
 0x383   :  { %v3791_v39 = vadd.f32 %v3790_v51, %v3789_v11  ;;  %3433 = vxpose.xlu0.b32.cont [4/16] (narrow) %v3379_v36, 8 }
 0x384   :  { %v3792_v59 = vpop.f32.mrf.mxu0 }
 0x385   :  { %v3384_v34 = vadd.f32 %v3791_v39, %v5970_v55 }
 0x386   :  { %v3793_v37 = vpop.f32.mrf.mxu0 }
 0x387   :  { %v3794_v52 = vadd.f32 %v3793_v37, %v3792_v59  ;;  %3434 = vxpose.xlu0.b32.cont [5/16] (narrow) %v3384_v34, 8 }
 0x388   :  { %v3795_v56 = vpop.f32.mrf.mxu0 }
 0x389   :  { %v3387_v7 = vadd.f32 %v3794_v52, %v5970_v55 }
 0x38a   :  { %v3796_v49 = vpop.f32.mrf.mxu0 }
 0x38b   :  { %v3797_v31 = vadd.f32 %v3796_v49, %v3795_v56  ;;  %3435 = vxpose.xlu0.b32.cont [6/16] (narrow) %v3387_v7, 8 }
 0x38c   :  { %v3798_v63 = vpop.f32.mrf.mxu0 }
 0x38d   :  { %v3392_v54 = vadd.f32 %v3797_v31, %v5970_v55 }
 0x38e   :  { %v3799_v3 = vpop.f32.mrf.mxu0 }
 0x38f   :  { %v3800_v61 = vadd.f32 %v3799_v3, %v3798_v63  ;;  %3436 = vxpose.xlu0.b32.cont [7/16] (narrow) %v3392_v54, 8 }
 0x390   :  { %v3801_v42 = vpop.f32.mrf.mxu1 }
 0x391   :  { %v3395_v41 = vadd.f32 %v3800_v61, %v5970_v55 }
 0x392   :  { %v3802_v13 = vpop.f32.mrf.mxu1 }
 0x393   :  { %v3803_v14 = vadd.f32 %v3802_v13, %v3801_v42  ;;  %3437 = vxpose.xlu0.b32.cont [8/16] (narrow) %v3395_v41, 8 }
 0x394   :  { %v3804_v48 = vpop.f32.mrf.mxu1 }
 0x395   :  { %v3400_v2 = vadd.f32 %v3803_v14, %v5970_v55 }
 0x396   :  { %v3805_v33 = vpop.f32.mrf.mxu1 }
 0x397   :  { %v3806_v21 = vadd.f32 %v3805_v33, %v3804_v48  ;;  %3438 = vxpose.xlu0.b32.cont [9/16] (narrow) %v3400_v2, 8 }
 0x398   :  { %v3807_v28 = vpop.f32.mrf.mxu1 }
 0x399   :  { %v3403_v62 = vadd.f32 %v3806_v21, %v5970_v55 }
 0x39a   :  { %v3808_v17 = vpop.f32.mrf.mxu1 }
 0x39b   :  { %v3809_v6 = vadd.f32 %v3808_v17, %v3807_v28  ;;  %3439 = vxpose.xlu0.b32.cont [10/16] (narrow) %v3403_v62, 8 }
 0x39c   :  { %v3810_v50 = vpop.f32.mrf.mxu1 }
 0x39d   :  { %v3408_v30 = vadd.f32 %v3809_v6, %v5970_v55 }
 0x39e   :  { %v3811_v26 = vpop.f32.mrf.mxu1 }
 0x39f   :  { %v3812_v25 = vadd.f32 %v3811_v26, %v3810_v50  ;;  %3440 = vxpose.xlu0.b32.cont [11/16] (narrow) %v3408_v30, 8 }
 0x3a0   :  { %v3813_v9 = vpop.f32.mrf.mxu1 }
 0x3a1   :  { %v3411_v16 = vadd.f32 %v3812_v25, %v5970_v55 }
 0x3a2   :  { %v3814_v29 = vpop.f32.mrf.mxu1 }
 0x3a3   :  { %v3815_v44 = vadd.f32 %v3814_v29, %v3813_v9  ;;  %3441 = vxpose.xlu0.b32.cont [12/16] (narrow) %v3411_v16, 8 }
 0x3a4   :  { %v3816_v15 = vpop.f32.mrf.mxu1 }
 0x3a5   :  { %v3416_v32 = vadd.f32 %v3815_v44, %v5970_v55 }
 0x3a6   :  { %v3817_v35 = vpop.f32.mrf.mxu1 }
 0x3a7   :  { %v3818_v57 = vadd.f32 %v3817_v35, %v3816_v15  ;;  %3442 = vxpose.xlu0.b32.cont [13/16] (narrow) %v3416_v32, 8 }
 0x3a8   :  { %v3819_v23 = vpop.f32.mrf.mxu1 }
 0x3a9   :  { %v3419_v47 = vadd.f32 %v3818_v57, %v5970_v55 }
 0x3aa   :  { %v3820_v18 = vpop.f32.mrf.mxu1 }
 0x3ab   :  { %v3821_v24 = vadd.f32 %v3820_v18, %v3819_v23  ;;  %3443 = vxpose.xlu0.b32.cont [14/16] (narrow) %v3419_v47, 8 }
 0x3ac   :  { %v3822_v5 = vpop.f32.mrf.mxu1 }
 0x3ad   :  { %v3424_v38 = vadd.f32 %v3821_v24, %v5970_v55 }
 0x3ae   :  { %v3823_v45 = vpop.f32.mrf.mxu1 }
 0x3af   :  { %v3824_v12 = vadd.f32 %v3823_v45, %v3822_v5  ;;  %3444 = vxpose.xlu0.b32.cont [15/16] (narrow) %v3424_v38, 8 }
 0x3b1   :  { %v3427_v58 = vadd.f32 %v3824_v12, %v5970_v55 }
 0x3b3   :  { %3445 = vxpose.xlu0.b32.end [16/16] (narrow) %v3427_v58, 8 }
 0x3f3   :  { %v3446_v10 = vpop.trf.xlu0 }
 0x3f4   :  { %3462 = vst [vmem:[%s5998_s7] sm:$0x1] %v3446_v10 }
 0x3f5   :  { %3467 = vsyncpa [#allocation3], 1 }

</bundles_post_ra>
